<compile_context>
chip_gen: v7x
topology: tpu7x:2x2x1
jax: 0.10.0
libtpu: 0.0.40
codegen_flags: <defaults>
</compile_context>

<pallas_src>
import functools
import math

import jax
import jax.numpy as jnp
from jax import lax
from jax.experimental import pallas as pl
from jax.experimental.pallas import tpu as pltpu

# ----------------------------- config (small) --------------------------------
VOCAB = 50
VOCAB_PAD = 128         # lane-dense padded vocab for the output projection
MAX_LEN = 16
EMBED_DIM = 64          # decoder_dim == embed_dim == encoder dim (384 in the real model)
N_HEADS = 4
FF_DIM = 128
N_DEC_LAYERS = 2

IMG_SIZE = 32           # (224 in the real model)
PATCH = 16
IN_CH = 3
ENC_DIM = EMBED_DIM
ENC_FF = 4 * ENC_DIM
N_ENC_LAYERS = 2

BATCH = 2
SEQ = 8
NEG_INF = -1e9

_PARALLEL = pltpu.CompilerParams(dimension_semantics=("parallel",))


# --------------------------- in-kernel helpers --------------------------------
def _layernorm(x, g, b, eps):
    mean = jnp.mean(x, axis=-1, keepdims=True)
    var = jnp.mean((x - mean) ** 2, axis=-1, keepdims=True)
    return (x - mean) * lax.rsqrt(var + eps) * g + b


def _gelu(x):
    # TODO(synk): tanh-approx GELU stands in for timm's exact erf-GELU.
    c = math.sqrt(2.0 / math.pi)
    return 0.5 * x * (1.0 + jnp.tanh(c * (x + 0.044715 * x * x * x)))


def _mha(q, k, v, wo, bo, *, n_heads, causal):
    """All heads of one batch element, fully in-registers/VMEM.

    q: (Tq, D), k/v: (Tk, D), wo: (D, D), bo: (1, D).
    Per-head lane slices are static; the output projection is accumulated per head
    (concat_h(o_h) @ wo == sum_h o_h @ wo[h]) so no lane concat and the result is
    lane-dense (width D).
    """
    tq, d = q.shape
    tk = k.shape[0]
    dh = d // n_heads
    scale = 1.0 / math.sqrt(dh)

    mask = None
    if causal:
        row = lax.broadcasted_iota(jnp.int32, (tq, tk), 0)
        col = lax.broadcasted_iota(jnp.int32, (tq, tk), 1)
        mask = jnp.where(row >= col, 0.0, NEG_INF).astype(jnp.float32)

    acc = None
    for h in range(n_heads):                      # static unroll (n_heads is a constant)
        lo, hi = h * dh, (h + 1) * dh
        s = lax.dot_general(q[:, lo:hi], k[:, lo:hi], (((1,), (1,)), ((), ())),
                            preferred_element_type=jnp.float32) * scale
        if mask is not None:
            s = s + mask
        m = jnp.max(s, axis=-1, keepdims=True)
        p = jnp.exp(s - m)
        p = p * pl.reciprocal(jnp.sum(p, axis=-1, keepdims=True), approx=True)
        o_h = jnp.dot(p, v[:, lo:hi], preferred_element_type=jnp.float32)
        term = jnp.dot(o_h, wo[lo:hi, :], preferred_element_type=jnp.float32)
        acc = term if acc is None else acc + term
    return acc + bo


# ------------------------------ Pallas kernels --------------------------------
def _patch_embed_kernel(p_ref, w_ref, adj_ref, o_ref):
    # p_ref: (1, T, Cpp) with row 0 zero-padded (cls slot); adj folds cls/pos/patch bias.
    x = jnp.dot(p_ref[0].astype(jnp.float32), w_ref[...],
                preferred_element_type=jnp.float32)
    o_ref[0] = (x + adj_ref[...]).astype(o_ref.dtype)


def _encoder_block_kernel(x_ref, ln1g_ref, ln1b_ref, wqkv_ref, bqkv_ref, wo_ref, bo_ref,
                          ln2g_ref, ln2b_ref, fc1w_ref, fc1b_ref, fc2w_ref, fc2b_ref,
                          o_ref, *, n_heads, eps):
    # Pre-norm ViT block: x += attn(ln1(x)); x += mlp(ln2(x))
    x = x_ref[0].astype(jnp.float32)                       # (T, D)
    d = x.shape[-1]

    h = _layernorm(x, ln1g_ref[...], ln1b_ref[...], eps)
    qkv = jnp.dot(h, wqkv_ref[...], preferred_element_type=jnp.float32) + bqkv_ref[...]
    q, k, v = qkv[:, :d], qkv[:, d:2 * d], qkv[:, 2 * d:]
    x = x + _mha(q, k, v, wo_ref[...], bo_ref[...], n_heads=n_heads, causal=False)

    h = _layernorm(x, ln2g_ref[...], ln2b_ref[...], eps)
    h = _gelu(jnp.dot(h, fc1w_ref[...], preferred_element_type=jnp.float32) + fc1b_ref[...])
    h = jnp.dot(h, fc2w_ref[...], preferred_element_type=jnp.float32) + fc2b_ref[...]
    o_ref[0] = (x + h).astype(o_ref.dtype)


def _layernorm_kernel(x_ref, g_ref, b_ref, o_ref, *, eps):
    o_ref[0] = _layernorm(x_ref[0].astype(jnp.float32),
                          g_ref[...], b_ref[...], eps).astype(o_ref.dtype)


def _decoder_layer_kernel(x_ref, mem_ref,
                          sa_wqkv_ref, sa_bqkv_ref, sa_wo_ref, sa_bo_ref,
                          ca_wq_ref, ca_bq_ref, ca_wkv_ref, ca_bkv_ref, ca_wo_ref, ca_bo_ref,
                          ln1g_ref, ln1b_ref, ln2g_ref, ln2b_ref, ln3g_ref, ln3b_ref,
                          fc1w_ref, fc1b_ref, fc2w_ref, fc2b_ref,
                          o_ref, *, n_heads, eps):
    # Post-norm nn.TransformerDecoderLayer (ReLU FFN, causal self-attn).
    x = x_ref[0].astype(jnp.float32)                       # (S, D)
    mem = mem_ref[0].astype(jnp.float32)                   # (T, D)
    d = x.shape[-1]

    # causal self-attention
    qkv = jnp.dot(x, sa_wqkv_ref[...], preferred_element_type=jnp.float32) + sa_bqkv_ref[...]
    q, k, v = qkv[:, :d], qkv[:, d:2 * d], qkv[:, 2 * d:]
    sa = _mha(q, k, v, sa_wo_ref[...], sa_bo_ref[...], n_heads=n_heads, causal=True)
    x = _layernorm(x + sa, ln1g_ref[...], ln1b_ref[...], eps)

    # cross-attention over encoder memory (no mask)
    q = jnp.dot(x, ca_wq_ref[...], preferred_element_type=jnp.float32) + ca_bq_ref[...]
    kv = jnp.dot(mem, ca_wkv_ref[...], preferred_element_type=jnp.float32) + ca_bkv_ref[...]
    k, v = kv[:, :d], kv[:, d:]
    ca = _mha(q, k, v, ca_wo_ref[...], ca_bo_ref[...], n_heads=n_heads, causal=False)
    x = _layernorm(x + ca, ln2g_ref[...], ln2b_ref[...], eps)

    # ReLU FFN (fused, hidden never leaves the kernel)
    h = jnp.maximum(jnp.dot(x, fc1w_ref[...], preferred_element_type=jnp.float32)
                    + fc1b_ref[...], 0.0)
    h = jnp.dot(h, fc2w_ref[...], preferred_element_type=jnp.float32) + fc2b_ref[...]
    o_ref[0] = _layernorm(x + h, ln3g_ref[...], ln3b_ref[...], eps).astype(o_ref.dtype)


def _out_proj_kernel(x_ref, w_ref, b_ref, o_ref):
    x = x_ref[0].astype(jnp.float32)
    o_ref[0] = (jnp.dot(x, w_ref[...], preferred_element_type=jnp.float32)
                + b_ref[...]).astype(o_ref.dtype)


# ------------------------------ call wrappers --------------------------------
def _full_spec(arr):
    nd = arr.ndim
    return pl.BlockSpec(tuple(arr.shape), lambda b, _nd=nd: (0,) * _nd)


def _batch_spec(shape):
    nd = len(shape)
    return pl.BlockSpec((1,) + tuple(shape[1:]), lambda b, _nd=nd: (b,) + (0,) * (_nd - 1))


def patch_embed(patches_padded, enc):
    B, T, _ = patches_padded.shape
    weights = (enc["patch_w"], enc["tok_adj"])
    return pl.pallas_call(
        _patch_embed_kernel,
        out_shape=jax.ShapeDtypeStruct((B, T, ENC_DIM), jnp.float32),
        grid=(B,),
        in_specs=[_batch_spec(patches_padded.shape)] + [_full_spec(w) for w in weights],
        out_specs=_batch_spec((B, T, ENC_DIM)),
        compiler_params=_PARALLEL,
    )(patches_padded, *weights)


def encoder_block(x, blk):
    names = ("ln1_g", "ln1_b", "wqkv", "bqkv", "wo", "bo",
             "ln2_g", "ln2_b", "fc1_w", "fc1_b", "fc2_w", "fc2_b")
    weights = tuple(blk[n] for n in names)
    B = x.shape[0]
    return pl.pallas_call(
        functools.partial(_encoder_block_kernel, n_heads=N_HEADS, eps=1e-6),
        out_shape=jax.ShapeDtypeStruct(x.shape, jnp.float32),
        grid=(B,),
        in_specs=[_batch_spec(x.shape)] + [_full_spec(w) for w in weights],
        out_specs=_batch_spec(x.shape),
        compiler_params=_PARALLEL,
    )(x, *weights)


def encoder_final_norm(x, g, b):
    B = x.shape[0]
    return pl.pallas_call(
        functools.partial(_layernorm_kernel, eps=1e-6),
        out_shape=jax.ShapeDtypeStruct(x.shape, jnp.float32),
        grid=(B,),
        in_specs=[_batch_spec(x.shape), _full_spec(g), _full_spec(b)],
        out_specs=_batch_spec(x.shape),
        compiler_params=_PARALLEL,
    )(x, g, b)


def decoder_layer(x, memory, lyr):
    names = ("sa_wqkv", "sa_bqkv", "sa_wo", "sa_bo",
             "ca_wq", "ca_bq", "ca_wkv", "ca_bkv", "ca_wo", "ca_bo",
             "ln1_g", "ln1_b", "ln2_g", "ln2_b", "ln3_g", "ln3_b",
             "fc1_w", "fc1_b", "fc2_w", "fc2_b")
    weights = tuple(lyr[n] for n in names)
    B = x.shape[0]
    return pl.pallas_call(
        functools.partial(_decoder_layer_kernel, n_heads=N_HEADS, eps=1e-5),
        out_shape=jax.ShapeDtypeStruct(x.shape, jnp.float32),
        grid=(B,),
        in_specs=[_batch_spec(x.shape), _batch_spec(memory.shape)]
                 + [_full_spec(w) for w in weights],
        out_specs=_batch_spec(x.shape),
        compiler_params=_PARALLEL,
    )(x, memory, *weights)


def output_projection(x, w, b):
    B, S, _ = x.shape
    V = w.shape[1]
    return pl.pallas_call(
        _out_proj_kernel,
        out_shape=jax.ShapeDtypeStruct((B, S, V), jnp.float32),
        grid=(B,),
        in_specs=[_batch_spec(x.shape), _full_spec(w), _full_spec(b)],
        out_specs=_batch_spec((B, S, V)),
        compiler_params=_PARALLEL,
    )(x, w, b)


# ------------------------------ model forward --------------------------------
def vit_encoder(enc, images):
    # patch extraction (16x16 stride-16 conv == flatten + matmul) in JAX glue
    B = images.shape[0]
    g = IMG_SIZE // PATCH
    patches = images.reshape(B, IN_CH, g, PATCH, g, PATCH)
    patches = patches.transpose(0, 2, 4, 1, 3, 5).reshape(B, g * g, IN_CH * PATCH * PATCH)
    # zero row at the front = cls slot; cls/pos/bias are folded into enc["tok_adj"]
    patches = jnp.pad(patches, ((0, 0), (1, 0), (0, 0)))
    x = patch_embed(patches, enc)                           # [B, Np+1, D]
    for blk in enc["blocks"]:
        x = encoder_block(x, blk)
    return encoder_final_norm(x, enc["norm_g"], enc["norm_b"])


def image_captioning_forward(params, images, captions):
    B, S = captions.shape
    memory = vit_encoder(params["encoder"], images)                     # [B, T, D]
    tok = jnp.take(params["token_embedding"], captions, axis=0)         # [B, S, D]
    pos = params["position_embedding"][:S][None, :, :]                  # [1, S, D]
    x = (tok + pos).astype(jnp.float32)
    for lyr in params["decoder"]["layers"]:
        x = decoder_layer(x, memory, lyr)
    logits = output_projection(x, params["out_w"], params["out_b"])     # [B, S, VOCAB_PAD]
    return logits[..., :VOCAB]


# ------------------------------ parameter init --------------------------------
def init_params(key):
    keys = iter(jax.random.split(key, 256))
    nk = lambda: next(keys)
    dense = lambda din, dout: 0.02 * jax.random.normal(nk(), (din, dout), jnp.float32)
    bias = lambda d: jnp.zeros((1, d), jnp.float32)
    ln = lambda d: (jnp.ones((1, d), jnp.float32), jnp.zeros((1, d), jnp.float32))

    num_patches = (IMG_SIZE // PATCH) ** 2

    enc_blocks = []
    for _ in range(N_ENC_LAYERS):
        g1, b1 = ln(ENC_DIM)
        g2, b2 = ln(ENC_DIM)
        enc_blocks.append(dict(
            ln1_g=g1, ln1_b=b1,
            wqkv=dense(ENC_DIM, 3 * ENC_DIM), bqkv=bias(3 * ENC_DIM),
            wo=dense(ENC_DIM, ENC_DIM), bo=bias(ENC_DIM),
            ln2_g=g2, ln2_b=b2,
            fc1_w=dense(ENC_DIM, ENC_FF), fc1_b=bias(ENC_FF),
            fc2_w=dense(ENC_FF, ENC_DIM), fc2_b=bias(ENC_DIM)))
    ng, nb = ln(ENC_DIM)

    patch_w = dense(IN_CH * PATCH * PATCH, ENC_DIM)
    patch_b = bias(ENC_DIM)
    cls = 0.02 * jax.random.normal(nk(), (1, ENC_DIM), jnp.float32)
    pos = 0.02 * jax.random.normal(nk(), (num_patches + 1, ENC_DIM), jnp.float32)
    # tok_adj row0 = cls + pos[0]; rows i>=1 = patch_b + pos[i]  (cls slot enters matmul as 0)
    tok_adj = jnp.concatenate([cls + pos[0:1], patch_b + pos[1:]], axis=0)

    encoder = dict(patch_w=patch_w, tok_adj=tok_adj,
                   blocks=enc_blocks, norm_g=ng, norm_b=nb)

    dec_layers = []
    for _ in range(N_DEC_LAYERS):
        g1, b1 = ln(EMBED_DIM)
        g2, b2 = ln(EMBED_DIM)
        g3, b3 = ln(EMBED_DIM)
        dec_layers.append(dict(
            sa_wqkv=dense(EMBED_DIM, 3 * EMBED_DIM), sa_bqkv=bias(3 * EMBED_DIM),
            sa_wo=dense(EMBED_DIM, EMBED_DIM), sa_bo=bias(EMBED_DIM),
            ca_wq=dense(EMBED_DIM, EMBED_DIM), ca_bq=bias(EMBED_DIM),
            ca_wkv=dense(EMBED_DIM, 2 * EMBED_DIM), ca_bkv=bias(2 * EMBED_DIM),
            ca_wo=dense(EMBED_DIM, EMBED_DIM), ca_bo=bias(EMBED_DIM),
            ln1_g=g1, ln1_b=b1, ln2_g=g2, ln2_b=b2, ln3_g=g3, ln3_b=b3,
            fc1_w=dense(EMBED_DIM, FF_DIM), fc1_b=bias(FF_DIM),
            fc2_w=dense(FF_DIM, EMBED_DIM), fc2_b=bias(EMBED_DIM)))
    decoder = dict(layers=dec_layers)

    # output projection padded to 128 lanes (pad columns are zero and sliced off)
    out_w = jnp.zeros((EMBED_DIM, VOCAB_PAD), jnp.float32)
    out_w = out_w.at[:, :VOCAB].set(dense(EMBED_DIM, VOCAB))
    out_b = jnp.zeros((1, VOCAB_PAD), jnp.float32)

    return dict(encoder=encoder, decoder=decoder,
                token_embedding=0.02 * jax.random.normal(nk(), (VOCAB, EMBED_DIM), jnp.float32),
                position_embedding=0.02 * jax.random.normal(nk(), (MAX_LEN, EMBED_DIM), jnp.float32),
                out_w=out_w, out_b=out_b)


# ------------------------------ main --------------------------------
if __name__ == "__main__":
    key = jax.random.PRNGKey(0)
    pkey, ikey, ckey = jax.random.split(key, 3)
    params = init_params(pkey)
    images = jax.random.normal(ikey, (BATCH, IN_CH, IMG_SIZE, IMG_SIZE), jnp.float32)
    captions = jax.random.randint(ckey, (BATCH, SEQ), 0, VOCAB, dtype=jnp.int32)

    fwd = jax.jit(image_captioning_forward)
    logits = fwd(params, images, captions)
    jax.block_until_ready(logits)
    assert logits.shape == (BATCH, SEQ, VOCAB)
    assert bool(jnp.all(jnp.isfinite(logits)))
    print("KERNEL_OK")
</pallas_src>

<mosaic_0001>
module attributes {stable_mosaic.version = 11 : i64} {
  func.func @_patch_embed_kernel(%arg0: i32, %arg1: memref<1x5x768xf32, #tpu.memory_space<vmem>>, %arg2: memref<768x64xf32, #tpu.memory_space<vmem>>, %arg3: memref<5x64xf32, #tpu.memory_space<vmem>>, %arg4: memref<1x5x64xf32, #tpu.memory_space<vmem>>) attributes {dimension_semantics = [#tpu.dimension_semantics<parallel>], iteration_bounds = array<i64: 2>, scalar_prefetch = 0 : i64, scratch_operands = 0 : i64, tpu.core_type = #tpu.core_type<tc>, window_params = [{transform_indices = @transform_0, window_bounds = array<i64: 1, 5, 768>}, {pipeline_mode = #tpu.pipeline_mode<synchronous>, transform_indices = @transform_1, window_bounds = array<i64: 768, 64>}, {pipeline_mode = #tpu.pipeline_mode<synchronous>, transform_indices = @transform_2, window_bounds = array<i64: 5, 64>}, {transform_indices = @transform_3, window_bounds = array<i64: 1, 5, 64>}]} {
    %c0 = arith.constant 0 : index
    %c0_0 = arith.constant 0 : index
    %c0_1 = arith.constant 0 : index
    %0 = vector.load %arg1[%c0, %c0_0, %c0_1] : memref<1x5x768xf32, #tpu.memory_space<vmem>>, vector<1x5x768xf32>
    %1 = vector.shape_cast %0 : vector<1x5x768xf32> to vector<5x768xf32>
    %c0_2 = arith.constant 0 : index
    %c0_3 = arith.constant 0 : index
    %2 = vector.load %arg2[%c0_2, %c0_3] : memref<768x64xf32, #tpu.memory_space<vmem>>, vector<768x64xf32>
    %cst = arith.constant dense<0.000000e+00> : vector<5x64xf32>
    %3 = tpu.matmul %1, %2, %cst {dimension_numbers = #tpu.dot_dimension_numbers<[1], [0], [0], [1], [0, 0, 1, 1], [], []>} : vector<5x768xf32>, vector<768x64xf32>, vector<5x64xf32> -> vector<5x64xf32>
    %c0_4 = arith.constant 0 : index
    %c0_5 = arith.constant 0 : index
    %4 = vector.load %arg3[%c0_4, %c0_5] : memref<5x64xf32, #tpu.memory_space<vmem>>, vector<5x64xf32>
    %5 = arith.addf %3, %4 : vector<5x64xf32>
    %c0_6 = arith.constant 0 : index
    %c0_7 = arith.constant 0 : index
    %c0_8 = arith.constant 0 : index
    %6 = vector.load %arg4[%c0_6, %c0_7, %c0_8] : memref<1x5x64xf32, #tpu.memory_space<vmem>>, vector<1x5x64xf32>
    %7 = vector.shape_cast %6 : vector<1x5x64xf32> to vector<5x64xf32>
    %8 = vector.shape_cast %5 : vector<5x64xf32> to vector<1x5x64xf32>
    tpu.vector_store %arg4[%c0_6, %c0_7, %c0_8], %8 {strides = array<i32>} : memref<1x5x64xf32, #tpu.memory_space<vmem>>, vector<1x5x64xf32>,
    return
  }
  func.func @transform_0(%arg0: i32) -> (i32, i32, i32) {
    %c0_i32 = arith.constant 0 : i32
    %c0_i32_0 = arith.constant 0 : i32
    %c0_i32_1 = arith.constant 0 : i32
    return %arg0, %c0_i32, %c0_i32_0 : i32, i32, i32
  }
  func.func @transform_1(%arg0: i32) -> (i32, i32) {
    %c0_i32 = arith.constant 0 : i32
    %c0_i32_0 = arith.constant 0 : i32
    %c0_i32_1 = arith.constant 0 : i32
    return %c0_i32, %c0_i32_0 : i32, i32
  }
  func.func @transform_2(%arg0: i32) -> (i32, i32) {
    %c0_i32 = arith.constant 0 : i32
    %c0_i32_0 = arith.constant 0 : i32
    %c0_i32_1 = arith.constant 0 : i32
    return %c0_i32, %c0_i32_0 : i32, i32
  }
  func.func @transform_3(%arg0: i32) -> (i32, i32, i32) {
    %c0_i32 = arith.constant 0 : i32
    %c0_i32_0 = arith.constant 0 : i32
    %c0_i32_1 = arith.constant 0 : i32
    return %arg0, %c0_i32, %c0_i32_0 : i32, i32, i32
  }
}

module attributes {stable_mosaic.version = 11 : i64} {
  func.func @_layernorm_kernel(%arg0: i32, %arg1: memref<1x5x64xf32, #tpu.memory_space<vmem>>, %arg2: memref<1x64xf32, #tpu.memory_space<vmem>>, %arg3: memref<1x64xf32, #tpu.memory_space<vmem>>, %arg4: memref<1x5x64xf32, #tpu.memory_space<vmem>>) attributes {dimension_semantics = [#tpu.dimension_semantics<parallel>], iteration_bounds = array<i64: 2>, scalar_prefetch = 0 : i64, scratch_operands = 0 : i64, tpu.core_type = #tpu.core_type<tc>, window_params = [{transform_indices = @transform_0, window_bounds = array<i64: 1, 5, 64>}, {pipeline_mode = #tpu.pipeline_mode<synchronous>, transform_indices = @transform_1, window_bounds = array<i64: 1, 64>}, {pipeline_mode = #tpu.pipeline_mode<synchronous>, transform_indices = @transform_2, window_bounds = array<i64: 1, 64>}, {transform_indices = @transform_3, window_bounds = array<i64: 1, 5, 64>}]} {
    %c0 = arith.constant 0 : index
    %c0_0 = arith.constant 0 : index
    %c0_1 = arith.constant 0 : index
    %0 = vector.load %arg1[%c0, %c0_0, %c0_1] : memref<1x5x64xf32, #tpu.memory_space<vmem>>, vector<1x5x64xf32>
    %1 = vector.shape_cast %0 : vector<1x5x64xf32> to vector<5x64xf32>
    %c0_2 = arith.constant 0 : index
    %c0_3 = arith.constant 0 : index
    %2 = vector.load %arg2[%c0_2, %c0_3] : memref<1x64xf32, #tpu.memory_space<vmem>>, vector<1x64xf32>
    %c0_4 = arith.constant 0 : index
    %c0_5 = arith.constant 0 : index
    %3 = vector.load %arg3[%c0_4, %c0_5] : memref<1x64xf32, #tpu.memory_space<vmem>>, vector<1x64xf32>
    %cst = arith.constant dense<0.000000e+00> : vector<5xf32>
    %4 = vector.multi_reduction <add>, %1, %cst [1] : vector<5x64xf32> to vector<5xf32>
    %5 = vector.shape_cast %4 : vector<5xf32> to vector<5x1xf32>
    %cst_6 = arith.constant 6.400000e+01 : f32
    %6 = vector.broadcast %cst_6 : f32 to vector<5x1xf32>
    %7 = arith.divf %5, %6 : vector<5x1xf32>
    %8 = vector.broadcast %7 : vector<5x1xf32> to vector<5x64xf32>
    %9 = arith.subf %1, %8 : vector<5x64xf32>
    %10 = arith.mulf %9, %9 : vector<5x64xf32>
    %cst_7 = arith.constant dense<0.000000e+00> : vector<5xf32>
    %11 = vector.multi_reduction <add>, %10, %cst_7 [1] : vector<5x64xf32> to vector<5xf32>
    %12 = vector.shape_cast %11 : vector<5xf32> to vector<5x1xf32>
    %cst_8 = arith.constant 6.400000e+01 : f32
    %13 = vector.broadcast %cst_8 : f32 to vector<5x1xf32>
    %14 = arith.divf %12, %13 : vector<5x1xf32>
    %15 = vector.broadcast %7 : vector<5x1xf32> to vector<5x64xf32>
    %16 = arith.subf %1, %15 : vector<5x64xf32>
    %cst_9 = arith.constant 9.99999997E-7 : f32
    %17 = vector.broadcast %cst_9 : f32 to vector<5x1xf32>
    %18 = arith.addf %14, %17 : vector<5x1xf32>
    %19 = math.rsqrt %18 : vector<5x1xf32>
    %20 = vector.broadcast %19 : vector<5x1xf32> to vector<5x64xf32>
    %21 = arith.mulf %16, %20 : vector<5x64xf32>
    %22 = vector.broadcast %2 : vector<1x64xf32> to vector<5x64xf32>
    %23 = arith.mulf %21, %22 : vector<5x64xf32>
    %24 = vector.broadcast %3 : vector<1x64xf32> to vector<5x64xf32>
    %25 = arith.addf %23, %24 : vector<5x64xf32>
    %c0_10 = arith.constant 0 : index
    %c0_11 = arith.constant 0 : index
    %c0_12 = arith.constant 0 : index
    %26 = vector.load %arg4[%c0_10, %c0_11, %c0_12] : memref<1x5x64xf32, #tpu.memory_space<vmem>>, vector<1x5x64xf32>
    %27 = vector.shape_cast %26 : vector<1x5x64xf32> to vector<5x64xf32>
    %28 = vector.shape_cast %25 : vector<5x64xf32> to vector<1x5x64xf32>
    tpu.vector_store %arg4[%c0_10, %c0_11, %c0_12], %28 {strides = array<i32>} : memref<1x5x64xf32, #tpu.memory_space<vmem>>, vector<1x5x64xf32>,
    return
  }
  func.func @transform_0(%arg0: i32) -> (i32, i32, i32) {
    %c0_i32 = arith.constant 0 : i32
    %c0_i32_0 = arith.constant 0 : i32
    %c0_i32_1 = arith.constant 0 : i32
    return %arg0, %c0_i32, %c0_i32_0 : i32, i32, i32
  }
  func.func @transform_1(%arg0: i32) -> (i32, i32) {
    %c0_i32 = arith.constant 0 : i32
    %c0_i32_0 = arith.constant 0 : i32
    %c0_i32_1 = arith.constant 0 : i32
    return %c0_i32, %c0_i32_0 : i32, i32
  }
  func.func @transform_2(%arg0: i32) -> (i32, i32) {
    %c0_i32 = arith.constant 0 : i32
    %c0_i32_0 = arith.constant 0 : i32
    %c0_i32_1 = arith.constant 0 : i32
    return %c0_i32, %c0_i32_0 : i32, i32
  }
  func.func @transform_3(%arg0: i32) -> (i32, i32, i32) {
    %c0_i32 = arith.constant 0 : i32
    %c0_i32_0 = arith.constant 0 : i32
    %c0_i32_1 = arith.constant 0 : i32
    return %arg0, %c0_i32, %c0_i32_0 : i32, i32, i32
  }
}

module attributes {stable_mosaic.version = 11 : i64} {
  func.func @_encoder_block_kernel(%arg0: i32, %arg1: memref<1x5x64xf32, #tpu.memory_space<vmem>>, %arg2: memref<1x64xf32, #tpu.memory_space<vmem>>, %arg3: memref<1x64xf32, #tpu.memory_space<vmem>>, %arg4: memref<64x192xf32, #tpu.memory_space<vmem>>, %arg5: memref<1x192xf32, #tpu.memory_space<vmem>>, %arg6: memref<64x64xf32, #tpu.memory_space<vmem>>, %arg7: memref<1x64xf32, #tpu.memory_space<vmem>>, %arg8: memref<1x64xf32, #tpu.memory_space<vmem>>, %arg9: memref<1x64xf32, #tpu.memory_space<vmem>>, %arg10: memref<64x256xf32, #tpu.memory_space<vmem>>, %arg11: memref<1x256xf32, #tpu.memory_space<vmem>>, %arg12: memref<256x64xf32, #tpu.memory_space<vmem>>, %arg13: memref<1x64xf32, #tpu.memory_space<vmem>>, %arg14: memref<1x5x64xf32, #tpu.memory_space<vmem>>) attributes {dimension_semantics = [#tpu.dimension_semantics<parallel>], iteration_bounds = array<i64: 2>, scalar_prefetch = 0 : i64, scratch_operands = 0 : i64, tpu.core_type = #tpu.core_type<tc>, window_params = [{transform_indices = @transform_0, window_bounds = array<i64: 1, 5, 64>}, {pipeline_mode = #tpu.pipeline_mode<synchronous>, transform_indices = @transform_1, window_bounds = array<i64: 1, 64>}, {pipeline_mode = #tpu.pipeline_mode<synchronous>, transform_indices = @transform_2, window_bounds = array<i64: 1, 64>}, {pipeline_mode = #tpu.pipeline_mode<synchronous>, transform_indices = @transform_3, window_bounds = array<i64: 64, 192>}, {pipeline_mode = #tpu.pipeline_mode<synchronous>, transform_indices = @transform_4, window_bounds = array<i64: 1, 192>}, {pipeline_mode = #tpu.pipeline_mode<synchronous>, transform_indices = @transform_5, window_bounds = array<i64: 64, 64>}, {pipeline_mode = #tpu.pipeline_mode<synchronous>, transform_indices = @transform_6, window_bounds = array<i64: 1, 64>}, {pipeline_mode = #tpu.pipeline_mode<synchronous>, transform_indices = @transform_7, window_bounds = array<i64: 1, 64>}, {pipeline_mode = #tpu.pipeline_mode<synchronous>, transform_indices = @transform_8, window_bounds = array<i64: 1, 64>}, {pipeline_mode = #tpu.pipeline_mode<synchronous>, transform_indices = @transform_9, window_bounds = array<i64: 64, 256>}, {pipeline_mode = #tpu.pipeline_mode<synchronous>, transform_indices = @transform_10, window_bounds = array<i64: 1, 256>}, {pipeline_mode = #tpu.pipeline_mode<synchronous>, transform_indices = @transform_11, window_bounds = array<i64: 256, 64>}, {pipeline_mode = #tpu.pipeline_mode<synchronous>, transform_indices = @transform_12, window_bounds = array<i64: 1, 64>}, {transform_indices = @transform_13, window_bounds = array<i64: 1, 5, 64>}]} {
    %c0 = arith.constant 0 : index
    %c0_0 = arith.constant 0 : index
    %c0_1 = arith.constant 0 : index
    %0 = vector.load %arg1[%c0, %c0_0, %c0_1] : memref<1x5x64xf32, #tpu.memory_space<vmem>>, vector<1x5x64xf32>
    %1 = vector.shape_cast %0 : vector<1x5x64xf32> to vector<5x64xf32>
    %c0_2 = arith.constant 0 : index
    %c0_3 = arith.constant 0 : index
    %2 = vector.load %arg2[%c0_2, %c0_3] : memref<1x64xf32, #tpu.memory_space<vmem>>, vector<1x64xf32>
    %c0_4 = arith.constant 0 : index
    %c0_5 = arith.constant 0 : index
    %3 = vector.load %arg3[%c0_4, %c0_5] : memref<1x64xf32, #tpu.memory_space<vmem>>, vector<1x64xf32>
    %cst = arith.constant dense<0.000000e+00> : vector<5xf32>
    %4 = vector.multi_reduction <add>, %1, %cst [1] : vector<5x64xf32> to vector<5xf32>
    %5 = vector.shape_cast %4 : vector<5xf32> to vector<5x1xf32>
    %cst_6 = arith.constant 6.400000e+01 : f32
    %6 = vector.broadcast %cst_6 : f32 to vector<5x1xf32>
    %7 = arith.divf %5, %6 : vector<5x1xf32>
    %8 = vector.broadcast %7 : vector<5x1xf32> to vector<5x64xf32>
    %9 = arith.subf %1, %8 : vector<5x64xf32>
    %10 = arith.mulf %9, %9 : vector<5x64xf32>
    %cst_7 = arith.constant dense<0.000000e+00> : vector<5xf32>
    %11 = vector.multi_reduction <add>, %10, %cst_7 [1] : vector<5x64xf32> to vector<5xf32>
    %12 = vector.shape_cast %11 : vector<5xf32> to vector<5x1xf32>
    %cst_8 = arith.constant 6.400000e+01 : f32
    %13 = vector.broadcast %cst_8 : f32 to vector<5x1xf32>
    %14 = arith.divf %12, %13 : vector<5x1xf32>
    %15 = vector.broadcast %7 : vector<5x1xf32> to vector<5x64xf32>
    %16 = arith.subf %1, %15 : vector<5x64xf32>
    %cst_9 = arith.constant 9.99999997E-7 : f32
    %17 = vector.broadcast %cst_9 : f32 to vector<5x1xf32>
    %18 = arith.addf %14, %17 : vector<5x1xf32>
    %19 = math.rsqrt %18 : vector<5x1xf32>
    %20 = vector.broadcast %19 : vector<5x1xf32> to vector<5x64xf32>
    %21 = arith.mulf %16, %20 : vector<5x64xf32>
    %22 = vector.broadcast %2 : vector<1x64xf32> to vector<5x64xf32>
    %23 = arith.mulf %21, %22 : vector<5x64xf32>
    %24 = vector.broadcast %3 : vector<1x64xf32> to vector<5x64xf32>
    %25 = arith.addf %23, %24 : vector<5x64xf32>
    %c0_10 = arith.constant 0 : index
    %c0_11 = arith.constant 0 : index
    %26 = vector.load %arg4[%c0_10, %c0_11] : memref<64x192xf32, #tpu.memory_space<vmem>>, vector<64x192xf32>
    %cst_12 = arith.constant dense<0.000000e+00> : vector<5x192xf32>
    %27 = tpu.matmul %25, %26, %cst_12 {dimension_numbers = #tpu.dot_dimension_numbers<[1], [0], [0], [1], [0, 0, 1, 1], [], []>} : vector<5x64xf32>, vector<64x192xf32>, vector<5x192xf32> -> vector<5x192xf32>
    %c0_13 = arith.constant 0 : index
    %c0_14 = arith.constant 0 : index
    %28 = vector.load %arg5[%c0_13, %c0_14] : memref<1x192xf32, #tpu.memory_space<vmem>>, vector<1x192xf32>
    %29 = vector.broadcast %28 : vector<1x192xf32> to vector<5x192xf32>
    %30 = arith.addf %27, %29 : vector<5x192xf32>
    %31 = vector.extract_strided_slice %30 {offsets = [0, 0], sizes = [5, 64], strides = [1, 1]} : vector<5x192xf32> to vector<5x64xf32>
    %32 = vector.extract_strided_slice %30 {offsets = [0, 64], sizes = [5, 64], strides = [1, 1]} : vector<5x192xf32> to vector<5x64xf32>
    %33 = vector.extract_strided_slice %30 {offsets = [0, 128], sizes = [5, 64], strides = [1, 1]} : vector<5x192xf32> to vector<5x64xf32>
    %c0_15 = arith.constant 0 : index
    %c0_16 = arith.constant 0 : index
    %34 = vector.load %arg6[%c0_15, %c0_16] : memref<64x64xf32, #tpu.memory_space<vmem>>, vector<64x64xf32>
    %c0_17 = arith.constant 0 : index
    %c0_18 = arith.constant 0 : index
    %35 = vector.load %arg7[%c0_17, %c0_18] : memref<1x64xf32, #tpu.memory_space<vmem>>, vector<1x64xf32>
    %36 = vector.extract_strided_slice %31 {offsets = [0, 0], sizes = [5, 16], strides = [1, 1]} : vector<5x64xf32> to vector<5x16xf32>
    %37 = vector.extract_strided_slice %32 {offsets = [0, 0], sizes = [5, 16], strides = [1, 1]} : vector<5x64xf32> to vector<5x16xf32>
    %cst_19 = arith.constant dense<0.000000e+00> : vector<5x5xf32>
    %38 = tpu.matmul %36, %37, %cst_19 {dimension_numbers = #tpu.dot_dimension_numbers<[1], [1], [0], [0], [0, 0, 1, 0], [], []>} : vector<5x16xf32>, vector<5x16xf32>, vector<5x5xf32> -> vector<5x5xf32>
    %cst_20 = arith.constant 2.500000e-01 : f32
    %39 = vector.broadcast %cst_20 : f32 to vector<5x5xf32>
    %40 = arith.mulf %38, %39 : vector<5x5xf32>
    %cst_21 = arith.constant dense<0xFF800000> : vector<5xf32>
    %41 = vector.multi_reduction <maximumf>, %40, %cst_21 [1] : vector<5x5xf32> to vector<5xf32>
    %42 = vector.shape_cast %41 : vector<5xf32> to vector<5x1xf32>
    %43 = vector.broadcast %42 : vector<5x1xf32> to vector<5x5xf32>
    %44 = arith.subf %40, %43 : vector<5x5xf32>
    %45 = math.exp %44 : vector<5x5xf32>
    %cst_22 = arith.constant dense<0.000000e+00> : vector<5xf32>
    %46 = vector.multi_reduction <add>, %45, %cst_22 [1] : vector<5x5xf32> to vector<5xf32>
    %47 = vector.shape_cast %46 : vector<5xf32> to vector<5x1xf32>
    %48 = tpu.reciprocal %47 {approx = true} : vector<5x1xf32> -> vector<5x1xf32>
    %49 = vector.broadcast %48 : vector<5x1xf32> to vector<5x5xf32>
    %50 = arith.mulf %45, %49 : vector<5x5xf32>
    %51 = vector.extract_strided_slice %33 {offsets = [0, 0], sizes = [5, 16], strides = [1, 1]} : vector<5x64xf32> to vector<5x16xf32>
    %cst_23 = arith.constant dense<0.000000e+00> : vector<5x16xf32>
    %52 = tpu.matmul %50, %51, %cst_23 {dimension_numbers = #tpu.dot_dimension_numbers<[1], [0], [0], [1], [0, 0, 1, 1], [], []>} : vector<5x5xf32>, vector<5x16xf32>, vector<5x16xf32> -> vector<5x16xf32>
    %53 = vector.extract_strided_slice %34 {offsets = [0, 0], sizes = [16, 64], strides = [1, 1]} : vector<64x64xf32> to vector<16x64xf32>
    %cst_24 = arith.constant dense<0.000000e+00> : vector<5x64xf32>
    %54 = tpu.matmul %52, %53, %cst_24 {dimension_numbers = #tpu.dot_dimension_numbers<[1], [0], [0], [1], [0, 0, 1, 1], [], []>} : vector<5x16xf32>, vector<16x64xf32>, vector<5x64xf32> -> vector<5x64xf32>
    %55 = vector.extract_strided_slice %31 {offsets = [0, 16], sizes = [5, 16], strides = [1, 1]} : vector<5x64xf32> to vector<5x16xf32>
    %56 = vector.extract_strided_slice %32 {offsets = [0, 16], sizes = [5, 16], strides = [1, 1]} : vector<5x64xf32> to vector<5x16xf32>
    %cst_25 = arith.constant dense<0.000000e+00> : vector<5x5xf32>
    %57 = tpu.matmul %55, %56, %cst_25 {dimension_numbers = #tpu.dot_dimension_numbers<[1], [1], [0], [0], [0, 0, 1, 0], [], []>} : vector<5x16xf32>, vector<5x16xf32>, vector<5x5xf32> -> vector<5x5xf32>
    %cst_26 = arith.constant 2.500000e-01 : f32
    %58 = vector.broadcast %cst_26 : f32 to vector<5x5xf32>
    %59 = arith.mulf %57, %58 : vector<5x5xf32>
    %cst_27 = arith.constant dense<0xFF800000> : vector<5xf32>
    %60 = vector.multi_reduction <maximumf>, %59, %cst_27 [1] : vector<5x5xf32> to vector<5xf32>
    %61 = vector.shape_cast %60 : vector<5xf32> to vector<5x1xf32>
    %62 = vector.broadcast %61 : vector<5x1xf32> to vector<5x5xf32>
    %63 = arith.subf %59, %62 : vector<5x5xf32>
    %64 = math.exp %63 : vector<5x5xf32>
    %cst_28 = arith.constant dense<0.000000e+00> : vector<5xf32>
    %65 = vector.multi_reduction <add>, %64, %cst_28 [1] : vector<5x5xf32> to vector<5xf32>
    %66 = vector.shape_cast %65 : vector<5xf32> to vector<5x1xf32>
    %67 = tpu.reciprocal %66 {approx = true} : vector<5x1xf32> -> vector<5x1xf32>
    %68 = vector.broadcast %67 : vector<5x1xf32> to vector<5x5xf32>
    %69 = arith.mulf %64, %68 : vector<5x5xf32>
    %70 = vector.extract_strided_slice %33 {offsets = [0, 16], sizes = [5, 16], strides = [1, 1]} : vector<5x64xf32> to vector<5x16xf32>
    %cst_29 = arith.constant dense<0.000000e+00> : vector<5x16xf32>
    %71 = tpu.matmul %69, %70, %cst_29 {dimension_numbers = #tpu.dot_dimension_numbers<[1], [0], [0], [1], [0, 0, 1, 1], [], []>} : vector<5x5xf32>, vector<5x16xf32>, vector<5x16xf32> -> vector<5x16xf32>
    %72 = vector.extract_strided_slice %34 {offsets = [16, 0], sizes = [16, 64], strides = [1, 1]} : vector<64x64xf32> to vector<16x64xf32>
    %cst_30 = arith.constant dense<0.000000e+00> : vector<5x64xf32>
    %73 = tpu.matmul %71, %72, %cst_30 {dimension_numbers = #tpu.dot_dimension_numbers<[1], [0], [0], [1], [0, 0, 1, 1], [], []>} : vector<5x16xf32>, vector<16x64xf32>, vector<5x64xf32> -> vector<5x64xf32>
    %74 = arith.addf %54, %73 : vector<5x64xf32>
    %75 = vector.extract_strided_slice %31 {offsets = [0, 32], sizes = [5, 16], strides = [1, 1]} : vector<5x64xf32> to vector<5x16xf32>
    %76 = vector.extract_strided_slice %32 {offsets = [0, 32], sizes = [5, 16], strides = [1, 1]} : vector<5x64xf32> to vector<5x16xf32>
    %cst_31 = arith.constant dense<0.000000e+00> : vector<5x5xf32>
    %77 = tpu.matmul %75, %76, %cst_31 {dimension_numbers = #tpu.dot_dimension_numbers<[1], [1], [0], [0], [0, 0, 1, 0], [], []>} : vector<5x16xf32>, vector<5x16xf32>, vector<5x5xf32> -> vector<5x5xf32>
    %cst_32 = arith.constant 2.500000e-01 : f32
    %78 = vector.broadcast %cst_32 : f32 to vector<5x5xf32>
    %79 = arith.mulf %77, %78 : vector<5x5xf32>
    %cst_33 = arith.constant dense<0xFF800000> : vector<5xf32>
    %80 = vector.multi_reduction <maximumf>, %79, %cst_33 [1] : vector<5x5xf32> to vector<5xf32>
    %81 = vector.shape_cast %80 : vector<5xf32> to vector<5x1xf32>
    %82 = vector.broadcast %81 : vector<5x1xf32> to vector<5x5xf32>
    %83 = arith.subf %79, %82 : vector<5x5xf32>
    %84 = math.exp %83 : vector<5x5xf32>
    %cst_34 = arith.constant dense<0.000000e+00> : vector<5xf32>
    %85 = vector.multi_reduction <add>, %84, %cst_34 [1] : vector<5x5xf32> to vector<5xf32>
    %86 = vector.shape_cast %85 : vector<5xf32> to vector<5x1xf32>
    %87 = tpu.reciprocal %86 {approx = true} : vector<5x1xf32> -> vector<5x1xf32>
    %88 = vector.broadcast %87 : vector<5x1xf32> to vector<5x5xf32>
    %89 = arith.mulf %84, %88 : vector<5x5xf32>
    %90 = vector.extract_strided_slice %33 {offsets = [0, 32], sizes = [5, 16], strides = [1, 1]} : vector<5x64xf32> to vector<5x16xf32>
    %cst_35 = arith.constant dense<0.000000e+00> : vector<5x16xf32>
    %91 = tpu.matmul %89, %90, %cst_35 {dimension_numbers = #tpu.dot_dimension_numbers<[1], [0], [0], [1], [0, 0, 1, 1], [], []>} : vector<5x5xf32>, vector<5x16xf32>, vector<5x16xf32> -> vector<5x16xf32>
    %92 = vector.extract_strided_slice %34 {offsets = [32, 0], sizes = [16, 64], strides = [1, 1]} : vector<64x64xf32> to vector<16x64xf32>
    %cst_36 = arith.constant dense<0.000000e+00> : vector<5x64xf32>
    %93 = tpu.matmul %91, %92, %cst_36 {dimension_numbers = #tpu.dot_dimension_numbers<[1], [0], [0], [1], [0, 0, 1, 1], [], []>} : vector<5x16xf32>, vector<16x64xf32>, vector<5x64xf32> -> vector<5x64xf32>
    %94 = arith.addf %74, %93 : vector<5x64xf32>
    %95 = vector.extract_strided_slice %31 {offsets = [0, 48], sizes = [5, 16], strides = [1, 1]} : vector<5x64xf32> to vector<5x16xf32>
    %96 = vector.extract_strided_slice %32 {offsets = [0, 48], sizes = [5, 16], strides = [1, 1]} : vector<5x64xf32> to vector<5x16xf32>
    %cst_37 = arith.constant dense<0.000000e+00> : vector<5x5xf32>
    %97 = tpu.matmul %95, %96, %cst_37 {dimension_numbers = #tpu.dot_dimension_numbers<[1], [1], [0], [0], [0, 0, 1, 0], [], []>} : vector<5x16xf32>, vector<5x16xf32>, vector<5x5xf32> -> vector<5x5xf32>
    %cst_38 = arith.constant 2.500000e-01 : f32
    %98 = vector.broadcast %cst_38 : f32 to vector<5x5xf32>
    %99 = arith.mulf %97, %98 : vector<5x5xf32>
    %cst_39 = arith.constant dense<0xFF800000> : vector<5xf32>
    %100 = vector.multi_reduction <maximumf>, %99, %cst_39 [1] : vector<5x5xf32> to vector<5xf32>
    %101 = vector.shape_cast %100 : vector<5xf32> to vector<5x1xf32>
    %102 = vector.broadcast %101 : vector<5x1xf32> to vector<5x5xf32>
    %103 = arith.subf %99, %102 : vector<5x5xf32>
    %104 = math.exp %103 : vector<5x5xf32>
    %cst_40 = arith.constant dense<0.000000e+00> : vector<5xf32>
    %105 = vector.multi_reduction <add>, %104, %cst_40 [1] : vector<5x5xf32> to vector<5xf32>
    %106 = vector.shape_cast %105 : vector<5xf32> to vector<5x1xf32>
    %107 = tpu.reciprocal %106 {approx = true} : vector<5x1xf32> -> vector<5x1xf32>
    %108 = vector.broadcast %107 : vector<5x1xf32> to vector<5x5xf32>
    %109 = arith.mulf %104, %108 : vector<5x5xf32>
    %110 = vector.extract_strided_slice %33 {offsets = [0, 48], sizes = [5, 16], strides = [1, 1]} : vector<5x64xf32> to vector<5x16xf32>
    %cst_41 = arith.constant dense<0.000000e+00> : vector<5x16xf32>
    %111 = tpu.matmul %109, %110, %cst_41 {dimension_numbers = #tpu.dot_dimension_numbers<[1], [0], [0], [1], [0, 0, 1, 1], [], []>} : vector<5x5xf32>, vector<5x16xf32>, vector<5x16xf32> -> vector<5x16xf32>
    %112 = vector.extract_strided_slice %34 {offsets = [48, 0], sizes = [16, 64], strides = [1, 1]} : vector<64x64xf32> to vector<16x64xf32>
    %cst_42 = arith.constant dense<0.000000e+00> : vector<5x64xf32>
    %113 = tpu.matmul %111, %112, %cst_42 {dimension_numbers = #tpu.dot_dimension_numbers<[1], [0], [0], [1], [0, 0, 1, 1], [], []>} : vector<5x16xf32>, vector<16x64xf32>, vector<5x64xf32> -> vector<5x64xf32>
    %114 = arith.addf %94, %113 : vector<5x64xf32>
    %115 = vector.broadcast %35 : vector<1x64xf32> to vector<5x64xf32>
    %116 = arith.addf %114, %115 : vector<5x64xf32>
    %117 = arith.addf %1, %116 : vector<5x64xf32>
    %c0_43 = arith.constant 0 : index
    %c0_44 = arith.constant 0 : index
    %118 = vector.load %arg8[%c0_43, %c0_44] : memref<1x64xf32, #tpu.memory_space<vmem>>, vector<1x64xf32>
    %c0_45 = arith.constant 0 : index
    %c0_46 = arith.constant 0 : index
    %119 = vector.load %arg9[%c0_45, %c0_46] : memref<1x64xf32, #tpu.memory_space<vmem>>, vector<1x64xf32>
    %cst_47 = arith.constant dense<0.000000e+00> : vector<5xf32>
    %120 = vector.multi_reduction <add>, %117, %cst_47 [1] : vector<5x64xf32> to vector<5xf32>
    %121 = vector.shape_cast %120 : vector<5xf32> to vector<5x1xf32>
    %cst_48 = arith.constant 6.400000e+01 : f32
    %122 = vector.broadcast %cst_48 : f32 to vector<5x1xf32>
    %123 = arith.divf %121, %122 : vector<5x1xf32>
    %124 = vector.broadcast %123 : vector<5x1xf32> to vector<5x64xf32>
    %125 = arith.subf %117, %124 : vector<5x64xf32>
    %126 = arith.mulf %125, %125 : vector<5x64xf32>
    %cst_49 = arith.constant dense<0.000000e+00> : vector<5xf32>
    %127 = vector.multi_reduction <add>, %126, %cst_49 [1] : vector<5x64xf32> to vector<5xf32>
    %128 = vector.shape_cast %127 : vector<5xf32> to vector<5x1xf32>
    %cst_50 = arith.constant 6.400000e+01 : f32
    %129 = vector.broadcast %cst_50 : f32 to vector<5x1xf32>
    %130 = arith.divf %128, %129 : vector<5x1xf32>
    %131 = vector.broadcast %123 : vector<5x1xf32> to vector<5x64xf32>
    %132 = arith.subf %117, %131 : vector<5x64xf32>
    %cst_51 = arith.constant 9.99999997E-7 : f32
    %133 = vector.broadcast %cst_51 : f32 to vector<5x1xf32>
    %134 = arith.addf %130, %133 : vector<5x1xf32>
    %135 = math.rsqrt %134 : vector<5x1xf32>
    %136 = vector.broadcast %135 : vector<5x1xf32> to vector<5x64xf32>
    %137 = arith.mulf %132, %136 : vector<5x64xf32>
    %138 = vector.broadcast %118 : vector<1x64xf32> to vector<5x64xf32>
    %139 = arith.mulf %137, %138 : vector<5x64xf32>
    %140 = vector.broadcast %119 : vector<1x64xf32> to vector<5x64xf32>
    %141 = arith.addf %139, %140 : vector<5x64xf32>
    %c0_52 = arith.constant 0 : index
    %c0_53 = arith.constant 0 : index
    %142 = vector.load %arg10[%c0_52, %c0_53] : memref<64x256xf32, #tpu.memory_space<vmem>>, vector<64x256xf32>
    %cst_54 = arith.constant dense<0.000000e+00> : vector<5x256xf32>
    %143 = tpu.matmul %141, %142, %cst_54 {dimension_numbers = #tpu.dot_dimension_numbers<[1], [0], [0], [1], [0, 0, 1, 1], [], []>} : vector<5x64xf32>, vector<64x256xf32>, vector<5x256xf32> -> vector<5x256xf32>
    %c0_55 = arith.constant 0 : index
    %c0_56 = arith.constant 0 : index
    %144 = vector.load %arg11[%c0_55, %c0_56] : memref<1x256xf32, #tpu.memory_space<vmem>>, vector<1x256xf32>
    %145 = vector.broadcast %144 : vector<1x256xf32> to vector<5x256xf32>
    %146 = arith.addf %143, %145 : vector<5x256xf32>
    %cst_57 = arith.constant 5.000000e-01 : f32
    %147 = vector.broadcast %cst_57 : f32 to vector<5x256xf32>
    %148 = arith.mulf %147, %146 : vector<5x256xf32>
    %cst_58 = arith.constant 4.471500e-02 : f32
    %149 = vector.broadcast %cst_58 : f32 to vector<5x256xf32>
    %150 = arith.mulf %149, %146 : vector<5x256xf32>
    %151 = arith.mulf %150, %146 : vector<5x256xf32>
    %152 = arith.mulf %151, %146 : vector<5x256xf32>
    %153 = arith.addf %146, %152 : vector<5x256xf32>
    %cst_59 = arith.constant 0.797884583 : f32
    %154 = vector.broadcast %cst_59 : f32 to vector<5x256xf32>
    %155 = arith.mulf %154, %153 : vector<5x256xf32>
    %156 = math.tanh %155 : vector<5x256xf32>
    %cst_60 = arith.constant 1.000000e+00 : f32
    %157 = vector.broadcast %cst_60 : f32 to vector<5x256xf32>
    %158 = arith.addf %157, %156 : vector<5x256xf32>
    %159 = arith.mulf %148, %158 : vector<5x256xf32>
    %c0_61 = arith.constant 0 : index
    %c0_62 = arith.constant 0 : index
    %160 = vector.load %arg12[%c0_61, %c0_62] : memref<256x64xf32, #tpu.memory_space<vmem>>, vector<256x64xf32>
    %cst_63 = arith.constant dense<0.000000e+00> : vector<5x64xf32>
    %161 = tpu.matmul %159, %160, %cst_63 {dimension_numbers = #tpu.dot_dimension_numbers<[1], [0], [0], [1], [0, 0, 1, 1], [], []>} : vector<5x256xf32>, vector<256x64xf32>, vector<5x64xf32> -> vector<5x64xf32>
    %c0_64 = arith.constant 0 : index
    %c0_65 = arith.constant 0 : index
    %162 = vector.load %arg13[%c0_64, %c0_65] : memref<1x64xf32, #tpu.memory_space<vmem>>, vector<1x64xf32>
    %163 = vector.broadcast %162 : vector<1x64xf32> to vector<5x64xf32>
    %164 = arith.addf %161, %163 : vector<5x64xf32>
    %165 = arith.addf %117, %164 : vector<5x64xf32>
    %c0_66 = arith.constant 0 : index
    %c0_67 = arith.constant 0 : index
    %c0_68 = arith.constant 0 : index
    %166 = vector.load %arg14[%c0_66, %c0_67, %c0_68] : memref<1x5x64xf32, #tpu.memory_space<vmem>>, vector<1x5x64xf32>
    %167 = vector.shape_cast %166 : vector<1x5x64xf32> to vector<5x64xf32>
    %168 = vector.shape_cast %165 : vector<5x64xf32> to vector<1x5x64xf32>
    tpu.vector_store %arg14[%c0_66, %c0_67, %c0_68], %168 {strides = array<i32>} : memref<1x5x64xf32, #tpu.memory_space<vmem>>, vector<1x5x64xf32>,
    return
  }
  func.func @transform_0(%arg0: i32) -> (i32, i32, i32) {
    %c0_i32 = arith.constant 0 : i32
    %c0_i32_0 = arith.constant 0 : i32
    %c0_i32_1 = arith.constant 0 : i32
    return %arg0, %c0_i32, %c0_i32_0 : i32, i32, i32
  }
  func.func @transform_1(%arg0: i32) -> (i32, i32) {
    %c0_i32 = arith.constant 0 : i32
    %c0_i32_0 = arith.constant 0 : i32
    %c0_i32_1 = arith.constant 0 : i32
    return %c0_i32, %c0_i32_0 : i32, i32
  }
  func.func @transform_2(%arg0: i32) -> (i32, i32) {
    %c0_i32 = arith.constant 0 : i32
    %c0_i32_0 = arith.constant 0 : i32
    %c0_i32_1 = arith.constant 0 : i32
    return %c0_i32, %c0_i32_0 : i32, i32
  }
  func.func @transform_3(%arg0: i32) -> (i32, i32) {
    %c0_i32 = arith.constant 0 : i32
    %c0_i32_0 = arith.constant 0 : i32
    %c0_i32_1 = arith.constant 0 : i32
    return %c0_i32, %c0_i32_0 : i32, i32
  }
  func.func @transform_4(%arg0: i32) -> (i32, i32) {
    %c0_i32 = arith.constant 0 : i32
    %c0_i32_0 = arith.constant 0 : i32
    %c0_i32_1 = arith.constant 0 : i32
    return %c0_i32, %c0_i32_0 : i32, i32
  }
  func.func @transform_5(%arg0: i32) -> (i32, i32) {
    %c0_i32 = arith.constant 0 : i32
    %c0_i32_0 = arith.constant 0 : i32
    %c0_i32_1 = arith.constant 0 : i32
    return %c0_i32, %c0_i32_0 : i32, i32
  }
  func.func @transform_6(%arg0: i32) -> (i32, i32) {
    %c0_i32 = arith.constant 0 : i32
    %c0_i32_0 = arith.constant 0 : i32
    %c0_i32_1 = arith.constant 0 : i32
    return %c0_i32, %c0_i32_0 : i32, i32
  }
  func.func @transform_7(%arg0: i32) -> (i32, i32) {
    %c0_i32 = arith.constant 0 : i32
    %c0_i32_0 = arith.constant 0 : i32
    %c0_i32_1 = arith.constant 0 : i32
    return %c0_i32, %c0_i32_0 : i32, i32
  }
  func.func @transform_8(%arg0: i32) -> (i32, i32) {
    %c0_i32 = arith.constant 0 : i32
    %c0_i32_0 = arith.constant 0 : i32
    %c0_i32_1 = arith.constant 0 : i32
    return %c0_i32, %c0_i32_0 : i32, i32
  }
  func.func @transform_9(%arg0: i32) -> (i32, i32) {
    %c0_i32 = arith.constant 0 : i32
    %c0_i32_0 = arith.constant 0 : i32
    %c0_i32_1 = arith.constant 0 : i32
    return %c0_i32, %c0_i32_0 : i32, i32
  }
  func.func @transform_10(%arg0: i32) -> (i32, i32) {
    %c0_i32 = arith.constant 0 : i32
    %c0_i32_0 = arith.constant 0 : i32
    %c0_i32_1 = arith.constant 0 : i32
    return %c0_i32, %c0_i32_0 : i32, i32
  }
  func.func @transform_11(%arg0: i32) -> (i32, i32) {
    %c0_i32 = arith.constant 0 : i32
    %c0_i32_0 = arith.constant 0 : i32
    %c0_i32_1 = arith.constant 0 : i32
    return %c0_i32, %c0_i32_0 : i32, i32
  }
  func.func @transform_12(%arg0: i32) -> (i32, i32) {
    %c0_i32 = arith.constant 0 : i32
    %c0_i32_0 = arith.constant 0 : i32
    %c0_i32_1 = arith.constant 0 : i32
    return %c0_i32, %c0_i32_0 : i32, i32
  }
  func.func @transform_13(%arg0: i32) -> (i32, i32, i32) {
    %c0_i32 = arith.constant 0 : i32
    %c0_i32_0 = arith.constant 0 : i32
    %c0_i32_1 = arith.constant 0 : i32
    return %arg0, %c0_i32, %c0_i32_0 : i32, i32, i32
  }
}

module attributes {stable_mosaic.version = 11 : i64} {
  func.func @_decoder_layer_kernel(%arg0: i32, %arg1: memref<1x8x64xf32, #tpu.memory_space<vmem>>, %arg2: memref<1x5x64xf32, #tpu.memory_space<vmem>>, %arg3: memref<64x192xf32, #tpu.memory_space<vmem>>, %arg4: memref<1x192xf32, #tpu.memory_space<vmem>>, %arg5: memref<64x64xf32, #tpu.memory_space<vmem>>, %arg6: memref<1x64xf32, #tpu.memory_space<vmem>>, %arg7: memref<64x64xf32, #tpu.memory_space<vmem>>, %arg8: memref<1x64xf32, #tpu.memory_space<vmem>>, %arg9: memref<64x128xf32, #tpu.memory_space<vmem>>, %arg10: memref<1x128xf32, #tpu.memory_space<vmem>>, %arg11: memref<64x64xf32, #tpu.memory_space<vmem>>, %arg12: memref<1x64xf32, #tpu.memory_space<vmem>>, %arg13: memref<1x64xf32, #tpu.memory_space<vmem>>, %arg14: memref<1x64xf32, #tpu.memory_space<vmem>>, %arg15: memref<1x64xf32, #tpu.memory_space<vmem>>, %arg16: memref<1x64xf32, #tpu.memory_space<vmem>>, %arg17: memref<1x64xf32, #tpu.memory_space<vmem>>, %arg18: memref<1x64xf32, #tpu.memory_space<vmem>>, %arg19: memref<64x128xf32, #tpu.memory_space<vmem>>, %arg20: memref<1x128xf32, #tpu.memory_space<vmem>>, %arg21: memref<128x64xf32, #tpu.memory_space<vmem>>, %arg22: memref<1x64xf32, #tpu.memory_space<vmem>>, %arg23: memref<1x8x64xf32, #tpu.memory_space<vmem>>) attributes {dimension_semantics = [#tpu.dimension_semantics<parallel>], iteration_bounds = array<i64: 2>, scalar_prefetch = 0 : i64, scratch_operands = 0 : i64, tpu.core_type = #tpu.core_type<tc>, window_params = [{transform_indices = @transform_0, window_bounds = array<i64: 1, 8, 64>}, {transform_indices = @transform_1, window_bounds = array<i64: 1, 5, 64>}, {pipeline_mode = #tpu.pipeline_mode<synchronous>, transform_indices = @transform_2, window_bounds = array<i64: 64, 192>}, {pipeline_mode = #tpu.pipeline_mode<synchronous>, transform_indices = @transform_3, window_bounds = array<i64: 1, 192>}, {pipeline_mode = #tpu.pipeline_mode<synchronous>, transform_indices = @transform_4, window_bounds = array<i64: 64, 64>}, {pipeline_mode = #tpu.pipeline_mode<synchronous>, transform_indices = @transform_5, window_bounds = array<i64: 1, 64>}, {pipeline_mode = #tpu.pipeline_mode<synchronous>, transform_indices = @transform_6, window_bounds = array<i64: 64, 64>}, {pipeline_mode = #tpu.pipeline_mode<synchronous>, transform_indices = @transform_7, window_bounds = array<i64: 1, 64>}, {pipeline_mode = #tpu.pipeline_mode<synchronous>, transform_indices = @transform_8, window_bounds = array<i64: 64, 128>}, {pipeline_mode = #tpu.pipeline_mode<synchronous>, transform_indices = @transform_9, window_bounds = array<i64: 1, 128>}, {pipeline_mode = #tpu.pipeline_mode<synchronous>, transform_indices = @transform_10, window_bounds = array<i64: 64, 64>}, {pipeline_mode = #tpu.pipeline_mode<synchronous>, transform_indices = @transform_11, window_bounds = array<i64: 1, 64>}, {pipeline_mode = #tpu.pipeline_mode<synchronous>, transform_indices = @transform_12, window_bounds = array<i64: 1, 64>}, {pipeline_mode = #tpu.pipeline_mode<synchronous>, transform_indices = @transform_13, window_bounds = array<i64: 1, 64>}, {pipeline_mode = #tpu.pipeline_mode<synchronous>, transform_indices = @transform_14, window_bounds = array<i64: 1, 64>}, {pipeline_mode = #tpu.pipeline_mode<synchronous>, transform_indices = @transform_15, window_bounds = array<i64: 1, 64>}, {pipeline_mode = #tpu.pipeline_mode<synchronous>, transform_indices = @transform_16, window_bounds = array<i64: 1, 64>}, {pipeline_mode = #tpu.pipeline_mode<synchronous>, transform_indices = @transform_17, window_bounds = array<i64: 1, 64>}, {pipeline_mode = #tpu.pipeline_mode<synchronous>, transform_indices = @transform_18, window_bounds = array<i64: 64, 128>}, {pipeline_mode = #tpu.pipeline_mode<synchronous>, transform_indices = @transform_19, window_bounds = array<i64: 1, 128>}, {pipeline_mode = #tpu.pipeline_mode<synchronous>, transform_indices = @transform_20, window_bounds = array<i64: 128, 64>}, {pipeline_mode = #tpu.pipeline_mode<synchronous>, transform_indices = @transform_21, window_bounds = array<i64: 1, 64>}, {transform_indices = @transform_22, window_bounds = array<i64: 1, 8, 64>}]} {
    %c0 = arith.constant 0 : index
    %c0_0 = arith.constant 0 : index
    %c0_1 = arith.constant 0 : index
    %0 = vector.load %arg1[%c0, %c0_0, %c0_1] : memref<1x8x64xf32, #tpu.memory_space<vmem>>, vector<1x8x64xf32>
    %1 = vector.shape_cast %0 : vector<1x8x64xf32> to vector<8x64xf32>
    %c0_2 = arith.constant 0 : index
    %c0_3 = arith.constant 0 : index
    %c0_4 = arith.constant 0 : index
    %2 = vector.load %arg2[%c0_2, %c0_3, %c0_4] : memref<1x5x64xf32, #tpu.memory_space<vmem>>, vector<1x5x64xf32>
    %3 = vector.shape_cast %2 : vector<1x5x64xf32> to vector<5x64xf32>
    %c0_5 = arith.constant 0 : index
    %c0_6 = arith.constant 0 : index
    %4 = vector.load %arg3[%c0_5, %c0_6] : memref<64x192xf32, #tpu.memory_space<vmem>>, vector<64x192xf32>
    %cst = arith.constant dense<0.000000e+00> : vector<8x192xf32>
    %5 = tpu.matmul %1, %4, %cst {dimension_numbers = #tpu.dot_dimension_numbers<[1], [0], [0], [1], [0, 0, 1, 1], [], []>} : vector<8x64xf32>, vector<64x192xf32>, vector<8x192xf32> -> vector<8x192xf32>
    %c0_7 = arith.constant 0 : index
    %c0_8 = arith.constant 0 : index
    %6 = vector.load %arg4[%c0_7, %c0_8] : memref<1x192xf32, #tpu.memory_space<vmem>>, vector<1x192xf32>
    %7 = vector.broadcast %6 : vector<1x192xf32> to vector<8x192xf32>
    %8 = arith.addf %5, %7 : vector<8x192xf32>
    %9 = vector.extract_strided_slice %8 {offsets = [0, 0], sizes = [8, 64], strides = [1, 1]} : vector<8x192xf32> to vector<8x64xf32>
    %10 = vector.extract_strided_slice %8 {offsets = [0, 64], sizes = [8, 64], strides = [1, 1]} : vector<8x192xf32> to vector<8x64xf32>
    %11 = vector.extract_strided_slice %8 {offsets = [0, 128], sizes = [8, 64], strides = [1, 1]} : vector<8x192xf32> to vector<8x64xf32>
    %c0_9 = arith.constant 0 : index
    %c0_10 = arith.constant 0 : index
    %12 = vector.load %arg5[%c0_9, %c0_10] : memref<64x64xf32, #tpu.memory_space<vmem>>, vector<64x64xf32>
    %c0_11 = arith.constant 0 : index
    %c0_12 = arith.constant 0 : index
    %13 = vector.load %arg6[%c0_11, %c0_12] : memref<1x64xf32, #tpu.memory_space<vmem>>, vector<1x64xf32>
    %14 = tpu.iota {dimensions = array<i32: 0>} : vector<8x8xi32>
    %15 = tpu.iota {dimensions = array<i32: 1>} : vector<8x8xi32>
    %16 = arith.cmpi sge, %14, %15 : vector<8x8xi32>
    %cst_13 = arith.constant 0.000000e+00 : f32
    %cst_14 = arith.constant -1.000000e+09 : f32
    %17 = vector.broadcast %cst_13 : f32 to vector<8x8xf32>
    %18 = vector.broadcast %cst_14 : f32 to vector<8x8xf32>
    %19 = arith.select %16, %17, %18 : vector<8x8xi1>, vector<8x8xf32>
    %20 = vector.extract_strided_slice %9 {offsets = [0, 0], sizes = [8, 16], strides = [1, 1]} : vector<8x64xf32> to vector<8x16xf32>
    %21 = vector.extract_strided_slice %10 {offsets = [0, 0], sizes = [8, 16], strides = [1, 1]} : vector<8x64xf32> to vector<8x16xf32>
    %cst_15 = arith.constant dense<0.000000e+00> : vector<8x8xf32>
    %22 = tpu.matmul %20, %21, %cst_15 {dimension_numbers = #tpu.dot_dimension_numbers<[1], [1], [0], [0], [0, 0, 1, 0], [], []>} : vector<8x16xf32>, vector<8x16xf32>, vector<8x8xf32> -> vector<8x8xf32>
    %cst_16 = arith.constant 2.500000e-01 : f32
    %23 = vector.broadcast %cst_16 : f32 to vector<8x8xf32>
    %24 = arith.mulf %22, %23 : vector<8x8xf32>
    %25 = arith.addf %24, %19 : vector<8x8xf32>
    %cst_17 = arith.constant dense<0xFF800000> : vector<8xf32>
    %26 = vector.multi_reduction <maximumf>, %25, %cst_17 [1] : vector<8x8xf32> to vector<8xf32>
    %27 = vector.shape_cast %26 : vector<8xf32> to vector<8x1xf32>
    %28 = vector.broadcast %27 : vector<8x1xf32> to vector<8x8xf32>
    %29 = arith.subf %25, %28 : vector<8x8xf32>
    %30 = math.exp %29 : vector<8x8xf32>
    %cst_18 = arith.constant dense<0.000000e+00> : vector<8xf32>
    %31 = vector.multi_reduction <add>, %30, %cst_18 [1] : vector<8x8xf32> to vector<8xf32>
    %32 = vector.shape_cast %31 : vector<8xf32> to vector<8x1xf32>
    %33 = tpu.reciprocal %32 {approx = true} : vector<8x1xf32> -> vector<8x1xf32>
    %34 = vector.broadcast %33 : vector<8x1xf32> to vector<8x8xf32>
    %35 = arith.mulf %30, %34 : vector<8x8xf32>
    %36 = vector.extract_strided_slice %11 {offsets = [0, 0], sizes = [8, 16], strides = [1, 1]} : vector<8x64xf32> to vector<8x16xf32>
    %cst_19 = arith.constant dense<0.000000e+00> : vector<8x16xf32>
    %37 = tpu.matmul %35, %36, %cst_19 {dimension_numbers = #tpu.dot_dimension_numbers<[1], [0], [0], [1], [0, 0, 1, 1], [], []>} : vector<8x8xf32>, vector<8x16xf32>, vector<8x16xf32> -> vector<8x16xf32>
    %38 = vector.extract_strided_slice %12 {offsets = [0, 0], sizes = [16, 64], strides = [1, 1]} : vector<64x64xf32> to vector<16x64xf32>
    %cst_20 = arith.constant dense<0.000000e+00> : vector<8x64xf32>
    %39 = tpu.matmul %37, %38, %cst_20 {dimension_numbers = #tpu.dot_dimension_numbers<[1], [0], [0], [1], [0, 0, 1, 1], [], []>} : vector<8x16xf32>, vector<16x64xf32>, vector<8x64xf32> -> vector<8x64xf32>
    %40 = vector.extract_strided_slice %9 {offsets = [0, 16], sizes = [8, 16], strides = [1, 1]} : vector<8x64xf32> to vector<8x16xf32>
    %41 = vector.extract_strided_slice %10 {offsets = [0, 16], sizes = [8, 16], strides = [1, 1]} : vector<8x64xf32> to vector<8x16xf32>
    %cst_21 = arith.constant dense<0.000000e+00> : vector<8x8xf32>
    %42 = tpu.matmul %40, %41, %cst_21 {dimension_numbers = #tpu.dot_dimension_numbers<[1], [1], [0], [0], [0, 0, 1, 0], [], []>} : vector<8x16xf32>, vector<8x16xf32>, vector<8x8xf32> -> vector<8x8xf32>
    %cst_22 = arith.constant 2.500000e-01 : f32
    %43 = vector.broadcast %cst_22 : f32 to vector<8x8xf32>
    %44 = arith.mulf %42, %43 : vector<8x8xf32>
    %45 = arith.addf %44, %19 : vector<8x8xf32>
    %cst_23 = arith.constant dense<0xFF800000> : vector<8xf32>
    %46 = vector.multi_reduction <maximumf>, %45, %cst_23 [1] : vector<8x8xf32> to vector<8xf32>
    %47 = vector.shape_cast %46 : vector<8xf32> to vector<8x1xf32>
    %48 = vector.broadcast %47 : vector<8x1xf32> to vector<8x8xf32>
    %49 = arith.subf %45, %48 : vector<8x8xf32>
    %50 = math.exp %49 : vector<8x8xf32>
    %cst_24 = arith.constant dense<0.000000e+00> : vector<8xf32>
    %51 = vector.multi_reduction <add>, %50, %cst_24 [1] : vector<8x8xf32> to vector<8xf32>
    %52 = vector.shape_cast %51 : vector<8xf32> to vector<8x1xf32>
    %53 = tpu.reciprocal %52 {approx = true} : vector<8x1xf32> -> vector<8x1xf32>
    %54 = vector.broadcast %53 : vector<8x1xf32> to vector<8x8xf32>
    %55 = arith.mulf %50, %54 : vector<8x8xf32>
    %56 = vector.extract_strided_slice %11 {offsets = [0, 16], sizes = [8, 16], strides = [1, 1]} : vector<8x64xf32> to vector<8x16xf32>
    %cst_25 = arith.constant dense<0.000000e+00> : vector<8x16xf32>
    %57 = tpu.matmul %55, %56, %cst_25 {dimension_numbers = #tpu.dot_dimension_numbers<[1], [0], [0], [1], [0, 0, 1, 1], [], []>} : vector<8x8xf32>, vector<8x16xf32>, vector<8x16xf32> -> vector<8x16xf32>
    %58 = vector.extract_strided_slice %12 {offsets = [16, 0], sizes = [16, 64], strides = [1, 1]} : vector<64x64xf32> to vector<16x64xf32>
    %cst_26 = arith.constant dense<0.000000e+00> : vector<8x64xf32>
    %59 = tpu.matmul %57, %58, %cst_26 {dimension_numbers = #tpu.dot_dimension_numbers<[1], [0], [0], [1], [0, 0, 1, 1], [], []>} : vector<8x16xf32>, vector<16x64xf32>, vector<8x64xf32> -> vector<8x64xf32>
    %60 = arith.addf %39, %59 : vector<8x64xf32>
    %61 = vector.extract_strided_slice %9 {offsets = [0, 32], sizes = [8, 16], strides = [1, 1]} : vector<8x64xf32> to vector<8x16xf32>
    %62 = vector.extract_strided_slice %10 {offsets = [0, 32], sizes = [8, 16], strides = [1, 1]} : vector<8x64xf32> to vector<8x16xf32>
    %cst_27 = arith.constant dense<0.000000e+00> : vector<8x8xf32>
    %63 = tpu.matmul %61, %62, %cst_27 {dimension_numbers = #tpu.dot_dimension_numbers<[1], [1], [0], [0], [0, 0, 1, 0], [], []>} : vector<8x16xf32>, vector<8x16xf32>, vector<8x8xf32> -> vector<8x8xf32>
    %cst_28 = arith.constant 2.500000e-01 : f32
    %64 = vector.broadcast %cst_28 : f32 to vector<8x8xf32>
    %65 = arith.mulf %63, %64 : vector<8x8xf32>
    %66 = arith.addf %65, %19 : vector<8x8xf32>
    %cst_29 = arith.constant dense<0xFF800000> : vector<8xf32>
    %67 = vector.multi_reduction <maximumf>, %66, %cst_29 [1] : vector<8x8xf32> to vector<8xf32>
    %68 = vector.shape_cast %67 : vector<8xf32> to vector<8x1xf32>
    %69 = vector.broadcast %68 : vector<8x1xf32> to vector<8x8xf32>
    %70 = arith.subf %66, %69 : vector<8x8xf32>
    %71 = math.exp %70 : vector<8x8xf32>
    %cst_30 = arith.constant dense<0.000000e+00> : vector<8xf32>
    %72 = vector.multi_reduction <add>, %71, %cst_30 [1] : vector<8x8xf32> to vector<8xf32>
    %73 = vector.shape_cast %72 : vector<8xf32> to vector<8x1xf32>
    %74 = tpu.reciprocal %73 {approx = true} : vector<8x1xf32> -> vector<8x1xf32>
    %75 = vector.broadcast %74 : vector<8x1xf32> to vector<8x8xf32>
    %76 = arith.mulf %71, %75 : vector<8x8xf32>
    %77 = vector.extract_strided_slice %11 {offsets = [0, 32], sizes = [8, 16], strides = [1, 1]} : vector<8x64xf32> to vector<8x16xf32>
    %cst_31 = arith.constant dense<0.000000e+00> : vector<8x16xf32>
    %78 = tpu.matmul %76, %77, %cst_31 {dimension_numbers = #tpu.dot_dimension_numbers<[1], [0], [0], [1], [0, 0, 1, 1], [], []>} : vector<8x8xf32>, vector<8x16xf32>, vector<8x16xf32> -> vector<8x16xf32>
    %79 = vector.extract_strided_slice %12 {offsets = [32, 0], sizes = [16, 64], strides = [1, 1]} : vector<64x64xf32> to vector<16x64xf32>
    %cst_32 = arith.constant dense<0.000000e+00> : vector<8x64xf32>
    %80 = tpu.matmul %78, %79, %cst_32 {dimension_numbers = #tpu.dot_dimension_numbers<[1], [0], [0], [1], [0, 0, 1, 1], [], []>} : vector<8x16xf32>, vector<16x64xf32>, vector<8x64xf32> -> vector<8x64xf32>
    %81 = arith.addf %60, %80 : vector<8x64xf32>
    %82 = vector.extract_strided_slice %9 {offsets = [0, 48], sizes = [8, 16], strides = [1, 1]} : vector<8x64xf32> to vector<8x16xf32>
    %83 = vector.extract_strided_slice %10 {offsets = [0, 48], sizes = [8, 16], strides = [1, 1]} : vector<8x64xf32> to vector<8x16xf32>
    %cst_33 = arith.constant dense<0.000000e+00> : vector<8x8xf32>
    %84 = tpu.matmul %82, %83, %cst_33 {dimension_numbers = #tpu.dot_dimension_numbers<[1], [1], [0], [0], [0, 0, 1, 0], [], []>} : vector<8x16xf32>, vector<8x16xf32>, vector<8x8xf32> -> vector<8x8xf32>
    %cst_34 = arith.constant 2.500000e-01 : f32
    %85 = vector.broadcast %cst_34 : f32 to vector<8x8xf32>
    %86 = arith.mulf %84, %85 : vector<8x8xf32>
    %87 = arith.addf %86, %19 : vector<8x8xf32>
    %cst_35 = arith.constant dense<0xFF800000> : vector<8xf32>
    %88 = vector.multi_reduction <maximumf>, %87, %cst_35 [1] : vector<8x8xf32> to vector<8xf32>
    %89 = vector.shape_cast %88 : vector<8xf32> to vector<8x1xf32>
    %90 = vector.broadcast %89 : vector<8x1xf32> to vector<8x8xf32>
    %91 = arith.subf %87, %90 : vector<8x8xf32>
    %92 = math.exp %91 : vector<8x8xf32>
    %cst_36 = arith.constant dense<0.000000e+00> : vector<8xf32>
    %93 = vector.multi_reduction <add>, %92, %cst_36 [1] : vector<8x8xf32> to vector<8xf32>
    %94 = vector.shape_cast %93 : vector<8xf32> to vector<8x1xf32>
    %95 = tpu.reciprocal %94 {approx = true} : vector<8x1xf32> -> vector<8x1xf32>
    %96 = vector.broadcast %95 : vector<8x1xf32> to vector<8x8xf32>
    %97 = arith.mulf %92, %96 : vector<8x8xf32>
    %98 = vector.extract_strided_slice %11 {offsets = [0, 48], sizes = [8, 16], strides = [1, 1]} : vector<8x64xf32> to vector<8x16xf32>
    %cst_37 = arith.constant dense<0.000000e+00> : vector<8x16xf32>
    %99 = tpu.matmul %97, %98, %cst_37 {dimension_numbers = #tpu.dot_dimension_numbers<[1], [0], [0], [1], [0, 0, 1, 1], [], []>} : vector<8x8xf32>, vector<8x16xf32>, vector<8x16xf32> -> vector<8x16xf32>
    %100 = vector.extract_strided_slice %12 {offsets = [48, 0], sizes = [16, 64], strides = [1, 1]} : vector<64x64xf32> to vector<16x64xf32>
    %cst_38 = arith.constant dense<0.000000e+00> : vector<8x64xf32>
    %101 = tpu.matmul %99, %100, %cst_38 {dimension_numbers = #tpu.dot_dimension_numbers<[1], [0], [0], [1], [0, 0, 1, 1], [], []>} : vector<8x16xf32>, vector<16x64xf32>, vector<8x64xf32> -> vector<8x64xf32>
    %102 = arith.addf %81, %101 : vector<8x64xf32>
    %103 = vector.broadcast %13 : vector<1x64xf32> to vector<8x64xf32>
    %104 = arith.addf %102, %103 : vector<8x64xf32>
    %105 = arith.addf %1, %104 : vector<8x64xf32>
    %c0_39 = arith.constant 0 : index
    %c0_40 = arith.constant 0 : index
    %106 = vector.load %arg13[%c0_39, %c0_40] : memref<1x64xf32, #tpu.memory_space<vmem>>, vector<1x64xf32>
    %c0_41 = arith.constant 0 : index
    %c0_42 = arith.constant 0 : index
    %107 = vector.load %arg14[%c0_41, %c0_42] : memref<1x64xf32, #tpu.memory_space<vmem>>, vector<1x64xf32>
    %cst_43 = arith.constant dense<0.000000e+00> : vector<8xf32>
    %108 = vector.multi_reduction <add>, %105, %cst_43 [1] : vector<8x64xf32> to vector<8xf32>
    %109 = vector.shape_cast %108 : vector<8xf32> to vector<8x1xf32>
    %cst_44 = arith.constant 6.400000e+01 : f32
    %110 = vector.broadcast %cst_44 : f32 to vector<8x1xf32>
    %111 = arith.divf %109, %110 : vector<8x1xf32>
    %112 = vector.broadcast %111 : vector<8x1xf32> to vector<8x64xf32>
    %113 = arith.subf %105, %112 : vector<8x64xf32>
    %114 = arith.mulf %113, %113 : vector<8x64xf32>
    %cst_45 = arith.constant dense<0.000000e+00> : vector<8xf32>
    %115 = vector.multi_reduction <add>, %114, %cst_45 [1] : vector<8x64xf32> to vector<8xf32>
    %116 = vector.shape_cast %115 : vector<8xf32> to vector<8x1xf32>
    %cst_46 = arith.constant 6.400000e+01 : f32
    %117 = vector.broadcast %cst_46 : f32 to vector<8x1xf32>
    %118 = arith.divf %116, %117 : vector<8x1xf32>
    %119 = vector.broadcast %111 : vector<8x1xf32> to vector<8x64xf32>
    %120 = arith.subf %105, %119 : vector<8x64xf32>
    %cst_47 = arith.constant 9.99999974E-6 : f32
    %121 = vector.broadcast %cst_47 : f32 to vector<8x1xf32>
    %122 = arith.addf %118, %121 : vector<8x1xf32>
    %123 = math.rsqrt %122 : vector<8x1xf32>
    %124 = vector.broadcast %123 : vector<8x1xf32> to vector<8x64xf32>
    %125 = arith.mulf %120, %124 : vector<8x64xf32>
    %126 = vector.broadcast %106 : vector<1x64xf32> to vector<8x64xf32>
    %127 = arith.mulf %125, %126 : vector<8x64xf32>
    %128 = vector.broadcast %107 : vector<1x64xf32> to vector<8x64xf32>
    %129 = arith.addf %127, %128 : vector<8x64xf32>
    %c0_48 = arith.constant 0 : index
    %c0_49 = arith.constant 0 : index
    %130 = vector.load %arg7[%c0_48, %c0_49] : memref<64x64xf32, #tpu.memory_space<vmem>>, vector<64x64xf32>
    %cst_50 = arith.constant dense<0.000000e+00> : vector<8x64xf32>
    %131 = tpu.matmul %129, %130, %cst_50 {dimension_numbers = #tpu.dot_dimension_numbers<[1], [0], [0], [1], [0, 0, 1, 1], [], []>} : vector<8x64xf32>, vector<64x64xf32>, vector<8x64xf32> -> vector<8x64xf32>
    %c0_51 = arith.constant 0 : index
    %c0_52 = arith.constant 0 : index
    %132 = vector.load %arg8[%c0_51, %c0_52] : memref<1x64xf32, #tpu.memory_space<vmem>>, vector<1x64xf32>
    %133 = vector.broadcast %132 : vector<1x64xf32> to vector<8x64xf32>
    %134 = arith.addf %131, %133 : vector<8x64xf32>
    %c0_53 = arith.constant 0 : index
    %c0_54 = arith.constant 0 : index
    %135 = vector.load %arg9[%c0_53, %c0_54] : memref<64x128xf32, #tpu.memory_space<vmem>>, vector<64x128xf32>
    %cst_55 = arith.constant dense<0.000000e+00> : vector<5x128xf32>
    %136 = tpu.matmul %3, %135, %cst_55 {dimension_numbers = #tpu.dot_dimension_numbers<[1], [0], [0], [1], [0, 0, 1, 1], [], []>} : vector<5x64xf32>, vector<64x128xf32>, vector<5x128xf32> -> vector<5x128xf32>
    %c0_56 = arith.constant 0 : index
    %c0_57 = arith.constant 0 : index
    %137 = vector.load %arg10[%c0_56, %c0_57] : memref<1x128xf32, #tpu.memory_space<vmem>>, vector<1x128xf32>
    %138 = vector.broadcast %137 : vector<1x128xf32> to vector<5x128xf32>
    %139 = arith.addf %136, %138 : vector<5x128xf32>
    %140 = vector.extract_strided_slice %139 {offsets = [0, 0], sizes = [5, 64], strides = [1, 1]} : vector<5x128xf32> to vector<5x64xf32>
    %141 = vector.extract_strided_slice %139 {offsets = [0, 64], sizes = [5, 64], strides = [1, 1]} : vector<5x128xf32> to vector<5x64xf32>
    %c0_58 = arith.constant 0 : index
    %c0_59 = arith.constant 0 : index
    %142 = vector.load %arg11[%c0_58, %c0_59] : memref<64x64xf32, #tpu.memory_space<vmem>>, vector<64x64xf32>
    %c0_60 = arith.constant 0 : index
    %c0_61 = arith.constant 0 : index
    %143 = vector.load %arg12[%c0_60, %c0_61] : memref<1x64xf32, #tpu.memory_space<vmem>>, vector<1x64xf32>
    %144 = vector.extract_strided_slice %134 {offsets = [0, 0], sizes = [8, 16], strides = [1, 1]} : vector<8x64xf32> to vector<8x16xf32>
    %145 = vector.extract_strided_slice %140 {offsets = [0, 0], sizes = [5, 16], strides = [1, 1]} : vector<5x64xf32> to vector<5x16xf32>
    %cst_62 = arith.constant dense<0.000000e+00> : vector<8x5xf32>
    %146 = tpu.matmul %144, %145, %cst_62 {dimension_numbers = #tpu.dot_dimension_numbers<[1], [1], [0], [0], [0, 0, 1, 0], [], []>} : vector<8x16xf32>, vector<5x16xf32>, vector<8x5xf32> -> vector<8x5xf32>
    %cst_63 = arith.constant 2.500000e-01 : f32
    %147 = vector.broadcast %cst_63 : f32 to vector<8x5xf32>
    %148 = arith.mulf %146, %147 : vector<8x5xf32>
    %cst_64 = arith.constant dense<0xFF800000> : vector<8xf32>
    %149 = vector.multi_reduction <maximumf>, %148, %cst_64 [1] : vector<8x5xf32> to vector<8xf32>
    %150 = vector.shape_cast %149 : vector<8xf32> to vector<8x1xf32>
    %151 = vector.broadcast %150 : vector<8x1xf32> to vector<8x5xf32>
    %152 = arith.subf %148, %151 : vector<8x5xf32>
    %153 = math.exp %152 : vector<8x5xf32>
    %cst_65 = arith.constant dense<0.000000e+00> : vector<8xf32>
    %154 = vector.multi_reduction <add>, %153, %cst_65 [1] : vector<8x5xf32> to vector<8xf32>
    %155 = vector.shape_cast %154 : vector<8xf32> to vector<8x1xf32>
    %156 = tpu.reciprocal %155 {approx = true} : vector<8x1xf32> -> vector<8x1xf32>
    %157 = vector.broadcast %156 : vector<8x1xf32> to vector<8x5xf32>
    %158 = arith.mulf %153, %157 : vector<8x5xf32>
    %159 = vector.extract_strided_slice %141 {offsets = [0, 0], sizes = [5, 16], strides = [1, 1]} : vector<5x64xf32> to vector<5x16xf32>
    %cst_66 = arith.constant dense<0.000000e+00> : vector<8x16xf32>
    %160 = tpu.matmul %158, %159, %cst_66 {dimension_numbers = #tpu.dot_dimension_numbers<[1], [0], [0], [1], [0, 0, 1, 1], [], []>} : vector<8x5xf32>, vector<5x16xf32>, vector<8x16xf32> -> vector<8x16xf32>
    %161 = vector.extract_strided_slice %142 {offsets = [0, 0], sizes = [16, 64], strides = [1, 1]} : vector<64x64xf32> to vector<16x64xf32>
    %cst_67 = arith.constant dense<0.000000e+00> : vector<8x64xf32>
    %162 = tpu.matmul %160, %161, %cst_67 {dimension_numbers = #tpu.dot_dimension_numbers<[1], [0], [0], [1], [0, 0, 1, 1], [], []>} : vector<8x16xf32>, vector<16x64xf32>, vector<8x64xf32> -> vector<8x64xf32>
    %163 = vector.extract_strided_slice %134 {offsets = [0, 16], sizes = [8, 16], strides = [1, 1]} : vector<8x64xf32> to vector<8x16xf32>
    %164 = vector.extract_strided_slice %140 {offsets = [0, 16], sizes = [5, 16], strides = [1, 1]} : vector<5x64xf32> to vector<5x16xf32>
    %cst_68 = arith.constant dense<0.000000e+00> : vector<8x5xf32>
    %165 = tpu.matmul %163, %164, %cst_68 {dimension_numbers = #tpu.dot_dimension_numbers<[1], [1], [0], [0], [0, 0, 1, 0], [], []>} : vector<8x16xf32>, vector<5x16xf32>, vector<8x5xf32> -> vector<8x5xf32>
    %cst_69 = arith.constant 2.500000e-01 : f32
    %166 = vector.broadcast %cst_69 : f32 to vector<8x5xf32>
    %167 = arith.mulf %165, %166 : vector<8x5xf32>
    %cst_70 = arith.constant dense<0xFF800000> : vector<8xf32>
    %168 = vector.multi_reduction <maximumf>, %167, %cst_70 [1] : vector<8x5xf32> to vector<8xf32>
    %169 = vector.shape_cast %168 : vector<8xf32> to vector<8x1xf32>
    %170 = vector.broadcast %169 : vector<8x1xf32> to vector<8x5xf32>
    %171 = arith.subf %167, %170 : vector<8x5xf32>
    %172 = math.exp %171 : vector<8x5xf32>
    %cst_71 = arith.constant dense<0.000000e+00> : vector<8xf32>
    %173 = vector.multi_reduction <add>, %172, %cst_71 [1] : vector<8x5xf32> to vector<8xf32>
    %174 = vector.shape_cast %173 : vector<8xf32> to vector<8x1xf32>
    %175 = tpu.reciprocal %174 {approx = true} : vector<8x1xf32> -> vector<8x1xf32>
    %176 = vector.broadcast %175 : vector<8x1xf32> to vector<8x5xf32>
    %177 = arith.mulf %172, %176 : vector<8x5xf32>
    %178 = vector.extract_strided_slice %141 {offsets = [0, 16], sizes = [5, 16], strides = [1, 1]} : vector<5x64xf32> to vector<5x16xf32>
    %cst_72 = arith.constant dense<0.000000e+00> : vector<8x16xf32>
    %179 = tpu.matmul %177, %178, %cst_72 {dimension_numbers = #tpu.dot_dimension_numbers<[1], [0], [0], [1], [0, 0, 1, 1], [], []>} : vector<8x5xf32>, vector<5x16xf32>, vector<8x16xf32> -> vector<8x16xf32>
    %180 = vector.extract_strided_slice %142 {offsets = [16, 0], sizes = [16, 64], strides = [1, 1]} : vector<64x64xf32> to vector<16x64xf32>
    %cst_73 = arith.constant dense<0.000000e+00> : vector<8x64xf32>
    %181 = tpu.matmul %179, %180, %cst_73 {dimension_numbers = #tpu.dot_dimension_numbers<[1], [0], [0], [1], [0, 0, 1, 1], [], []>} : vector<8x16xf32>, vector<16x64xf32>, vector<8x64xf32> -> vector<8x64xf32>
    %182 = arith.addf %162, %181 : vector<8x64xf32>
    %183 = vector.extract_strided_slice %134 {offsets = [0, 32], sizes = [8, 16], strides = [1, 1]} : vector<8x64xf32> to vector<8x16xf32>
    %184 = vector.extract_strided_slice %140 {offsets = [0, 32], sizes = [5, 16], strides = [1, 1]} : vector<5x64xf32> to vector<5x16xf32>
    %cst_74 = arith.constant dense<0.000000e+00> : vector<8x5xf32>
    %185 = tpu.matmul %183, %184, %cst_74 {dimension_numbers = #tpu.dot_dimension_numbers<[1], [1], [0], [0], [0, 0, 1, 0], [], []>} : vector<8x16xf32>, vector<5x16xf32>, vector<8x5xf32> -> vector<8x5xf32>
    %cst_75 = arith.constant 2.500000e-01 : f32
    %186 = vector.broadcast %cst_75 : f32 to vector<8x5xf32>
    %187 = arith.mulf %185, %186 : vector<8x5xf32>
    %cst_76 = arith.constant dense<0xFF800000> : vector<8xf32>
    %188 = vector.multi_reduction <maximumf>, %187, %cst_76 [1] : vector<8x5xf32> to vector<8xf32>
    %189 = vector.shape_cast %188 : vector<8xf32> to vector<8x1xf32>
    %190 = vector.broadcast %189 : vector<8x1xf32> to vector<8x5xf32>
    %191 = arith.subf %187, %190 : vector<8x5xf32>
    %192 = math.exp %191 : vector<8x5xf32>
    %cst_77 = arith.constant dense<0.000000e+00> : vector<8xf32>
    %193 = vector.multi_reduction <add>, %192, %cst_77 [1] : vector<8x5xf32> to vector<8xf32>
    %194 = vector.shape_cast %193 : vector<8xf32> to vector<8x1xf32>
    %195 = tpu.reciprocal %194 {approx = true} : vector<8x1xf32> -> vector<8x1xf32>
    %196 = vector.broadcast %195 : vector<8x1xf32> to vector<8x5xf32>
    %197 = arith.mulf %192, %196 : vector<8x5xf32>
    %198 = vector.extract_strided_slice %141 {offsets = [0, 32], sizes = [5, 16], strides = [1, 1]} : vector<5x64xf32> to vector<5x16xf32>
    %cst_78 = arith.constant dense<0.000000e+00> : vector<8x16xf32>
    %199 = tpu.matmul %197, %198, %cst_78 {dimension_numbers = #tpu.dot_dimension_numbers<[1], [0], [0], [1], [0, 0, 1, 1], [], []>} : vector<8x5xf32>, vector<5x16xf32>, vector<8x16xf32> -> vector<8x16xf32>
    %200 = vector.extract_strided_slice %142 {offsets = [32, 0], sizes = [16, 64], strides = [1, 1]} : vector<64x64xf32> to vector<16x64xf32>
    %cst_79 = arith.constant dense<0.000000e+00> : vector<8x64xf32>
    %201 = tpu.matmul %199, %200, %cst_79 {dimension_numbers = #tpu.dot_dimension_numbers<[1], [0], [0], [1], [0, 0, 1, 1], [], []>} : vector<8x16xf32>, vector<16x64xf32>, vector<8x64xf32> -> vector<8x64xf32>
    %202 = arith.addf %182, %201 : vector<8x64xf32>
    %203 = vector.extract_strided_slice %134 {offsets = [0, 48], sizes = [8, 16], strides = [1, 1]} : vector<8x64xf32> to vector<8x16xf32>
    %204 = vector.extract_strided_slice %140 {offsets = [0, 48], sizes = [5, 16], strides = [1, 1]} : vector<5x64xf32> to vector<5x16xf32>
    %cst_80 = arith.constant dense<0.000000e+00> : vector<8x5xf32>
    %205 = tpu.matmul %203, %204, %cst_80 {dimension_numbers = #tpu.dot_dimension_numbers<[1], [1], [0], [0], [0, 0, 1, 0], [], []>} : vector<8x16xf32>, vector<5x16xf32>, vector<8x5xf32> -> vector<8x5xf32>
    %cst_81 = arith.constant 2.500000e-01 : f32
    %206 = vector.broadcast %cst_81 : f32 to vector<8x5xf32>
    %207 = arith.mulf %205, %206 : vector<8x5xf32>
    %cst_82 = arith.constant dense<0xFF800000> : vector<8xf32>
    %208 = vector.multi_reduction <maximumf>, %207, %cst_82 [1] : vector<8x5xf32> to vector<8xf32>
    %209 = vector.shape_cast %208 : vector<8xf32> to vector<8x1xf32>
    %210 = vector.broadcast %209 : vector<8x1xf32> to vector<8x5xf32>
    %211 = arith.subf %207, %210 : vector<8x5xf32>
    %212 = math.exp %211 : vector<8x5xf32>
    %cst_83 = arith.constant dense<0.000000e+00> : vector<8xf32>
    %213 = vector.multi_reduction <add>, %212, %cst_83 [1] : vector<8x5xf32> to vector<8xf32>
    %214 = vector.shape_cast %213 : vector<8xf32> to vector<8x1xf32>
    %215 = tpu.reciprocal %214 {approx = true} : vector<8x1xf32> -> vector<8x1xf32>
    %216 = vector.broadcast %215 : vector<8x1xf32> to vector<8x5xf32>
    %217 = arith.mulf %212, %216 : vector<8x5xf32>
    %218 = vector.extract_strided_slice %141 {offsets = [0, 48], sizes = [5, 16], strides = [1, 1]} : vector<5x64xf32> to vector<5x16xf32>
    %cst_84 = arith.constant dense<0.000000e+00> : vector<8x16xf32>
    %219 = tpu.matmul %217, %218, %cst_84 {dimension_numbers = #tpu.dot_dimension_numbers<[1], [0], [0], [1], [0, 0, 1, 1], [], []>} : vector<8x5xf32>, vector<5x16xf32>, vector<8x16xf32> -> vector<8x16xf32>
    %220 = vector.extract_strided_slice %142 {offsets = [48, 0], sizes = [16, 64], strides = [1, 1]} : vector<64x64xf32> to vector<16x64xf32>
    %cst_85 = arith.constant dense<0.000000e+00> : vector<8x64xf32>
    %221 = tpu.matmul %219, %220, %cst_85 {dimension_numbers = #tpu.dot_dimension_numbers<[1], [0], [0], [1], [0, 0, 1, 1], [], []>} : vector<8x16xf32>, vector<16x64xf32>, vector<8x64xf32> -> vector<8x64xf32>
    %222 = arith.addf %202, %221 : vector<8x64xf32>
    %223 = vector.broadcast %143 : vector<1x64xf32> to vector<8x64xf32>
    %224 = arith.addf %222, %223 : vector<8x64xf32>
    %225 = arith.addf %129, %224 : vector<8x64xf32>
    %c0_86 = arith.constant 0 : index
    %c0_87 = arith.constant 0 : index
    %226 = vector.load %arg15[%c0_86, %c0_87] : memref<1x64xf32, #tpu.memory_space<vmem>>, vector<1x64xf32>
    %c0_88 = arith.constant 0 : index
    %c0_89 = arith.constant 0 : index
    %227 = vector.load %arg16[%c0_88, %c0_89] : memref<1x64xf32, #tpu.memory_space<vmem>>, vector<1x64xf32>
    %cst_90 = arith.constant dense<0.000000e+00> : vector<8xf32>
    %228 = vector.multi_reduction <add>, %225, %cst_90 [1] : vector<8x64xf32> to vector<8xf32>
    %229 = vector.shape_cast %228 : vector<8xf32> to vector<8x1xf32>
    %cst_91 = arith.constant 6.400000e+01 : f32
    %230 = vector.broadcast %cst_91 : f32 to vector<8x1xf32>
    %231 = arith.divf %229, %230 : vector<8x1xf32>
    %232 = vector.broadcast %231 : vector<8x1xf32> to vector<8x64xf32>
    %233 = arith.subf %225, %232 : vector<8x64xf32>
    %234 = arith.mulf %233, %233 : vector<8x64xf32>
    %cst_92 = arith.constant dense<0.000000e+00> : vector<8xf32>
    %235 = vector.multi_reduction <add>, %234, %cst_92 [1] : vector<8x64xf32> to vector<8xf32>
    %236 = vector.shape_cast %235 : vector<8xf32> to vector<8x1xf32>
    %cst_93 = arith.constant 6.400000e+01 : f32
    %237 = vector.broadcast %cst_93 : f32 to vector<8x1xf32>
    %238 = arith.divf %236, %237 : vector<8x1xf32>
    %239 = vector.broadcast %231 : vector<8x1xf32> to vector<8x64xf32>
    %240 = arith.subf %225, %239 : vector<8x64xf32>
    %cst_94 = arith.constant 9.99999974E-6 : f32
    %241 = vector.broadcast %cst_94 : f32 to vector<8x1xf32>
    %242 = arith.addf %238, %241 : vector<8x1xf32>
    %243 = math.rsqrt %242 : vector<8x1xf32>
    %244 = vector.broadcast %243 : vector<8x1xf32> to vector<8x64xf32>
    %245 = arith.mulf %240, %244 : vector<8x64xf32>
    %246 = vector.broadcast %226 : vector<1x64xf32> to vector<8x64xf32>
    %247 = arith.mulf %245, %246 : vector<8x64xf32>
    %248 = vector.broadcast %227 : vector<1x64xf32> to vector<8x64xf32>
    %249 = arith.addf %247, %248 : vector<8x64xf32>
    %c0_95 = arith.constant 0 : index
    %c0_96 = arith.constant 0 : index
    %250 = vector.load %arg19[%c0_95, %c0_96] : memref<64x128xf32, #tpu.memory_space<vmem>>, vector<64x128xf32>
    %cst_97 = arith.constant dense<0.000000e+00> : vector<8x128xf32>
    %251 = tpu.matmul %249, %250, %cst_97 {dimension_numbers = #tpu.dot_dimension_numbers<[1], [0], [0], [1], [0, 0, 1, 1], [], []>} : vector<8x64xf32>, vector<64x128xf32>, vector<8x128xf32> -> vector<8x128xf32>
    %c0_98 = arith.constant 0 : index
    %c0_99 = arith.constant 0 : index
    %252 = vector.load %arg20[%c0_98, %c0_99] : memref<1x128xf32, #tpu.memory_space<vmem>>, vector<1x128xf32>
    %253 = vector.broadcast %252 : vector<1x128xf32> to vector<8x128xf32>
    %254 = arith.addf %251, %253 : vector<8x128xf32>
    %cst_100 = arith.constant 0.000000e+00 : f32
    %255 = vector.broadcast %cst_100 : f32 to vector<8x128xf32>
    %256 = arith.maximumf %254, %255 : vector<8x128xf32>
    %c0_101 = arith.constant 0 : index
    %c0_102 = arith.constant 0 : index
    %257 = vector.load %arg21[%c0_101, %c0_102] : memref<128x64xf32, #tpu.memory_space<vmem>>, vector<128x64xf32>
    %cst_103 = arith.constant dense<0.000000e+00> : vector<8x64xf32>
    %258 = tpu.matmul %256, %257, %cst_103 {dimension_numbers = #tpu.dot_dimension_numbers<[1], [0], [0], [1], [0, 0, 1, 1], [], []>} : vector<8x128xf32>, vector<128x64xf32>, vector<8x64xf32> -> vector<8x64xf32>
    %c0_104 = arith.constant 0 : index
    %c0_105 = arith.constant 0 : index
    %259 = vector.load %arg22[%c0_104, %c0_105] : memref<1x64xf32, #tpu.memory_space<vmem>>, vector<1x64xf32>
    %260 = vector.broadcast %259 : vector<1x64xf32> to vector<8x64xf32>
    %261 = arith.addf %258, %260 : vector<8x64xf32>
    %262 = arith.addf %249, %261 : vector<8x64xf32>
    %c0_106 = arith.constant 0 : index
    %c0_107 = arith.constant 0 : index
    %263 = vector.load %arg17[%c0_106, %c0_107] : memref<1x64xf32, #tpu.memory_space<vmem>>, vector<1x64xf32>
    %c0_108 = arith.constant 0 : index
    %c0_109 = arith.constant 0 : index
    %264 = vector.load %arg18[%c0_108, %c0_109] : memref<1x64xf32, #tpu.memory_space<vmem>>, vector<1x64xf32>
    %cst_110 = arith.constant dense<0.000000e+00> : vector<8xf32>
    %265 = vector.multi_reduction <add>, %262, %cst_110 [1] : vector<8x64xf32> to vector<8xf32>
    %266 = vector.shape_cast %265 : vector<8xf32> to vector<8x1xf32>
    %cst_111 = arith.constant 6.400000e+01 : f32
    %267 = vector.broadcast %cst_111 : f32 to vector<8x1xf32>
    %268 = arith.divf %266, %267 : vector<8x1xf32>
    %269 = vector.broadcast %268 : vector<8x1xf32> to vector<8x64xf32>
    %270 = arith.subf %262, %269 : vector<8x64xf32>
    %271 = arith.mulf %270, %270 : vector<8x64xf32>
    %cst_112 = arith.constant dense<0.000000e+00> : vector<8xf32>
    %272 = vector.multi_reduction <add>, %271, %cst_112 [1] : vector<8x64xf32> to vector<8xf32>
    %273 = vector.shape_cast %272 : vector<8xf32> to vector<8x1xf32>
    %cst_113 = arith.constant 6.400000e+01 : f32
    %274 = vector.broadcast %cst_113 : f32 to vector<8x1xf32>
    %275 = arith.divf %273, %274 : vector<8x1xf32>
    %276 = vector.broadcast %268 : vector<8x1xf32> to vector<8x64xf32>
    %277 = arith.subf %262, %276 : vector<8x64xf32>
    %cst_114 = arith.constant 9.99999974E-6 : f32
    %278 = vector.broadcast %cst_114 : f32 to vector<8x1xf32>
    %279 = arith.addf %275, %278 : vector<8x1xf32>
    %280 = math.rsqrt %279 : vector<8x1xf32>
    %281 = vector.broadcast %280 : vector<8x1xf32> to vector<8x64xf32>
    %282 = arith.mulf %277, %281 : vector<8x64xf32>
    %283 = vector.broadcast %263 : vector<1x64xf32> to vector<8x64xf32>
    %284 = arith.mulf %282, %283 : vector<8x64xf32>
    %285 = vector.broadcast %264 : vector<1x64xf32> to vector<8x64xf32>
    %286 = arith.addf %284, %285 : vector<8x64xf32>
    %c0_115 = arith.constant 0 : index
    %c0_116 = arith.constant 0 : index
    %c0_117 = arith.constant 0 : index
    %287 = vector.load %arg23[%c0_115, %c0_116, %c0_117] : memref<1x8x64xf32, #tpu.memory_space<vmem>>, vector<1x8x64xf32>
    %288 = vector.shape_cast %287 : vector<1x8x64xf32> to vector<8x64xf32>
    %289 = vector.shape_cast %286 : vector<8x64xf32> to vector<1x8x64xf32>
    tpu.vector_store %arg23[%c0_115, %c0_116, %c0_117], %289 {strides = array<i32>} : memref<1x8x64xf32, #tpu.memory_space<vmem>>, vector<1x8x64xf32>,
    return
  }
  func.func @transform_0(%arg0: i32) -> (i32, i32, i32) {
    %c0_i32 = arith.constant 0 : i32
    %c0_i32_0 = arith.constant 0 : i32
    %c0_i32_1 = arith.constant 0 : i32
    return %arg0, %c0_i32, %c0_i32_0 : i32, i32, i32
  }
  func.func @transform_1(%arg0: i32) -> (i32, i32, i32) {
    %c0_i32 = arith.constant 0 : i32
    %c0_i32_0 = arith.constant 0 : i32
    %c0_i32_1 = arith.constant 0 : i32
    return %arg0, %c0_i32, %c0_i32_0 : i32, i32, i32
  }
  func.func @transform_2(%arg0: i32) -> (i32, i32) {
    %c0_i32 = arith.constant 0 : i32
    %c0_i32_0 = arith.constant 0 : i32
    %c0_i32_1 = arith.constant 0 : i32
    return %c0_i32, %c0_i32_0 : i32, i32
  }
  func.func @transform_3(%arg0: i32) -> (i32, i32) {
    %c0_i32 = arith.constant 0 : i32
    %c0_i32_0 = arith.constant 0 : i32
    %c0_i32_1 = arith.constant 0 : i32
    return %c0_i32, %c0_i32_0 : i32, i32
  }
  func.func @transform_4(%arg0: i32) -> (i32, i32) {
    %c0_i32 = arith.constant 0 : i32
    %c0_i32_0 = arith.constant 0 : i32
    %c0_i32_1 = arith.constant 0 : i32
    return %c0_i32, %c0_i32_0 : i32, i32
  }
  func.func @transform_5(%arg0: i32) -> (i32, i32) {
    %c0_i32 = arith.constant 0 : i32
    %c0_i32_0 = arith.constant 0 : i32
    %c0_i32_1 = arith.constant 0 : i32
    return %c0_i32, %c0_i32_0 : i32, i32
  }
  func.func @transform_6(%arg0: i32) -> (i32, i32) {
    %c0_i32 = arith.constant 0 : i32
    %c0_i32_0 = arith.constant 0 : i32
    %c0_i32_1 = arith.constant 0 : i32
    return %c0_i32, %c0_i32_0 : i32, i32
  }
  func.func @transform_7(%arg0: i32) -> (i32, i32) {
    %c0_i32 = arith.constant 0 : i32
    %c0_i32_0 = arith.constant 0 : i32
    %c0_i32_1 = arith.constant 0 : i32
    return %c0_i32, %c0_i32_0 : i32, i32
  }
  func.func @transform_8(%arg0: i32) -> (i32, i32) {
    %c0_i32 = arith.constant 0 : i32
    %c0_i32_0 = arith.constant 0 : i32
    %c0_i32_1 = arith.constant 0 : i32
    return %c0_i32, %c0_i32_0 : i32, i32
  }
  func.func @transform_9(%arg0: i32) -> (i32, i32) {
    %c0_i32 = arith.constant 0 : i32
    %c0_i32_0 = arith.constant 0 : i32
    %c0_i32_1 = arith.constant 0 : i32
    return %c0_i32, %c0_i32_0 : i32, i32
  }
  func.func @transform_10(%arg0: i32) -> (i32, i32) {
    %c0_i32 = arith.constant 0 : i32
    %c0_i32_0 = arith.constant 0 : i32
    %c0_i32_1 = arith.constant 0 : i32
    return %c0_i32, %c0_i32_0 : i32, i32
  }
  func.func @transform_11(%arg0: i32) -> (i32, i32) {
    %c0_i32 = arith.constant 0 : i32
    %c0_i32_0 = arith.constant 0 : i32
    %c0_i32_1 = arith.constant 0 : i32
    return %c0_i32, %c0_i32_0 : i32, i32
  }
  func.func @transform_12(%arg0: i32) -> (i32, i32) {
    %c0_i32 = arith.constant 0 : i32
    %c0_i32_0 = arith.constant 0 : i32
    %c0_i32_1 = arith.constant 0 : i32
    return %c0_i32, %c0_i32_0 : i32, i32
  }
  func.func @transform_13(%arg0: i32) -> (i32, i32) {
    %c0_i32 = arith.constant 0 : i32
    %c0_i32_0 = arith.constant 0 : i32
    %c0_i32_1 = arith.constant 0 : i32
    return %c0_i32, %c0_i32_0 : i32, i32
  }
  func.func @transform_14(%arg0: i32) -> (i32, i32) {
    %c0_i32 = arith.constant 0 : i32
    %c0_i32_0 = arith.constant 0 : i32
    %c0_i32_1 = arith.constant 0 : i32
    return %c0_i32, %c0_i32_0 : i32, i32
  }
  func.func @transform_15(%arg0: i32) -> (i32, i32) {
    %c0_i32 = arith.constant 0 : i32
    %c0_i32_0 = arith.constant 0 : i32
    %c0_i32_1 = arith.constant 0 : i32
    return %c0_i32, %c0_i32_0 : i32, i32
  }
  func.func @transform_16(%arg0: i32) -> (i32, i32) {
    %c0_i32 = arith.constant 0 : i32
    %c0_i32_0 = arith.constant 0 : i32
    %c0_i32_1 = arith.constant 0 : i32
    return %c0_i32, %c0_i32_0 : i32, i32
  }
  func.func @transform_17(%arg0: i32) -> (i32, i32) {
    %c0_i32 = arith.constant 0 : i32
    %c0_i32_0 = arith.constant 0 : i32
    %c0_i32_1 = arith.constant 0 : i32
    return %c0_i32, %c0_i32_0 : i32, i32
  }
  func.func @transform_18(%arg0: i32) -> (i32, i32) {
    %c0_i32 = arith.constant 0 : i32
    %c0_i32_0 = arith.constant 0 : i32
    %c0_i32_1 = arith.constant 0 : i32
    return %c0_i32, %c0_i32_0 : i32, i32
  }
  func.func @transform_19(%arg0: i32) -> (i32, i32) {
    %c0_i32 = arith.constant 0 : i32
    %c0_i32_0 = arith.constant 0 : i32
    %c0_i32_1 = arith.constant 0 : i32
    return %c0_i32, %c0_i32_0 : i32, i32
  }
  func.func @transform_20(%arg0: i32) -> (i32, i32) {
    %c0_i32 = arith.constant 0 : i32
    %c0_i32_0 = arith.constant 0 : i32
    %c0_i32_1 = arith.constant 0 : i32
    return %c0_i32, %c0_i32_0 : i32, i32
  }
  func.func @transform_21(%arg0: i32) -> (i32, i32) {
    %c0_i32 = arith.constant 0 : i32
    %c0_i32_0 = arith.constant 0 : i32
    %c0_i32_1 = arith.constant 0 : i32
    return %c0_i32, %c0_i32_0 : i32, i32
  }
  func.func @transform_22(%arg0: i32) -> (i32, i32, i32) {
    %c0_i32 = arith.constant 0 : i32
    %c0_i32_0 = arith.constant 0 : i32
    %c0_i32_1 = arith.constant 0 : i32
    return %arg0, %c0_i32, %c0_i32_0 : i32, i32, i32
  }
}

module attributes {stable_mosaic.version = 11 : i64} {
  func.func @_decoder_layer_kernel(%arg0: i32, %arg1: memref<1x8x64xf32, #tpu.memory_space<vmem>>, %arg2: memref<1x5x64xf32, #tpu.memory_space<vmem>>, %arg3: memref<64x192xf32, #tpu.memory_space<vmem>>, %arg4: memref<1x192xf32, #tpu.memory_space<vmem>>, %arg5: memref<64x64xf32, #tpu.memory_space<vmem>>, %arg6: memref<1x64xf32, #tpu.memory_space<vmem>>, %arg7: memref<64x64xf32, #tpu.memory_space<vmem>>, %arg8: memref<1x64xf32, #tpu.memory_space<vmem>>, %arg9: memref<64x128xf32, #tpu.memory_space<vmem>>, %arg10: memref<1x128xf32, #tpu.memory_space<vmem>>, %arg11: memref<64x64xf32, #tpu.memory_space<vmem>>, %arg12: memref<1x64xf32, #tpu.memory_space<vmem>>, %arg13: memref<1x64xf32, #tpu.memory_space<vmem>>, %arg14: memref<1x64xf32, #tpu.memory_space<vmem>>, %arg15: memref<1x64xf32, #tpu.memory_space<vmem>>, %arg16: memref<1x64xf32, #tpu.memory_space<vmem>>, %arg17: memref<1x64xf32, #tpu.memory_space<vmem>>, %arg18: memref<1x64xf32, #tpu.memory_space<vmem>>, %arg19: memref<64x128xf32, #tpu.memory_space<vmem>>, %arg20: memref<1x128xf32, #tpu.memory_space<vmem>>, %arg21: memref<128x64xf32, #tpu.memory_space<vmem>>, %arg22: memref<1x64xf32, #tpu.memory_space<vmem>>, %arg23: memref<1x8x64xf32, #tpu.memory_space<vmem>>) attributes {dimension_semantics = [#tpu.dimension_semantics<parallel>], iteration_bounds = array<i64: 2>, scalar_prefetch = 0 : i64, scratch_operands = 0 : i64, tpu.core_type = #tpu.core_type<tc>, window_params = [{transform_indices = @transform_0, window_bounds = array<i64: 1, 8, 64>}, {transform_indices = @transform_1, window_bounds = array<i64: 1, 5, 64>}, {pipeline_mode = #tpu.pipeline_mode<synchronous>, transform_indices = @transform_2, window_bounds = array<i64: 64, 192>}, {pipeline_mode = #tpu.pipeline_mode<synchronous>, transform_indices = @transform_3, window_bounds = array<i64: 1, 192>}, {pipeline_mode = #tpu.pipeline_mode<synchronous>, transform_indices = @transform_4, window_bounds = array<i64: 64, 64>}, {pipeline_mode = #tpu.pipeline_mode<synchronous>, transform_indices = @transform_5, window_bounds = array<i64: 1, 64>}, {pipeline_mode = #tpu.pipeline_mode<synchronous>, transform_indices = @transform_6, window_bounds = array<i64: 64, 64>}, {pipeline_mode = #tpu.pipeline_mode<synchronous>, transform_indices = @transform_7, window_bounds = array<i64: 1, 64>}, {pipeline_mode = #tpu.pipeline_mode<synchronous>, transform_indices = @transform_8, window_bounds = array<i64: 64, 128>}, {pipeline_mode = #tpu.pipeline_mode<synchronous>, transform_indices = @transform_9, window_bounds = array<i64: 1, 128>}, {pipeline_mode = #tpu.pipeline_mode<synchronous>, transform_indices = @transform_10, window_bounds = array<i64: 64, 64>}, {pipeline_mode = #tpu.pipeline_mode<synchronous>, transform_indices = @transform_11, window_bounds = array<i64: 1, 64>}, {pipeline_mode = #tpu.pipeline_mode<synchronous>, transform_indices = @transform_12, window_bounds = array<i64: 1, 64>}, {pipeline_mode = #tpu.pipeline_mode<synchronous>, transform_indices = @transform_13, window_bounds = array<i64: 1, 64>}, {pipeline_mode = #tpu.pipeline_mode<synchronous>, transform_indices = @transform_14, window_bounds = array<i64: 1, 64>}, {pipeline_mode = #tpu.pipeline_mode<synchronous>, transform_indices = @transform_15, window_bounds = array<i64: 1, 64>}, {pipeline_mode = #tpu.pipeline_mode<synchronous>, transform_indices = @transform_16, window_bounds = array<i64: 1, 64>}, {pipeline_mode = #tpu.pipeline_mode<synchronous>, transform_indices = @transform_17, window_bounds = array<i64: 1, 64>}, {pipeline_mode = #tpu.pipeline_mode<synchronous>, transform_indices = @transform_18, window_bounds = array<i64: 64, 128>}, {pipeline_mode = #tpu.pipeline_mode<synchronous>, transform_indices = @transform_19, window_bounds = array<i64: 1, 128>}, {pipeline_mode = #tpu.pipeline_mode<synchronous>, transform_indices = @transform_20, window_bounds = array<i64: 128, 64>}, {pipeline_mode = #tpu.pipeline_mode<synchronous>, transform_indices = @transform_21, window_bounds = array<i64: 1, 64>}, {transform_indices = @transform_22, window_bounds = array<i64: 1, 8, 64>}]} {
    %c0 = arith.constant 0 : index
    %c0_0 = arith.constant 0 : index
    %c0_1 = arith.constant 0 : index
    %0 = vector.load %arg1[%c0, %c0_0, %c0_1] : memref<1x8x64xf32, #tpu.memory_space<vmem>>, vector<1x8x64xf32>
    %1 = vector.shape_cast %0 : vector<1x8x64xf32> to vector<8x64xf32>
    %c0_2 = arith.constant 0 : index
    %c0_3 = arith.constant 0 : index
    %c0_4 = arith.constant 0 : index
    %2 = vector.load %arg2[%c0_2, %c0_3, %c0_4] : memref<1x5x64xf32, #tpu.memory_space<vmem>>, vector<1x5x64xf32>
    %3 = vector.shape_cast %2 : vector<1x5x64xf32> to vector<5x64xf32>
    %c0_5 = arith.constant 0 : index
    %c0_6 = arith.constant 0 : index
    %4 = vector.load %arg3[%c0_5, %c0_6] : memref<64x192xf32, #tpu.memory_space<vmem>>, vector<64x192xf32>
    %cst = arith.constant dense<0.000000e+00> : vector<8x192xf32>
    %5 = tpu.matmul %1, %4, %cst {dimension_numbers = #tpu.dot_dimension_numbers<[1], [0], [0], [1], [0, 0, 1, 1], [], []>} : vector<8x64xf32>, vector<64x192xf32>, vector<8x192xf32> -> vector<8x192xf32>
    %c0_7 = arith.constant 0 : index
    %c0_8 = arith.constant 0 : index
    %6 = vector.load %arg4[%c0_7, %c0_8] : memref<1x192xf32, #tpu.memory_space<vmem>>, vector<1x192xf32>
    %7 = vector.broadcast %6 : vector<1x192xf32> to vector<8x192xf32>
    %8 = arith.addf %5, %7 : vector<8x192xf32>
    %9 = vector.extract_strided_slice %8 {offsets = [0, 0], sizes = [8, 64], strides = [1, 1]} : vector<8x192xf32> to vector<8x64xf32>
    %10 = vector.extract_strided_slice %8 {offsets = [0, 64], sizes = [8, 64], strides = [1, 1]} : vector<8x192xf32> to vector<8x64xf32>
    %11 = vector.extract_strided_slice %8 {offsets = [0, 128], sizes = [8, 64], strides = [1, 1]} : vector<8x192xf32> to vector<8x64xf32>
    %c0_9 = arith.constant 0 : index
    %c0_10 = arith.constant 0 : index
    %12 = vector.load %arg5[%c0_9, %c0_10] : memref<64x64xf32, #tpu.memory_space<vmem>>, vector<64x64xf32>
    %c0_11 = arith.constant 0 : index
    %c0_12 = arith.constant 0 : index
    %13 = vector.load %arg6[%c0_11, %c0_12] : memref<1x64xf32, #tpu.memory_space<vmem>>, vector<1x64xf32>
    %14 = tpu.iota {dimensions = array<i32: 0>} : vector<8x8xi32>
    %15 = tpu.iota {dimensions = array<i32: 1>} : vector<8x8xi32>
    %16 = arith.cmpi sge, %14, %15 : vector<8x8xi32>
    %cst_13 = arith.constant 0.000000e+00 : f32
    %cst_14 = arith.constant -1.000000e+09 : f32
    %17 = vector.broadcast %cst_13 : f32 to vector<8x8xf32>
    %18 = vector.broadcast %cst_14 : f32 to vector<8x8xf32>
    %19 = arith.select %16, %17, %18 : vector<8x8xi1>, vector<8x8xf32>
    %20 = vector.extract_strided_slice %9 {offsets = [0, 0], sizes = [8, 16], strides = [1, 1]} : vector<8x64xf32> to vector<8x16xf32>
    %21 = vector.extract_strided_slice %10 {offsets = [0, 0], sizes = [8, 16], strides = [1, 1]} : vector<8x64xf32> to vector<8x16xf32>
    %cst_15 = arith.constant dense<0.000000e+00> : vector<8x8xf32>
    %22 = tpu.matmul %20, %21, %cst_15 {dimension_numbers = #tpu.dot_dimension_numbers<[1], [1], [0], [0], [0, 0, 1, 0], [], []>} : vector<8x16xf32>, vector<8x16xf32>, vector<8x8xf32> -> vector<8x8xf32>
    %cst_16 = arith.constant 2.500000e-01 : f32
    %23 = vector.broadcast %cst_16 : f32 to vector<8x8xf32>
    %24 = arith.mulf %22, %23 : vector<8x8xf32>
    %25 = arith.addf %24, %19 : vector<8x8xf32>
    %cst_17 = arith.constant dense<0xFF800000> : vector<8xf32>
    %26 = vector.multi_reduction <maximumf>, %25, %cst_17 [1] : vector<8x8xf32> to vector<8xf32>
    %27 = vector.shape_cast %26 : vector<8xf32> to vector<8x1xf32>
    %28 = vector.broadcast %27 : vector<8x1xf32> to vector<8x8xf32>
    %29 = arith.subf %25, %28 : vector<8x8xf32>
    %30 = math.exp %29 : vector<8x8xf32>
    %cst_18 = arith.constant dense<0.000000e+00> : vector<8xf32>
    %31 = vector.multi_reduction <add>, %30, %cst_18 [1] : vector<8x8xf32> to vector<8xf32>
    %32 = vector.shape_cast %31 : vector<8xf32> to vector<8x1xf32>
    %33 = tpu.reciprocal %32 {approx = true} : vector<8x1xf32> -> vector<8x1xf32>
    %34 = vector.broadcast %33 : vector<8x1xf32> to vector<8x8xf32>
    %35 = arith.mulf %30, %34 : vector<8x8xf32>
    %36 = vector.extract_strided_slice %11 {offsets = [0, 0], sizes = [8, 16], strides = [1, 1]} : vector<8x64xf32> to vector<8x16xf32>
    %cst_19 = arith.constant dense<0.000000e+00> : vector<8x16xf32>
    %37 = tpu.matmul %35, %36, %cst_19 {dimension_numbers = #tpu.dot_dimension_numbers<[1], [0], [0], [1], [0, 0, 1, 1], [], []>} : vector<8x8xf32>, vector<8x16xf32>, vector<8x16xf32> -> vector<8x16xf32>
    %38 = vector.extract_strided_slice %12 {offsets = [0, 0], sizes = [16, 64], strides = [1, 1]} : vector<64x64xf32> to vector<16x64xf32>
    %cst_20 = arith.constant dense<0.000000e+00> : vector<8x64xf32>
    %39 = tpu.matmul %37, %38, %cst_20 {dimension_numbers = #tpu.dot_dimension_numbers<[1], [0], [0], [1], [0, 0, 1, 1], [], []>} : vector<8x16xf32>, vector<16x64xf32>, vector<8x64xf32> -> vector<8x64xf32>
    %40 = vector.extract_strided_slice %9 {offsets = [0, 16], sizes = [8, 16], strides = [1, 1]} : vector<8x64xf32> to vector<8x16xf32>
    %41 = vector.extract_strided_slice %10 {offsets = [0, 16], sizes = [8, 16], strides = [1, 1]} : vector<8x64xf32> to vector<8x16xf32>
    %cst_21 = arith.constant dense<0.000000e+00> : vector<8x8xf32>
    %42 = tpu.matmul %40, %41, %cst_21 {dimension_numbers = #tpu.dot_dimension_numbers<[1], [1], [0], [0], [0, 0, 1, 0], [], []>} : vector<8x16xf32>, vector<8x16xf32>, vector<8x8xf32> -> vector<8x8xf32>
    %cst_22 = arith.constant 2.500000e-01 : f32
    %43 = vector.broadcast %cst_22 : f32 to vector<8x8xf32>
    %44 = arith.mulf %42, %43 : vector<8x8xf32>
    %45 = arith.addf %44, %19 : vector<8x8xf32>
    %cst_23 = arith.constant dense<0xFF800000> : vector<8xf32>
    %46 = vector.multi_reduction <maximumf>, %45, %cst_23 [1] : vector<8x8xf32> to vector<8xf32>
    %47 = vector.shape_cast %46 : vector<8xf32> to vector<8x1xf32>
    %48 = vector.broadcast %47 : vector<8x1xf32> to vector<8x8xf32>
    %49 = arith.subf %45, %48 : vector<8x8xf32>
    %50 = math.exp %49 : vector<8x8xf32>
    %cst_24 = arith.constant dense<0.000000e+00> : vector<8xf32>
    %51 = vector.multi_reduction <add>, %50, %cst_24 [1] : vector<8x8xf32> to vector<8xf32>
    %52 = vector.shape_cast %51 : vector<8xf32> to vector<8x1xf32>
    %53 = tpu.reciprocal %52 {approx = true} : vector<8x1xf32> -> vector<8x1xf32>
    %54 = vector.broadcast %53 : vector<8x1xf32> to vector<8x8xf32>
    %55 = arith.mulf %50, %54 : vector<8x8xf32>
    %56 = vector.extract_strided_slice %11 {offsets = [0, 16], sizes = [8, 16], strides = [1, 1]} : vector<8x64xf32> to vector<8x16xf32>
    %cst_25 = arith.constant dense<0.000000e+00> : vector<8x16xf32>
    %57 = tpu.matmul %55, %56, %cst_25 {dimension_numbers = #tpu.dot_dimension_numbers<[1], [0], [0], [1], [0, 0, 1, 1], [], []>} : vector<8x8xf32>, vector<8x16xf32>, vector<8x16xf32> -> vector<8x16xf32>
    %58 = vector.extract_strided_slice %12 {offsets = [16, 0], sizes = [16, 64], strides = [1, 1]} : vector<64x64xf32> to vector<16x64xf32>
    %cst_26 = arith.constant dense<0.000000e+00> : vector<8x64xf32>
    %59 = tpu.matmul %57, %58, %cst_26 {dimension_numbers = #tpu.dot_dimension_numbers<[1], [0], [0], [1], [0, 0, 1, 1], [], []>} : vector<8x16xf32>, vector<16x64xf32>, vector<8x64xf32> -> vector<8x64xf32>
    %60 = arith.addf %39, %59 : vector<8x64xf32>
    %61 = vector.extract_strided_slice %9 {offsets = [0, 32], sizes = [8, 16], strides = [1, 1]} : vector<8x64xf32> to vector<8x16xf32>
    %62 = vector.extract_strided_slice %10 {offsets = [0, 32], sizes = [8, 16], strides = [1, 1]} : vector<8x64xf32> to vector<8x16xf32>
    %cst_27 = arith.constant dense<0.000000e+00> : vector<8x8xf32>
    %63 = tpu.matmul %61, %62, %cst_27 {dimension_numbers = #tpu.dot_dimension_numbers<[1], [1], [0], [0], [0, 0, 1, 0], [], []>} : vector<8x16xf32>, vector<8x16xf32>, vector<8x8xf32> -> vector<8x8xf32>
    %cst_28 = arith.constant 2.500000e-01 : f32
    %64 = vector.broadcast %cst_28 : f32 to vector<8x8xf32>
    %65 = arith.mulf %63, %64 : vector<8x8xf32>
    %66 = arith.addf %65, %19 : vector<8x8xf32>
    %cst_29 = arith.constant dense<0xFF800000> : vector<8xf32>
    %67 = vector.multi_reduction <maximumf>, %66, %cst_29 [1] : vector<8x8xf32> to vector<8xf32>
    %68 = vector.shape_cast %67 : vector<8xf32> to vector<8x1xf32>
    %69 = vector.broadcast %68 : vector<8x1xf32> to vector<8x8xf32>
    %70 = arith.subf %66, %69 : vector<8x8xf32>
    %71 = math.exp %70 : vector<8x8xf32>
    %cst_30 = arith.constant dense<0.000000e+00> : vector<8xf32>
    %72 = vector.multi_reduction <add>, %71, %cst_30 [1] : vector<8x8xf32> to vector<8xf32>
    %73 = vector.shape_cast %72 : vector<8xf32> to vector<8x1xf32>
    %74 = tpu.reciprocal %73 {approx = true} : vector<8x1xf32> -> vector<8x1xf32>
    %75 = vector.broadcast %74 : vector<8x1xf32> to vector<8x8xf32>
    %76 = arith.mulf %71, %75 : vector<8x8xf32>
    %77 = vector.extract_strided_slice %11 {offsets = [0, 32], sizes = [8, 16], strides = [1, 1]} : vector<8x64xf32> to vector<8x16xf32>
    %cst_31 = arith.constant dense<0.000000e+00> : vector<8x16xf32>
    %78 = tpu.matmul %76, %77, %cst_31 {dimension_numbers = #tpu.dot_dimension_numbers<[1], [0], [0], [1], [0, 0, 1, 1], [], []>} : vector<8x8xf32>, vector<8x16xf32>, vector<8x16xf32> -> vector<8x16xf32>
    %79 = vector.extract_strided_slice %12 {offsets = [32, 0], sizes = [16, 64], strides = [1, 1]} : vector<64x64xf32> to vector<16x64xf32>
    %cst_32 = arith.constant dense<0.000000e+00> : vector<8x64xf32>
    %80 = tpu.matmul %78, %79, %cst_32 {dimension_numbers = #tpu.dot_dimension_numbers<[1], [0], [0], [1], [0, 0, 1, 1], [], []>} : vector<8x16xf32>, vector<16x64xf32>, vector<8x64xf32> -> vector<8x64xf32>
    %81 = arith.addf %60, %80 : vector<8x64xf32>
    %82 = vector.extract_strided_slice %9 {offsets = [0, 48], sizes = [8, 16], strides = [1, 1]} : vector<8x64xf32> to vector<8x16xf32>
    %83 = vector.extract_strided_slice %10 {offsets = [0, 48], sizes = [8, 16], strides = [1, 1]} : vector<8x64xf32> to vector<8x16xf32>
    %cst_33 = arith.constant dense<0.000000e+00> : vector<8x8xf32>
    %84 = tpu.matmul %82, %83, %cst_33 {dimension_numbers = #tpu.dot_dimension_numbers<[1], [1], [0], [0], [0, 0, 1, 0], [], []>} : vector<8x16xf32>, vector<8x16xf32>, vector<8x8xf32> -> vector<8x8xf32>
    %cst_34 = arith.constant 2.500000e-01 : f32
    %85 = vector.broadcast %cst_34 : f32 to vector<8x8xf32>
    %86 = arith.mulf %84, %85 : vector<8x8xf32>
    %87 = arith.addf %86, %19 : vector<8x8xf32>
    %cst_35 = arith.constant dense<0xFF800000> : vector<8xf32>
    %88 = vector.multi_reduction <maximumf>, %87, %cst_35 [1] : vector<8x8xf32> to vector<8xf32>
    %89 = vector.shape_cast %88 : vector<8xf32> to vector<8x1xf32>
    %90 = vector.broadcast %89 : vector<8x1xf32> to vector<8x8xf32>
    %91 = arith.subf %87, %90 : vector<8x8xf32>
    %92 = math.exp %91 : vector<8x8xf32>
    %cst_36 = arith.constant dense<0.000000e+00> : vector<8xf32>
    %93 = vector.multi_reduction <add>, %92, %cst_36 [1] : vector<8x8xf32> to vector<8xf32>
    %94 = vector.shape_cast %93 : vector<8xf32> to vector<8x1xf32>
    %95 = tpu.reciprocal %94 {approx = true} : vector<8x1xf32> -> vector<8x1xf32>
    %96 = vector.broadcast %95 : vector<8x1xf32> to vector<8x8xf32>
    %97 = arith.mulf %92, %96 : vector<8x8xf32>
    %98 = vector.extract_strided_slice %11 {offsets = [0, 48], sizes = [8, 16], strides = [1, 1]} : vector<8x64xf32> to vector<8x16xf32>
    %cst_37 = arith.constant dense<0.000000e+00> : vector<8x16xf32>
    %99 = tpu.matmul %97, %98, %cst_37 {dimension_numbers = #tpu.dot_dimension_numbers<[1], [0], [0], [1], [0, 0, 1, 1], [], []>} : vector<8x8xf32>, vector<8x16xf32>, vector<8x16xf32> -> vector<8x16xf32>
    %100 = vector.extract_strided_slice %12 {offsets = [48, 0], sizes = [16, 64], strides = [1, 1]} : vector<64x64xf32> to vector<16x64xf32>
    %cst_38 = arith.constant dense<0.000000e+00> : vector<8x64xf32>
    %101 = tpu.matmul %99, %100, %cst_38 {dimension_numbers = #tpu.dot_dimension_numbers<[1], [0], [0], [1], [0, 0, 1, 1], [], []>} : vector<8x16xf32>, vector<16x64xf32>, vector<8x64xf32> -> vector<8x64xf32>
    %102 = arith.addf %81, %101 : vector<8x64xf32>
    %103 = vector.broadcast %13 : vector<1x64xf32> to vector<8x64xf32>
    %104 = arith.addf %102, %103 : vector<8x64xf32>
    %105 = arith.addf %1, %104 : vector<8x64xf32>
    %c0_39 = arith.constant 0 : index
    %c0_40 = arith.constant 0 : index
    %106 = vector.load %arg13[%c0_39, %c0_40] : memref<1x64xf32, #tpu.memory_space<vmem>>, vector<1x64xf32>
    %c0_41 = arith.constant 0 : index
    %c0_42 = arith.constant 0 : index
    %107 = vector.load %arg14[%c0_41, %c0_42] : memref<1x64xf32, #tpu.memory_space<vmem>>, vector<1x64xf32>
    %cst_43 = arith.constant dense<0.000000e+00> : vector<8xf32>
    %108 = vector.multi_reduction <add>, %105, %cst_43 [1] : vector<8x64xf32> to vector<8xf32>
    %109 = vector.shape_cast %108 : vector<8xf32> to vector<8x1xf32>
    %cst_44 = arith.constant 6.400000e+01 : f32
    %110 = vector.broadcast %cst_44 : f32 to vector<8x1xf32>
    %111 = arith.divf %109, %110 : vector<8x1xf32>
    %112 = vector.broadcast %111 : vector<8x1xf32> to vector<8x64xf32>
    %113 = arith.subf %105, %112 : vector<8x64xf32>
    %114 = arith.mulf %113, %113 : vector<8x64xf32>
    %cst_45 = arith.constant dense<0.000000e+00> : vector<8xf32>
    %115 = vector.multi_reduction <add>, %114, %cst_45 [1] : vector<8x64xf32> to vector<8xf32>
    %116 = vector.shape_cast %115 : vector<8xf32> to vector<8x1xf32>
    %cst_46 = arith.constant 6.400000e+01 : f32
    %117 = vector.broadcast %cst_46 : f32 to vector<8x1xf32>
    %118 = arith.divf %116, %117 : vector<8x1xf32>
    %119 = vector.broadcast %111 : vector<8x1xf32> to vector<8x64xf32>
    %120 = arith.subf %105, %119 : vector<8x64xf32>
    %cst_47 = arith.constant 9.99999974E-6 : f32
    %121 = vector.broadcast %cst_47 : f32 to vector<8x1xf32>
    %122 = arith.addf %118, %121 : vector<8x1xf32>
    %123 = math.rsqrt %122 : vector<8x1xf32>
    %124 = vector.broadcast %123 : vector<8x1xf32> to vector<8x64xf32>
    %125 = arith.mulf %120, %124 : vector<8x64xf32>
    %126 = vector.broadcast %106 : vector<1x64xf32> to vector<8x64xf32>
    %127 = arith.mulf %125, %126 : vector<8x64xf32>
    %128 = vector.broadcast %107 : vector<1x64xf32> to vector<8x64xf32>
    %129 = arith.addf %127, %128 : vector<8x64xf32>
    %c0_48 = arith.constant 0 : index
    %c0_49 = arith.constant 0 : index
    %130 = vector.load %arg7[%c0_48, %c0_49] : memref<64x64xf32, #tpu.memory_space<vmem>>, vector<64x64xf32>
    %cst_50 = arith.constant dense<0.000000e+00> : vector<8x64xf32>
    %131 = tpu.matmul %129, %130, %cst_50 {dimension_numbers = #tpu.dot_dimension_numbers<[1], [0], [0], [1], [0, 0, 1, 1], [], []>} : vector<8x64xf32>, vector<64x64xf32>, vector<8x64xf32> -> vector<8x64xf32>
    %c0_51 = arith.constant 0 : index
    %c0_52 = arith.constant 0 : index
    %132 = vector.load %arg8[%c0_51, %c0_52] : memref<1x64xf32, #tpu.memory_space<vmem>>, vector<1x64xf32>
    %133 = vector.broadcast %132 : vector<1x64xf32> to vector<8x64xf32>
    %134 = arith.addf %131, %133 : vector<8x64xf32>
    %c0_53 = arith.constant 0 : index
    %c0_54 = arith.constant 0 : index
    %135 = vector.load %arg9[%c0_53, %c0_54] : memref<64x128xf32, #tpu.memory_space<vmem>>, vector<64x128xf32>
    %cst_55 = arith.constant dense<0.000000e+00> : vector<5x128xf32>
    %136 = tpu.matmul %3, %135, %cst_55 {dimension_numbers = #tpu.dot_dimension_numbers<[1], [0], [0], [1], [0, 0, 1, 1], [], []>} : vector<5x64xf32>, vector<64x128xf32>, vector<5x128xf32> -> vector<5x128xf32>
    %c0_56 = arith.constant 0 : index
    %c0_57 = arith.constant 0 : index
    %137 = vector.load %arg10[%c0_56, %c0_57] : memref<1x128xf32, #tpu.memory_space<vmem>>, vector<1x128xf32>
    %138 = vector.broadcast %137 : vector<1x128xf32> to vector<5x128xf32>
    %139 = arith.addf %136, %138 : vector<5x128xf32>
    %140 = vector.extract_strided_slice %139 {offsets = [0, 0], sizes = [5, 64], strides = [1, 1]} : vector<5x128xf32> to vector<5x64xf32>
    %141 = vector.extract_strided_slice %139 {offsets = [0, 64], sizes = [5, 64], strides = [1, 1]} : vector<5x128xf32> to vector<5x64xf32>
    %c0_58 = arith.constant 0 : index
    %c0_59 = arith.constant 0 : index
    %142 = vector.load %arg11[%c0_58, %c0_59] : memref<64x64xf32, #tpu.memory_space<vmem>>, vector<64x64xf32>
    %c0_60 = arith.constant 0 : index
    %c0_61 = arith.constant 0 : index
    %143 = vector.load %arg12[%c0_60, %c0_61] : memref<1x64xf32, #tpu.memory_space<vmem>>, vector<1x64xf32>
    %144 = vector.extract_strided_slice %134 {offsets = [0, 0], sizes = [8, 16], strides = [1, 1]} : vector<8x64xf32> to vector<8x16xf32>
    %145 = vector.extract_strided_slice %140 {offsets = [0, 0], sizes = [5, 16], strides = [1, 1]} : vector<5x64xf32> to vector<5x16xf32>
    %cst_62 = arith.constant dense<0.000000e+00> : vector<8x5xf32>
    %146 = tpu.matmul %144, %145, %cst_62 {dimension_numbers = #tpu.dot_dimension_numbers<[1], [1], [0], [0], [0, 0, 1, 0], [], []>} : vector<8x16xf32>, vector<5x16xf32>, vector<8x5xf32> -> vector<8x5xf32>
    %cst_63 = arith.constant 2.500000e-01 : f32
    %147 = vector.broadcast %cst_63 : f32 to vector<8x5xf32>
    %148 = arith.mulf %146, %147 : vector<8x5xf32>
    %cst_64 = arith.constant dense<0xFF800000> : vector<8xf32>
    %149 = vector.multi_reduction <maximumf>, %148, %cst_64 [1] : vector<8x5xf32> to vector<8xf32>
    %150 = vector.shape_cast %149 : vector<8xf32> to vector<8x1xf32>
    %151 = vector.broadcast %150 : vector<8x1xf32> to vector<8x5xf32>
    %152 = arith.subf %148, %151 : vector<8x5xf32>
    %153 = math.exp %152 : vector<8x5xf32>
    %cst_65 = arith.constant dense<0.000000e+00> : vector<8xf32>
    %154 = vector.multi_reduction <add>, %153, %cst_65 [1] : vector<8x5xf32> to vector<8xf32>
    %155 = vector.shape_cast %154 : vector<8xf32> to vector<8x1xf32>
    %156 = tpu.reciprocal %155 {approx = true} : vector<8x1xf32> -> vector<8x1xf32>
    %157 = vector.broadcast %156 : vector<8x1xf32> to vector<8x5xf32>
    %158 = arith.mulf %153, %157 : vector<8x5xf32>
    %159 = vector.extract_strided_slice %141 {offsets = [0, 0], sizes = [5, 16], strides = [1, 1]} : vector<5x64xf32> to vector<5x16xf32>
    %cst_66 = arith.constant dense<0.000000e+00> : vector<8x16xf32>
    %160 = tpu.matmul %158, %159, %cst_66 {dimension_numbers = #tpu.dot_dimension_numbers<[1], [0], [0], [1], [0, 0, 1, 1], [], []>} : vector<8x5xf32>, vector<5x16xf32>, vector<8x16xf32> -> vector<8x16xf32>
    %161 = vector.extract_strided_slice %142 {offsets = [0, 0], sizes = [16, 64], strides = [1, 1]} : vector<64x64xf32> to vector<16x64xf32>
    %cst_67 = arith.constant dense<0.000000e+00> : vector<8x64xf32>
    %162 = tpu.matmul %160, %161, %cst_67 {dimension_numbers = #tpu.dot_dimension_numbers<[1], [0], [0], [1], [0, 0, 1, 1], [], []>} : vector<8x16xf32>, vector<16x64xf32>, vector<8x64xf32> -> vector<8x64xf32>
    %163 = vector.extract_strided_slice %134 {offsets = [0, 16], sizes = [8, 16], strides = [1, 1]} : vector<8x64xf32> to vector<8x16xf32>
    %164 = vector.extract_strided_slice %140 {offsets = [0, 16], sizes = [5, 16], strides = [1, 1]} : vector<5x64xf32> to vector<5x16xf32>
    %cst_68 = arith.constant dense<0.000000e+00> : vector<8x5xf32>
    %165 = tpu.matmul %163, %164, %cst_68 {dimension_numbers = #tpu.dot_dimension_numbers<[1], [1], [0], [0], [0, 0, 1, 0], [], []>} : vector<8x16xf32>, vector<5x16xf32>, vector<8x5xf32> -> vector<8x5xf32>
    %cst_69 = arith.constant 2.500000e-01 : f32
    %166 = vector.broadcast %cst_69 : f32 to vector<8x5xf32>
    %167 = arith.mulf %165, %166 : vector<8x5xf32>
    %cst_70 = arith.constant dense<0xFF800000> : vector<8xf32>
    %168 = vector.multi_reduction <maximumf>, %167, %cst_70 [1] : vector<8x5xf32> to vector<8xf32>
    %169 = vector.shape_cast %168 : vector<8xf32> to vector<8x1xf32>
    %170 = vector.broadcast %169 : vector<8x1xf32> to vector<8x5xf32>
    %171 = arith.subf %167, %170 : vector<8x5xf32>
    %172 = math.exp %171 : vector<8x5xf32>
    %cst_71 = arith.constant dense<0.000000e+00> : vector<8xf32>
    %173 = vector.multi_reduction <add>, %172, %cst_71 [1] : vector<8x5xf32> to vector<8xf32>
    %174 = vector.shape_cast %173 : vector<8xf32> to vector<8x1xf32>
    %175 = tpu.reciprocal %174 {approx = true} : vector<8x1xf32> -> vector<8x1xf32>
    %176 = vector.broadcast %175 : vector<8x1xf32> to vector<8x5xf32>
    %177 = arith.mulf %172, %176 : vector<8x5xf32>
    %178 = vector.extract_strided_slice %141 {offsets = [0, 16], sizes = [5, 16], strides = [1, 1]} : vector<5x64xf32> to vector<5x16xf32>
    %cst_72 = arith.constant dense<0.000000e+00> : vector<8x16xf32>
    %179 = tpu.matmul %177, %178, %cst_72 {dimension_numbers = #tpu.dot_dimension_numbers<[1], [0], [0], [1], [0, 0, 1, 1], [], []>} : vector<8x5xf32>, vector<5x16xf32>, vector<8x16xf32> -> vector<8x16xf32>
    %180 = vector.extract_strided_slice %142 {offsets = [16, 0], sizes = [16, 64], strides = [1, 1]} : vector<64x64xf32> to vector<16x64xf32>
    %cst_73 = arith.constant dense<0.000000e+00> : vector<8x64xf32>
    %181 = tpu.matmul %179, %180, %cst_73 {dimension_numbers = #tpu.dot_dimension_numbers<[1], [0], [0], [1], [0, 0, 1, 1], [], []>} : vector<8x16xf32>, vector<16x64xf32>, vector<8x64xf32> -> vector<8x64xf32>
    %182 = arith.addf %162, %181 : vector<8x64xf32>
    %183 = vector.extract_strided_slice %134 {offsets = [0, 32], sizes = [8, 16], strides = [1, 1]} : vector<8x64xf32> to vector<8x16xf32>
    %184 = vector.extract_strided_slice %140 {offsets = [0, 32], sizes = [5, 16], strides = [1, 1]} : vector<5x64xf32> to vector<5x16xf32>
    %cst_74 = arith.constant dense<0.000000e+00> : vector<8x5xf32>
    %185 = tpu.matmul %183, %184, %cst_74 {dimension_numbers = #tpu.dot_dimension_numbers<[1], [1], [0], [0], [0, 0, 1, 0], [], []>} : vector<8x16xf32>, vector<5x16xf32>, vector<8x5xf32> -> vector<8x5xf32>
    %cst_75 = arith.constant 2.500000e-01 : f32
    %186 = vector.broadcast %cst_75 : f32 to vector<8x5xf32>
    %187 = arith.mulf %185, %186 : vector<8x5xf32>
    %cst_76 = arith.constant dense<0xFF800000> : vector<8xf32>
    %188 = vector.multi_reduction <maximumf>, %187, %cst_76 [1] : vector<8x5xf32> to vector<8xf32>
    %189 = vector.shape_cast %188 : vector<8xf32> to vector<8x1xf32>
    %190 = vector.broadcast %189 : vector<8x1xf32> to vector<8x5xf32>
    %191 = arith.subf %187, %190 : vector<8x5xf32>
    %192 = math.exp %191 : vector<8x5xf32>
    %cst_77 = arith.constant dense<0.000000e+00> : vector<8xf32>
    %193 = vector.multi_reduction <add>, %192, %cst_77 [1] : vector<8x5xf32> to vector<8xf32>
    %194 = vector.shape_cast %193 : vector<8xf32> to vector<8x1xf32>
    %195 = tpu.reciprocal %194 {approx = true} : vector<8x1xf32> -> vector<8x1xf32>
    %196 = vector.broadcast %195 : vector<8x1xf32> to vector<8x5xf32>
    %197 = arith.mulf %192, %196 : vector<8x5xf32>
    %198 = vector.extract_strided_slice %141 {offsets = [0, 32], sizes = [5, 16], strides = [1, 1]} : vector<5x64xf32> to vector<5x16xf32>
    %cst_78 = arith.constant dense<0.000000e+00> : vector<8x16xf32>
    %199 = tpu.matmul %197, %198, %cst_78 {dimension_numbers = #tpu.dot_dimension_numbers<[1], [0], [0], [1], [0, 0, 1, 1], [], []>} : vector<8x5xf32>, vector<5x16xf32>, vector<8x16xf32> -> vector<8x16xf32>
    %200 = vector.extract_strided_slice %142 {offsets = [32, 0], sizes = [16, 64], strides = [1, 1]} : vector<64x64xf32> to vector<16x64xf32>
    %cst_79 = arith.constant dense<0.000000e+00> : vector<8x64xf32>
    %201 = tpu.matmul %199, %200, %cst_79 {dimension_numbers = #tpu.dot_dimension_numbers<[1], [0], [0], [1], [0, 0, 1, 1], [], []>} : vector<8x16xf32>, vector<16x64xf32>, vector<8x64xf32> -> vector<8x64xf32>
    %202 = arith.addf %182, %201 : vector<8x64xf32>
    %203 = vector.extract_strided_slice %134 {offsets = [0, 48], sizes = [8, 16], strides = [1, 1]} : vector<8x64xf32> to vector<8x16xf32>
    %204 = vector.extract_strided_slice %140 {offsets = [0, 48], sizes = [5, 16], strides = [1, 1]} : vector<5x64xf32> to vector<5x16xf32>
    %cst_80 = arith.constant dense<0.000000e+00> : vector<8x5xf32>
    %205 = tpu.matmul %203, %204, %cst_80 {dimension_numbers = #tpu.dot_dimension_numbers<[1], [1], [0], [0], [0, 0, 1, 0], [], []>} : vector<8x16xf32>, vector<5x16xf32>, vector<8x5xf32> -> vector<8x5xf32>
    %cst_81 = arith.constant 2.500000e-01 : f32
    %206 = vector.broadcast %cst_81 : f32 to vector<8x5xf32>
    %207 = arith.mulf %205, %206 : vector<8x5xf32>
    %cst_82 = arith.constant dense<0xFF800000> : vector<8xf32>
    %208 = vector.multi_reduction <maximumf>, %207, %cst_82 [1] : vector<8x5xf32> to vector<8xf32>
    %209 = vector.shape_cast %208 : vector<8xf32> to vector<8x1xf32>
    %210 = vector.broadcast %209 : vector<8x1xf32> to vector<8x5xf32>
    %211 = arith.subf %207, %210 : vector<8x5xf32>
    %212 = math.exp %211 : vector<8x5xf32>
    %cst_83 = arith.constant dense<0.000000e+00> : vector<8xf32>
    %213 = vector.multi_reduction <add>, %212, %cst_83 [1] : vector<8x5xf32> to vector<8xf32>
    %214 = vector.shape_cast %213 : vector<8xf32> to vector<8x1xf32>
    %215 = tpu.reciprocal %214 {approx = true} : vector<8x1xf32> -> vector<8x1xf32>
    %216 = vector.broadcast %215 : vector<8x1xf32> to vector<8x5xf32>
    %217 = arith.mulf %212, %216 : vector<8x5xf32>
    %218 = vector.extract_strided_slice %141 {offsets = [0, 48], sizes = [5, 16], strides = [1, 1]} : vector<5x64xf32> to vector<5x16xf32>
    %cst_84 = arith.constant dense<0.000000e+00> : vector<8x16xf32>
    %219 = tpu.matmul %217, %218, %cst_84 {dimension_numbers = #tpu.dot_dimension_numbers<[1], [0], [0], [1], [0, 0, 1, 1], [], []>} : vector<8x5xf32>, vector<5x16xf32>, vector<8x16xf32> -> vector<8x16xf32>
    %220 = vector.extract_strided_slice %142 {offsets = [48, 0], sizes = [16, 64], strides = [1, 1]} : vector<64x64xf32> to vector<16x64xf32>
    %cst_85 = arith.constant dense<0.000000e+00> : vector<8x64xf32>
    %221 = tpu.matmul %219, %220, %cst_85 {dimension_numbers = #tpu.dot_dimension_numbers<[1], [0], [0], [1], [0, 0, 1, 1], [], []>} : vector<8x16xf32>, vector<16x64xf32>, vector<8x64xf32> -> vector<8x64xf32>
    %222 = arith.addf %202, %221 : vector<8x64xf32>
    %223 = vector.broadcast %143 : vector<1x64xf32> to vector<8x64xf32>
    %224 = arith.addf %222, %223 : vector<8x64xf32>
    %225 = arith.addf %129, %224 : vector<8x64xf32>
    %c0_86 = arith.constant 0 : index
    %c0_87 = arith.constant 0 : index
    %226 = vector.load %arg15[%c0_86, %c0_87] : memref<1x64xf32, #tpu.memory_space<vmem>>, vector<1x64xf32>
    %c0_88 = arith.constant 0 : index
    %c0_89 = arith.constant 0 : index
    %227 = vector.load %arg16[%c0_88, %c0_89] : memref<1x64xf32, #tpu.memory_space<vmem>>, vector<1x64xf32>
    %cst_90 = arith.constant dense<0.000000e+00> : vector<8xf32>
    %228 = vector.multi_reduction <add>, %225, %cst_90 [1] : vector<8x64xf32> to vector<8xf32>
    %229 = vector.shape_cast %228 : vector<8xf32> to vector<8x1xf32>
    %cst_91 = arith.constant 6.400000e+01 : f32
    %230 = vector.broadcast %cst_91 : f32 to vector<8x1xf32>
    %231 = arith.divf %229, %230 : vector<8x1xf32>
    %232 = vector.broadcast %231 : vector<8x1xf32> to vector<8x64xf32>
    %233 = arith.subf %225, %232 : vector<8x64xf32>
    %234 = arith.mulf %233, %233 : vector<8x64xf32>
    %cst_92 = arith.constant dense<0.000000e+00> : vector<8xf32>
    %235 = vector.multi_reduction <add>, %234, %cst_92 [1] : vector<8x64xf32> to vector<8xf32>
    %236 = vector.shape_cast %235 : vector<8xf32> to vector<8x1xf32>
    %cst_93 = arith.constant 6.400000e+01 : f32
    %237 = vector.broadcast %cst_93 : f32 to vector<8x1xf32>
    %238 = arith.divf %236, %237 : vector<8x1xf32>
    %239 = vector.broadcast %231 : vector<8x1xf32> to vector<8x64xf32>
    %240 = arith.subf %225, %239 : vector<8x64xf32>
    %cst_94 = arith.constant 9.99999974E-6 : f32
    %241 = vector.broadcast %cst_94 : f32 to vector<8x1xf32>
    %242 = arith.addf %238, %241 : vector<8x1xf32>
    %243 = math.rsqrt %242 : vector<8x1xf32>
    %244 = vector.broadcast %243 : vector<8x1xf32> to vector<8x64xf32>
    %245 = arith.mulf %240, %244 : vector<8x64xf32>
    %246 = vector.broadcast %226 : vector<1x64xf32> to vector<8x64xf32>
    %247 = arith.mulf %245, %246 : vector<8x64xf32>
    %248 = vector.broadcast %227 : vector<1x64xf32> to vector<8x64xf32>
    %249 = arith.addf %247, %248 : vector<8x64xf32>
    %c0_95 = arith.constant 0 : index
    %c0_96 = arith.constant 0 : index
    %250 = vector.load %arg19[%c0_95, %c0_96] : memref<64x128xf32, #tpu.memory_space<vmem>>, vector<64x128xf32>
    %cst_97 = arith.constant dense<0.000000e+00> : vector<8x128xf32>
    %251 = tpu.matmul %249, %250, %cst_97 {dimension_numbers = #tpu.dot_dimension_numbers<[1], [0], [0], [1], [0, 0, 1, 1], [], []>} : vector<8x64xf32>, vector<64x128xf32>, vector<8x128xf32> -> vector<8x128xf32>
    %c0_98 = arith.constant 0 : index
    %c0_99 = arith.constant 0 : index
    %252 = vector.load %arg20[%c0_98, %c0_99] : memref<1x128xf32, #tpu.memory_space<vmem>>, vector<1x128xf32>
    %253 = vector.broadcast %252 : vector<1x128xf32> to vector<8x128xf32>
    %254 = arith.addf %251, %253 : vector<8x128xf32>
    %cst_100 = arith.constant 0.000000e+00 : f32
    %255 = vector.broadcast %cst_100 : f32 to vector<8x128xf32>
    %256 = arith.maximumf %254, %255 : vector<8x128xf32>
    %c0_101 = arith.constant 0 : index
    %c0_102 = arith.constant 0 : index
    %257 = vector.load %arg21[%c0_101, %c0_102] : memref<128x64xf32, #tpu.memory_space<vmem>>, vector<128x64xf32>
    %cst_103 = arith.constant dense<0.000000e+00> : vector<8x64xf32>
    %258 = tpu.matmul %256, %257, %cst_103 {dimension_numbers = #tpu.dot_dimension_numbers<[1], [0], [0], [1], [0, 0, 1, 1], [], []>} : vector<8x128xf32>, vector<128x64xf32>, vector<8x64xf32> -> vector<8x64xf32>
    %c0_104 = arith.constant 0 : index
    %c0_105 = arith.constant 0 : index
    %259 = vector.load %arg22[%c0_104, %c0_105] : memref<1x64xf32, #tpu.memory_space<vmem>>, vector<1x64xf32>
    %260 = vector.broadcast %259 : vector<1x64xf32> to vector<8x64xf32>
    %261 = arith.addf %258, %260 : vector<8x64xf32>
    %262 = arith.addf %249, %261 : vector<8x64xf32>
    %c0_106 = arith.constant 0 : index
    %c0_107 = arith.constant 0 : index
    %263 = vector.load %arg17[%c0_106, %c0_107] : memref<1x64xf32, #tpu.memory_space<vmem>>, vector<1x64xf32>
    %c0_108 = arith.constant 0 : index
    %c0_109 = arith.constant 0 : index
    %264 = vector.load %arg18[%c0_108, %c0_109] : memref<1x64xf32, #tpu.memory_space<vmem>>, vector<1x64xf32>
    %cst_110 = arith.constant dense<0.000000e+00> : vector<8xf32>
    %265 = vector.multi_reduction <add>, %262, %cst_110 [1] : vector<8x64xf32> to vector<8xf32>
    %266 = vector.shape_cast %265 : vector<8xf32> to vector<8x1xf32>
    %cst_111 = arith.constant 6.400000e+01 : f32
    %267 = vector.broadcast %cst_111 : f32 to vector<8x1xf32>
    %268 = arith.divf %266, %267 : vector<8x1xf32>
    %269 = vector.broadcast %268 : vector<8x1xf32> to vector<8x64xf32>
    %270 = arith.subf %262, %269 : vector<8x64xf32>
    %271 = arith.mulf %270, %270 : vector<8x64xf32>
    %cst_112 = arith.constant dense<0.000000e+00> : vector<8xf32>
    %272 = vector.multi_reduction <add>, %271, %cst_112 [1] : vector<8x64xf32> to vector<8xf32>
    %273 = vector.shape_cast %272 : vector<8xf32> to vector<8x1xf32>
    %cst_113 = arith.constant 6.400000e+01 : f32
    %274 = vector.broadcast %cst_113 : f32 to vector<8x1xf32>
    %275 = arith.divf %273, %274 : vector<8x1xf32>
    %276 = vector.broadcast %268 : vector<8x1xf32> to vector<8x64xf32>
    %277 = arith.subf %262, %276 : vector<8x64xf32>
    %cst_114 = arith.constant 9.99999974E-6 : f32
    %278 = vector.broadcast %cst_114 : f32 to vector<8x1xf32>
    %279 = arith.addf %275, %278 : vector<8x1xf32>
    %280 = math.rsqrt %279 : vector<8x1xf32>
    %281 = vector.broadcast %280 : vector<8x1xf32> to vector<8x64xf32>
    %282 = arith.mulf %277, %281 : vector<8x64xf32>
    %283 = vector.broadcast %263 : vector<1x64xf32> to vector<8x64xf32>
    %284 = arith.mulf %282, %283 : vector<8x64xf32>
    %285 = vector.broadcast %264 : vector<1x64xf32> to vector<8x64xf32>
    %286 = arith.addf %284, %285 : vector<8x64xf32>
    %c0_115 = arith.constant 0 : index
    %c0_116 = arith.constant 0 : index
    %c0_117 = arith.constant 0 : index
    %287 = vector.load %arg23[%c0_115, %c0_116, %c0_117] : memref<1x8x64xf32, #tpu.memory_space<vmem>>, vector<1x8x64xf32>
    %288 = vector.shape_cast %287 : vector<1x8x64xf32> to vector<8x64xf32>
    %289 = vector.shape_cast %286 : vector<8x64xf32> to vector<1x8x64xf32>
    tpu.vector_store %arg23[%c0_115, %c0_116, %c0_117], %289 {strides = array<i32>} : memref<1x8x64xf32, #tpu.memory_space<vmem>>, vector<1x8x64xf32>,
    return
  }
  func.func @transform_0(%arg0: i32) -> (i32, i32, i32) {
    %c0_i32 = arith.constant 0 : i32
    %c0_i32_0 = arith.constant 0 : i32
    %c0_i32_1 = arith.constant 0 : i32
    return %arg0, %c0_i32, %c0_i32_0 : i32, i32, i32
  }
  func.func @transform_1(%arg0: i32) -> (i32, i32, i32) {
    %c0_i32 = arith.constant 0 : i32
    %c0_i32_0 = arith.constant 0 : i32
    %c0_i32_1 = arith.constant 0 : i32
    return %arg0, %c0_i32, %c0_i32_0 : i32, i32, i32
  }
  func.func @transform_2(%arg0: i32) -> (i32, i32) {
    %c0_i32 = arith.constant 0 : i32
    %c0_i32_0 = arith.constant 0 : i32
    %c0_i32_1 = arith.constant 0 : i32
    return %c0_i32, %c0_i32_0 : i32, i32
  }
  func.func @transform_3(%arg0: i32) -> (i32, i32) {
    %c0_i32 = arith.constant 0 : i32
    %c0_i32_0 = arith.constant 0 : i32
    %c0_i32_1 = arith.constant 0 : i32
    return %c0_i32, %c0_i32_0 : i32, i32
  }
  func.func @transform_4(%arg0: i32) -> (i32, i32) {
    %c0_i32 = arith.constant 0 : i32
    %c0_i32_0 = arith.constant 0 : i32
    %c0_i32_1 = arith.constant 0 : i32
    return %c0_i32, %c0_i32_0 : i32, i32
  }
  func.func @transform_5(%arg0: i32) -> (i32, i32) {
    %c0_i32 = arith.constant 0 : i32
    %c0_i32_0 = arith.constant 0 : i32
    %c0_i32_1 = arith.constant 0 : i32
    return %c0_i32, %c0_i32_0 : i32, i32
  }
  func.func @transform_6(%arg0: i32) -> (i32, i32) {
    %c0_i32 = arith.constant 0 : i32
    %c0_i32_0 = arith.constant 0 : i32
    %c0_i32_1 = arith.constant 0 : i32
    return %c0_i32, %c0_i32_0 : i32, i32
  }
  func.func @transform_7(%arg0: i32) -> (i32, i32) {
    %c0_i32 = arith.constant 0 : i32
    %c0_i32_0 = arith.constant 0 : i32
    %c0_i32_1 = arith.constant 0 : i32
    return %c0_i32, %c0_i32_0 : i32, i32
  }
  func.func @transform_8(%arg0: i32) -> (i32, i32) {
    %c0_i32 = arith.constant 0 : i32
    %c0_i32_0 = arith.constant 0 : i32
    %c0_i32_1 = arith.constant 0 : i32
    return %c0_i32, %c0_i32_0 : i32, i32
  }
  func.func @transform_9(%arg0: i32) -> (i32, i32) {
    %c0_i32 = arith.constant 0 : i32
    %c0_i32_0 = arith.constant 0 : i32
    %c0_i32_1 = arith.constant 0 : i32
    return %c0_i32, %c0_i32_0 : i32, i32
  }
  func.func @transform_10(%arg0: i32) -> (i32, i32) {
    %c0_i32 = arith.constant 0 : i32
    %c0_i32_0 = arith.constant 0 : i32
    %c0_i32_1 = arith.constant 0 : i32
    return %c0_i32, %c0_i32_0 : i32, i32
  }
  func.func @transform_11(%arg0: i32) -> (i32, i32) {
    %c0_i32 = arith.constant 0 : i32
    %c0_i32_0 = arith.constant 0 : i32
    %c0_i32_1 = arith.constant 0 : i32
    return %c0_i32, %c0_i32_0 : i32, i32
  }
  func.func @transform_12(%arg0: i32) -> (i32, i32) {
    %c0_i32 = arith.constant 0 : i32
    %c0_i32_0 = arith.constant 0 : i32
    %c0_i32_1 = arith.constant 0 : i32
    return %c0_i32, %c0_i32_0 : i32, i32
  }
  func.func @transform_13(%arg0: i32) -> (i32, i32) {
    %c0_i32 = arith.constant 0 : i32
    %c0_i32_0 = arith.constant 0 : i32
    %c0_i32_1 = arith.constant 0 : i32
    return %c0_i32, %c0_i32_0 : i32, i32
  }
  func.func @transform_14(%arg0: i32) -> (i32, i32) {
    %c0_i32 = arith.constant 0 : i32
    %c0_i32_0 = arith.constant 0 : i32
    %c0_i32_1 = arith.constant 0 : i32
    return %c0_i32, %c0_i32_0 : i32, i32
  }
  func.func @transform_15(%arg0: i32) -> (i32, i32) {
    %c0_i32 = arith.constant 0 : i32
    %c0_i32_0 = arith.constant 0 : i32
    %c0_i32_1 = arith.constant 0 : i32
    return %c0_i32, %c0_i32_0 : i32, i32
  }
  func.func @transform_16(%arg0: i32) -> (i32, i32) {
    %c0_i32 = arith.constant 0 : i32
    %c0_i32_0 = arith.constant 0 : i32
    %c0_i32_1 = arith.constant 0 : i32
    return %c0_i32, %c0_i32_0 : i32, i32
  }
  func.func @transform_17(%arg0: i32) -> (i32, i32) {
    %c0_i32 = arith.constant 0 : i32
    %c0_i32_0 = arith.constant 0 : i32
    %c0_i32_1 = arith.constant 0 : i32
    return %c0_i32, %c0_i32_0 : i32, i32
  }
  func.func @transform_18(%arg0: i32) -> (i32, i32) {
    %c0_i32 = arith.constant 0 : i32
    %c0_i32_0 = arith.constant 0 : i32
    %c0_i32_1 = arith.constant 0 : i32
    return %c0_i32, %c0_i32_0 : i32, i32
  }
  func.func @transform_19(%arg0: i32) -> (i32, i32) {
    %c0_i32 = arith.constant 0 : i32
    %c0_i32_0 = arith.constant 0 : i32
    %c0_i32_1 = arith.constant 0 : i32
    return %c0_i32, %c0_i32_0 : i32, i32
  }
  func.func @transform_20(%arg0: i32) -> (i32, i32) {
    %c0_i32 = arith.constant 0 : i32
    %c0_i32_0 = arith.constant 0 : i32
    %c0_i32_1 = arith.constant 0 : i32
    return %c0_i32, %c0_i32_0 : i32, i32
  }
  func.func @transform_21(%arg0: i32) -> (i32, i32) {
    %c0_i32 = arith.constant 0 : i32
    %c0_i32_0 = arith.constant 0 : i32
    %c0_i32_1 = arith.constant 0 : i32
    return %c0_i32, %c0_i32_0 : i32, i32
  }
  func.func @transform_22(%arg0: i32) -> (i32, i32, i32) {
    %c0_i32 = arith.constant 0 : i32
    %c0_i32_0 = arith.constant 0 : i32
    %c0_i32_1 = arith.constant 0 : i32
    return %arg0, %c0_i32, %c0_i32_0 : i32, i32, i32
  }
}

module attributes {stable_mosaic.version = 11 : i64} {
  func.func @_out_proj_kernel(%arg0: i32, %arg1: memref<1x8x64xf32, #tpu.memory_space<vmem>>, %arg2: memref<64x128xf32, #tpu.memory_space<vmem>>, %arg3: memref<1x128xf32, #tpu.memory_space<vmem>>, %arg4: memref<1x8x128xf32, #tpu.memory_space<vmem>>) attributes {dimension_semantics = [#tpu.dimension_semantics<parallel>], iteration_bounds = array<i64: 2>, scalar_prefetch = 0 : i64, scratch_operands = 0 : i64, tpu.core_type = #tpu.core_type<tc>, window_params = [{transform_indices = @transform_0, window_bounds = array<i64: 1, 8, 64>}, {pipeline_mode = #tpu.pipeline_mode<synchronous>, transform_indices = @transform_1, window_bounds = array<i64: 64, 128>}, {pipeline_mode = #tpu.pipeline_mode<synchronous>, transform_indices = @transform_2, window_bounds = array<i64: 1, 128>}, {transform_indices = @transform_3, window_bounds = array<i64: 1, 8, 128>}]} {
    %c0 = arith.constant 0 : index
    %c0_0 = arith.constant 0 : index
    %c0_1 = arith.constant 0 : index
    %0 = vector.load %arg1[%c0, %c0_0, %c0_1] : memref<1x8x64xf32, #tpu.memory_space<vmem>>, vector<1x8x64xf32>
    %1 = vector.shape_cast %0 : vector<1x8x64xf32> to vector<8x64xf32>
    %c0_2 = arith.constant 0 : index
    %c0_3 = arith.constant 0 : index
    %2 = vector.load %arg2[%c0_2, %c0_3] : memref<64x128xf32, #tpu.memory_space<vmem>>, vector<64x128xf32>
    %cst = arith.constant dense<0.000000e+00> : vector<8x128xf32>
    %3 = tpu.matmul %1, %2, %cst {dimension_numbers = #tpu.dot_dimension_numbers<[1], [0], [0], [1], [0, 0, 1, 1], [], []>} : vector<8x64xf32>, vector<64x128xf32>, vector<8x128xf32> -> vector<8x128xf32>
    %c0_4 = arith.constant 0 : index
    %c0_5 = arith.constant 0 : index
    %4 = vector.load %arg3[%c0_4, %c0_5] : memref<1x128xf32, #tpu.memory_space<vmem>>, vector<1x128xf32>
    %5 = vector.broadcast %4 : vector<1x128xf32> to vector<8x128xf32>
    %6 = arith.addf %3, %5 : vector<8x128xf32>
    %c0_6 = arith.constant 0 : index
    %c0_7 = arith.constant 0 : index
    %c0_8 = arith.constant 0 : index
    %7 = vector.load %arg4[%c0_6, %c0_7, %c0_8] : memref<1x8x128xf32, #tpu.memory_space<vmem>>, vector<1x8x128xf32>
    %8 = vector.shape_cast %7 : vector<1x8x128xf32> to vector<8x128xf32>
    %9 = vector.shape_cast %6 : vector<8x128xf32> to vector<1x8x128xf32>
    tpu.vector_store %arg4[%c0_6, %c0_7, %c0_8], %9 {strides = array<i32>} : memref<1x8x128xf32, #tpu.memory_space<vmem>>, vector<1x8x128xf32>,
    return
  }
  func.func @transform_0(%arg0: i32) -> (i32, i32, i32) {
    %c0_i32 = arith.constant 0 : i32
    %c0_i32_0 = arith.constant 0 : i32
    %c0_i32_1 = arith.constant 0 : i32
    return %arg0, %c0_i32, %c0_i32_0 : i32, i32, i32
  }
  func.func @transform_1(%arg0: i32) -> (i32, i32) {
    %c0_i32 = arith.constant 0 : i32
    %c0_i32_0 = arith.constant 0 : i32
    %c0_i32_1 = arith.constant 0 : i32
    return %c0_i32, %c0_i32_0 : i32, i32
  }
  func.func @transform_2(%arg0: i32) -> (i32, i32) {
    %c0_i32 = arith.constant 0 : i32
    %c0_i32_0 = arith.constant 0 : i32
    %c0_i32_1 = arith.constant 0 : i32
    return %c0_i32, %c0_i32_0 : i32, i32
  }
  func.func @transform_3(%arg0: i32) -> (i32, i32, i32) {
    %c0_i32 = arith.constant 0 : i32
    %c0_i32_0 = arith.constant 0 : i32
    %c0_i32_1 = arith.constant 0 : i32
    return %arg0, %c0_i32, %c0_i32_0 : i32, i32, i32
  }
}

</mosaic_0001>

<bundles_post_ra>
// kernel: image_captioning_forward.10
= control target key start
LH: loop header
LB: loop body
LE: loop exit
PB: predicated region body
PF: predicated region fallthrough
CT: control target
= control target key end

     0   :  { %s301_s12 = smov 0   ;;  %s327_s0 = inlined_call_operand.vmem [shape: f32[2,5,64], index: 0, kind: input, shape index: {}]   ;;  %s328_s1 = inlined_call_operand.vmem [shape: f32[1,64], index: 1, kind: input, shape index: {}]   ;;  %s329_s2 = inlined_call_operand.vmem [shape: f32[1,64], index: 2, kind: input, shape index: {}]   ;;  %s330_s3 = inlined_call_operand.vmem [shape: f32[2,5,64], index: 3, kind: output, shape index: {}]  }
   0x1 LB: > { %s252_s13 = sadd.s32 4294967295, %s279_s12   ;;  %p256_p0 = scmp.ge.s32.totalorder %s279_s12, 1  ;;  %s279_s12 = sphi %s301_s12, %s13_s12  }
   0x2   : > { %p136_p1 = scmp.lt.s32.totalorder %s279_s12, 3 }
   0x4   : > { %p137_p2 = pnand %p256_p0, %p136_p1 }
   0x5   : > { %p158_p3 = scmp.lt.s32.totalorder (!%p137_p2), %s252_s13, 1  ;;  %vm169_vm0 = vcmask (!%p137_p2), 520192   ;;  %v259_v11 = vld [vmem:[%s328_s1] ss:$0 sm:$0xff] (!%p137_p2) }
   0x6   : > { %140 = sbr.rel (%p137_p2) target bundleno = 331 (0x14b), region = 32  ;;  %v260_v13 = vld [vmem:[%s329_s2] ss:$0 sm:$0xff] (!%p137_p2) }
   0xd   : > { %s332_s13 = smov (!%p158_p3, %s252_s13), 1 }
   0xe   : > { %s257_s14 = sshll.u32 %s332_s13, 3 }
   0xf   : > { %s161_s17 = scalar_lea.vmem %s327_s0, %s257_s14  ;;  %s165_s24 = scalar_lea.vmem %s330_s3, %s257_s14 }
  0x10   : > { %v166_v0 = vld [vmem:[%s161_s17] sm:$0x1f] }
  0x11   : > { %v170_v1 = vsel %vm169_vm0, %v166_v0, 0.0 }
  0x12   : > { %171 = vadd.xlane.f32.xlu0 %v170_v1 }
  0x9f   : > { %v172_v2 = vpop.xlane.xlu0 %171 }
  0xa0   : > { %v174_v3 = vmul.f32 0.015625, %v172_v2 }
  0xa2   : > { %v175_v4 = vsub.f32 %v166_v0, %v174_v3 }
  0xa4   : > { %v176_v5 = vmul.f32 %v175_v4, %v175_v4 }
  0xa6   : > { %v177_v6 = vsel %vm169_vm0, %v176_v5, 0.0 }
  0xa7   : > { %178 = vadd.xlane.f32.xlu0 %v177_v6 }
 0x134   : > { %v179_v7 = vpop.xlane.xlu0 %178 }
 0x135   : > { %v180_v8 = vmul.f32 0.015625, %v179_v7 }
 0x137   : > { %v181_v9 = vadd.f32 1e-06, %v180_v8 }
 0x139   : > { %271 = vrsqrt.f32 %v181_v9 }
 0x143   : > { %v272_v10 = vpop.eup %271 }
 0x144   : > { %v183_v12 = vmul.f32 %v272_v10, %v175_v4 }
 0x146   : > { %v190_v14 = vmul.f32 %v259_v11, %v183_v12 }
 0x148   : > { %v197_v15 = vadd.f32 %v260_v13, %v190_v14 }
 0x14a   : > { %198 = vst.msk [vmem:[%s165_s24] sm:$0x1f] %vm169_vm0, %v197_v15 }
 0x14b PF: > { %s13_s12 = sadd.s32 1, %s279_s12  }
 0x14c   : > { %p10_p4 = scmp.ge.s32.totalorder %s13_s12, 4  }
 0x14e   :  { %12 = sbr.rel (!%p10_p4) target bundleno = 1 (0x1), region = 62 }

// kernel: image_captioning_forward.7
= control target key start
LH: loop header
LB: loop body
LE: loop exit
PB: predicated region body
PF: predicated region fallthrough
CT: control target
= control target key end

     0   :  { %s784_s12 = smov 0   ;;  %s1114_s0 = inlined_call_operand.vmem [shape: f32[2,5,768], index: 0, kind: input, shape index: {}]   ;;  %s1115_s1 = inlined_call_operand.vmem [shape: f32[768,64], index: 1, kind: input, shape index: {}]   ;;  %s1116_s2 = inlined_call_operand.vmem [shape: f32[5,64], index: 2, kind: input, shape index: {}]   ;;  %s1117_s3 = inlined_call_operand.vmem [shape: f32[2,5,64], index: 3, kind: output, shape index: {}]  }
   0x1 LB: > { %s537_s13 = sadd.s32 4294967295, %s762_s12   ;;  %p541_p0 = scmp.ge.s32.totalorder %s762_s12, 1  ;;  %s762_s12 = sphi %s784_s12, %s13_s12  }
   0x2   : > { %p137_p1 = scmp.lt.s32.totalorder %s762_s12, 3 }
   0x4   : > { %p138_p2 = pnand %p541_p0, %p137_p1 }
   0x5   : > { %v191_v0 = vld [vmem:[%s1115_s1 + $0x80] sm:$0xff] (!%p138_p2)  ;;  %v192_v1 = vld [vmem:[%s1115_s1 + $0x88] sm:$0xff] (!%p138_p2)  ;;  %v193_v11 = vld [vmem:[%s1115_s1 + $0x90] sm:$0xff] (!%p138_p2)  ;;  %p848_p3 = scmp.lt.s32.totalorder (!%p138_p2), %s537_s13, 1  ;;  %vm482_vm0 = vcmask (!%p138_p2), 520192  }
   0x6   : > { %141 = sbr.rel (%p138_p2) target bundleno = 290 (0x122), region = 32  ;;  %v175_v2 = vld [vmem:[%s1115_s1] sm:$0xff] (!%p138_p2)  ;;  %v651_v3 = vpack.c.bf16 (!%p138_p2), %v192_v1, %v191_v0  ;;  %v176_v4 = vld [vmem:[%s1115_s1 + $0x8] sm:$0xff] (!%p138_p2)  ;;  %v194_v13 = vld [vmem:[%s1115_s1 + $0x98] sm:$0xff] (!%p138_p2) }
   0x7   : > { %v223_v5 = vld [vmem:[%s1115_s1 + $0x180] sm:$0xff] (!%p138_p2)  ;;  %v224_v6 = vld [vmem:[%s1115_s1 + $0x188] sm:$0xff] (!%p138_p2)  ;;  %v653_v7 = vpack.c.bf16 (!%p138_p2), %v176_v4, %v175_v2  ;;  %v177_v14 = vld [vmem:[%s1115_s1 + $0x10] sm:$0xff] (!%p138_p2)  ;;  %v655_v16 = vpack.c.bf16 (!%p138_p2), %v194_v13, %v193_v11 }
   0x8   : > { %v683_v8 = vpack.c.bf16 (!%p138_p2), %v224_v6, %v223_v5  ;;  %v207_v9 = vld [vmem:[%s1115_s1 + $0x100] sm:$0xff] (!%p138_p2)  ;;  %v208_v10 = vld [vmem:[%s1115_s1 + $0x108] sm:$0xff] (!%p138_p2)  ;;  %652 = vmatprep.subr.bf16.mxu0 (!%p138_p2), %v651_v3  ;;  %v178_v15 = vld [vmem:[%s1115_s1 + $0x18] sm:$0xff] (!%p138_p2) }
   0x9   : > { %v685_v12 = vpack.c.bf16 (!%p138_p2), %v208_v10, %v207_v9  ;;  %654 = vmatpush3.bf16.msra.mxu0 (!%p138_p2), %v653_v7  ;;  %v657_v17 = vpack.c.bf16 (!%p138_p2), %v178_v15, %v177_v14  ;;  %v225_v18 = vld [vmem:[%s1115_s1 + $0x190] sm:$0xff] (!%p138_p2)  ;;  %v226_v19 = vld [vmem:[%s1115_s1 + $0x198] sm:$0xff] (!%p138_p2)  ;;  %v195_v23 = vld [vmem:[%s1115_s1 + $0xa0] sm:$0xff] (!%p138_p2) }
   0xa   : > { %684 = vmatprep.subr.bf16.mxu1 (!%p138_p2), %v683_v8  ;;  %v209_v20 = vld [vmem:[%s1115_s1 + $0x110] sm:$0xff] (!%p138_p2)  ;;  %v687_v21 = vpack.c.bf16 (!%p138_p2), %v226_v19, %v225_v18  ;;  %v210_v22 = vld [vmem:[%s1115_s1 + $0x118] sm:$0xff] (!%p138_p2)  ;;  %v196_v24 = vld [vmem:[%s1115_s1 + $0xa8] sm:$0xff] (!%p138_p2)  ;;  %656 = vmatprep.subr.bf16.mxu0 (!%p138_p2), %v655_v16 }
   0xb   : > { %686 = vmatpush3.bf16.msra.mxu1 (!%p138_p2), %v685_v12  ;;  %v689_v25 = vpack.c.bf16 (!%p138_p2), %v210_v22, %v209_v20  ;;  %v659_v26 = vpack.c.bf16 (!%p138_p2), %v196_v24, %v195_v23  ;;  %v179_v27 = vld [vmem:[%s1115_s1 + $0x20] sm:$0xff] (!%p138_p2)  ;;  %v180_v28 = vld [vmem:[%s1115_s1 + $0x28] sm:$0xff] (!%p138_p2)  ;;  %v197_v35 = vld [vmem:[%s1115_s1 + $0xb0] sm:$0xff] (!%p138_p2) }
   0xc   : > { %v227_v29 = vld [vmem:[%s1115_s1 + $0x1a0] sm:$0xff] (!%p138_p2)  ;;  %688 = vmatprep.subr.bf16.mxu1 (!%p138_p2), %v687_v21  ;;  %v228_v30 = vld [vmem:[%s1115_s1 + $0x1a8] sm:$0xff] (!%p138_p2)  ;;  %v661_v33 = vpack.c.bf16 (!%p138_p2), %v180_v28, %v179_v27  ;;  %v198_v36 = vld [vmem:[%s1115_s1 + $0xb8] sm:$0xff] (!%p138_p2) }
   0xd   : > { %v211_v31 = vld [vmem:[%s1115_s1 + $0x120] sm:$0xff]  ;;  %v212_v32 = vld [vmem:[%s1115_s1 + $0x128] sm:$0xff]  ;;  %658 = vmatpush3.bf16.msra.mxu0 %v657_v17  ;;  %v691_v34 = vpack.c.bf16 %v228_v30, %v227_v29  ;;  %v181_v37 = vld [vmem:[%s1115_s1 + $0x30] sm:$0xff]  ;;  %v663_v39 = vpack.c.bf16 %v198_v36, %v197_v35  ;;  %s1120_s13 = smov (!%p848_p3, %s537_s13), 1 }
   0xe   : > { %660 = vmatprep.subr.bf16.mxu0 %v659_v26  ;;  %v693_v38 = vpack.c.bf16 %v212_v32, %v211_v31  ;;  %v182_v40 = vld [vmem:[%s1115_s1 + $0x38] sm:$0xff]  ;;  %v229_v41 = vld [vmem:[%s1115_s1 + $0x1b0] sm:$0xff]  ;;  %v199_v46 = vld [vmem:[%s1115_s1 + $0xc0] sm:$0xff]  ;;  %s747_s18 = smul.u32 48, %s1120_s13  ;;  %s543_s17 = sshll.u32 %s1120_s13, 3 }
   0xf   : > { %690 = vmatpush3.bf16.msra.mxu1 %v689_v25  ;;  %v230_v42 = vld [vmem:[%s1115_s1 + $0x1b8] sm:$0xff]  ;;  %v213_v44 = vld [vmem:[%s1115_s1 + $0x130] sm:$0xff]  ;;  %v200_v47 = vld [vmem:[%s1115_s1 + $0xc8] sm:$0xff]  ;;  %v665_v48 = vpack.c.bf16 %v182_v40, %v181_v37 }
  0x10   : > { %692 = vmatprep.subr.bf16.mxu1 %v691_v34  ;;  %v695_v43 = vpack.c.bf16 %v230_v42, %v229_v41  ;;  %v214_v45 = vld [vmem:[%s1115_s1 + $0x138] sm:$0xff]  ;;  %v231_v49 = vld [vmem:[%s1115_s1 + $0x1c0] sm:$0xff]  ;;  %v232_v50 = vld [vmem:[%s1115_s1 + $0x1c8] sm:$0xff]  ;;  %v667_v52 = vpack.c.bf16 %v200_v47, %v199_v46  ;;  %s949_s10 = scalar_lea.vmem %s1114_s0, %s747_s18 }
  0x11   : > { %662 = vmatpush3.bf16.msra.mxu0 %v661_v33  ;;  %v697_v51 = vpack.c.bf16 %v214_v45, %v213_v44  ;;  %v183_v53 = vld [vmem:[%s1115_s1 + $0x40] sm:$0xff]  ;;  %v184_v54 = vld [vmem:[%s1115_s1 + $0x48] sm:$0xff]  ;;  %v699_v56 = vpack.c.bf16 %v232_v50, %v231_v49  ;;  %v201_v58 = vld [vmem:[%s1115_s1 + $0xd0] sm:$0xff] }
  0x12   : > { %664 = vmatprep.subr.bf16.mxu0 %v663_v39  ;;  %v215_v55 = vld [vmem:[%s1115_s1 + $0x140] sm:$0xff]  ;;  %v216_v57 = vld [vmem:[%s1115_s1 + $0x148] sm:$0xff]  ;;  %v202_v59 = vld [vmem:[%s1115_s1 + $0xd8] sm:$0xff]  ;;  %v669_v62 = vpack.c.bf16 %v184_v54, %v183_v53 }
  0x13   : > { %694 = vmatpush3.bf16.msra.mxu1 %v693_v38  ;;  %v233_v60 = vld [vmem:[%s1115_s1 + $0x1d0] sm:$0xff]  ;;  %v234_v61 = vld [vmem:[%s1115_s1 + $0x1d8] sm:$0xff]  ;;  %v701_v63 = vpack.c.bf16 %v216_v57, %v215_v55  ;;  %v671_v0 = vpack.c.bf16 %v202_v59, %v201_v58  ;;  %v203_v6 = vld [vmem:[%s1115_s1 + $0xe0] sm:$0xff] }
  0x14   : > { %696 = vmatprep.subr.bf16.mxu1 %v695_v43  ;;  %v185_v1 = vld [vmem:[%s1115_s1 + $0x50] sm:$0xff]  ;;  %v186_v2 = vld [vmem:[%s1115_s1 + $0x58] sm:$0xff]  ;;  %v703_v4 = vpack.c.bf16 %v234_v61, %v233_v60  ;;  %v204_v7 = vld [vmem:[%s1115_s1 + $0xe8] sm:$0xff] }
  0x15   : > { %666 = vmatpush3.bf16.msra.mxu0 %v665_v48  ;;  %v217_v3 = vld [vmem:[%s1115_s1 + $0x150] sm:$0xff]  ;;  %v218_v5 = vld [vmem:[%s1115_s1 + $0x158] sm:$0xff]  ;;  %v235_v8 = vld [vmem:[%s1115_s1 + $0x1e0] sm:$0xff]  ;;  %v673_v10 = vpack.c.bf16 %v186_v2, %v185_v1  ;;  %v675_v14 = vpack.c.bf16 %v204_v7, %v203_v6 }
  0x16   : > { %668 = vmatprep.subr.bf16.mxu0 %v667_v52  ;;  %v236_v9 = vld [vmem:[%s1115_s1 + $0x1e8] sm:$0xff]  ;;  %v187_v11 = vld [vmem:[%s1115_s1 + $0x60] sm:$0xff]  ;;  %v705_v13 = vpack.c.bf16 %v218_v5, %v217_v3  ;;  %v205_v19 = vld [vmem:[%s1115_s1 + $0xf0] sm:$0xff] }
  0x17   : > { %698 = vmatpush3.bf16.msra.mxu1 %v697_v51  ;;  %v170_v12 = vld [vmem:[%s949_s10 + $0x8] sm:$0x1f]  ;;  %v219_v16 = vld [vmem:[%s1115_s1 + $0x160] sm:$0xff]  ;;  %v707_v18 = vpack.c.bf16 %v236_v9, %v235_v8  ;;  %v206_v20 = vld [vmem:[%s1115_s1 + $0xf8] sm:$0xff] }
  0x18   : > { %700 = vmatprep.subr.bf16.mxu1 %v699_v56  ;;  %v188_v15 = vld [vmem:[%s1115_s1 + $0x68] sm:$0xff]  ;;  %336 = vmatprep.mubr.f32.mxu0 %v170_v12  ;;  %v172_v21 = vld [vmem:[%s949_s10 + $0x18] sm:$0x1f]  ;;  %v237_v22 = vld [vmem:[%s1115_s1 + $0x1f0] sm:$0xff]  ;;  %v679_v26 = vpack.c.bf16 %v206_v20, %v205_v19 }
  0x19   : > { %670 = vmatpush3.bf16.msra.mxu0 %v669_v62  ;;  %v220_v17 = vld [vmem:[%s1115_s1 + $0x168] sm:$0xff]  ;;  %v238_v23 = vld [vmem:[%s1115_s1 + $0x1f8] sm:$0xff]  ;;  %406 = vmatprep.mubr.f32.mxu1 %v172_v21  ;;  %v677_v24 = vpack.c.bf16 %v188_v15, %v187_v11  ;;  %v189_v27 = vld [vmem:[%s1115_s1 + $0x70] sm:$0xff] }
  0x1a   : > { %672 = vmatprep.subr.bf16.mxu0 %v671_v0  ;;  %v709_v25 = vpack.c.bf16 %v220_v17, %v219_v16  ;;  %v190_v28 = vld [vmem:[%s1115_s1 + $0x78] sm:$0xff]  ;;  %v221_v29 = vld [vmem:[%s1115_s1 + $0x170] sm:$0xff]  ;;  %v711_v30 = vpack.c.bf16 %v238_v23, %v237_v22  ;;  %v255_v32 = vld [vmem:[%s1115_s1 + $0x280] sm:$0xff] }
  0x1b   : > { %702 = vmatpush3.bf16.msra.mxu1 %v701_v63  ;;  %v222_v31 = vld [vmem:[%s1115_s1 + $0x178] sm:$0xff]  ;;  %v256_v33 = vld [vmem:[%s1115_s1 + $0x288] sm:$0xff]  ;;  %v681_v34 = vpack.c.bf16 %v190_v28, %v189_v27  ;;  %v239_v37 = vld [vmem:[%s1115_s1 + $0x200] sm:$0xff] }
  0x1c   : > { %704 = vmatprep.subr.bf16.mxu1 %v703_v4  ;;  %v713_v35 = vpack.c.bf16 %v222_v31, %v221_v29  ;;  %v715_v36 = vpack.c.bf16 %v256_v33, %v255_v32  ;;  %v240_v38 = vld [vmem:[%s1115_s1 + $0x208] sm:$0xff]  ;;  %v257_v39 = vld [vmem:[%s1115_s1 + $0x290] sm:$0xff]  ;;  %v258_v40 = vld [vmem:[%s1115_s1 + $0x298] sm:$0xff] }
  0x1d   : > { %674 = vmatpush3.bf16.msra.mxu0 %v673_v10  ;;  %v169_v41 = vld [vmem:[%s949_s10] sm:$0x1f]  ;;  %v717_v42 = vpack.c.bf16 %v240_v38, %v239_v37  ;;  %v171_v43 = vld [vmem:[%s949_s10 + $0x10] sm:$0x1f]  ;;  %v719_v44 = vpack.c.bf16 %v258_v40, %v257_v39  ;;  %v242_v46 = vld [vmem:[%s1115_s1 + $0x218] sm:$0xff] }
  0x1e   : > { %676 = vmatprep.subr.bf16.mxu0 %v675_v14  ;;  %v241_v45 = vld [vmem:[%s1115_s1 + $0x210] sm:$0xff]  ;;  %v259_v47 = vld [vmem:[%s1115_s1 + $0x2a0] sm:$0xff]  ;;  %v260_v48 = vld [vmem:[%s1115_s1 + $0x2a8] sm:$0xff] }
  0x1f   : > { %706 = vmatpush3.bf16.msra.mxu1 %v705_v13  ;;  %v174_v49 = vld [vmem:[%s949_s10 + $0x28] sm:$0x1f]  ;;  %v721_v50 = vpack.c.bf16 %v242_v46, %v241_v45  ;;  %v723_v51 = vpack.c.bf16 %v260_v48, %v259_v47  ;;  %v243_v52 = vld [vmem:[%s1115_s1 + $0x220] sm:$0xff]  ;;  %v261_v54 = vld [vmem:[%s1115_s1 + $0x2b0] sm:$0xff] }
  0x20   : > { %708 = vmatprep.subr.bf16.mxu1 %v707_v18  ;;  %v244_v53 = vld [vmem:[%s1115_s1 + $0x228] sm:$0xff]  ;;  %v262_v55 = vld [vmem:[%s1115_s1 + $0x2b8] sm:$0xff]  ;;  %v245_v58 = vld [vmem:[%s1115_s1 + $0x230] sm:$0xff] }
  0x21   : > { %678 = vmatpush3.bf16.msra.mxu0 %v677_v24  ;;  %v725_v56 = vpack.c.bf16 %v244_v53, %v243_v52  ;;  %v727_v57 = vpack.c.bf16 %v262_v55, %v261_v54  ;;  %v246_v59 = vld [vmem:[%s1115_s1 + $0x238] sm:$0xff]  ;;  %v263_v60 = vld [vmem:[%s1115_s1 + $0x2c0] sm:$0xff]  ;;  %v264_v61 = vld [vmem:[%s1115_s1 + $0x2c8] sm:$0xff] }
  0x22   : > { %680 = vmatprep.subr.bf16.mxu0 %v679_v26  ;;  %v729_v62 = vpack.c.bf16 %v246_v59, %v245_v58  ;;  %v731_v63 = vpack.c.bf16 %v264_v61, %v263_v60  ;;  %v247_v0 = vld [vmem:[%s1115_s1 + $0x240] sm:$0xff]  ;;  %v248_v1 = vld [vmem:[%s1115_s1 + $0x248] sm:$0xff]  ;;  %v265_v2 = vld [vmem:[%s1115_s1 + $0x2d0] sm:$0xff] }
  0x23   : > { %710 = vmatpush3.bf16.msra.mxu1 %v709_v25  ;;  %v266_v3 = vld [vmem:[%s1115_s1 + $0x2d8] sm:$0xff]  ;;  %v733_v4 = vpack.c.bf16 %v248_v1, %v247_v0  ;;  %v249_v6 = vld [vmem:[%s1115_s1 + $0x250] sm:$0xff]  ;;  %v267_v8 = vld [vmem:[%s1115_s1 + $0x2e0] sm:$0xff] }
  0x24   : > { %712 = vmatprep.subr.bf16.mxu1 %v711_v30  ;;  %v735_v5 = vpack.c.bf16 %v266_v3, %v265_v2  ;;  %v250_v7 = vld [vmem:[%s1115_s1 + $0x258] sm:$0xff]  ;;  %v268_v9 = vld [vmem:[%s1115_s1 + $0x2e8] sm:$0xff]  ;;  %v251_v12 = vld [vmem:[%s1115_s1 + $0x260] sm:$0xff] }
  0x25   : > { %682 = vmatpush3.bf16.msra.mxu0 %v681_v34  ;;  %v737_v10 = vpack.c.bf16 %v250_v7, %v249_v6  ;;  %v739_v11 = vpack.c.bf16 %v268_v9, %v267_v8  ;;  %v252_v13 = vld [vmem:[%s1115_s1 + $0x268] sm:$0xff]  ;;  %v269_v14 = vld [vmem:[%s1115_s1 + $0x2f0] sm:$0xff]  ;;  %v270_v15 = vld [vmem:[%s1115_s1 + $0x2f8] sm:$0xff] }
  0x26   : > { %716 = vmatprep.subr.bf16.mxu0 %v715_v36  ;;  %v741_v16 = vpack.c.bf16 %v252_v13, %v251_v12  ;;  %v743_v17 = vpack.c.bf16 %v270_v15, %v269_v14  ;;  %v253_v18 = vld [vmem:[%s1115_s1 + $0x270] sm:$0xff]  ;;  %v254_v19 = vld [vmem:[%s1115_s1 + $0x278] sm:$0xff]  ;;  %v173_v21 = vld [vmem:[%s949_s10 + $0x20] sm:$0x1f]  ;;  %s168_s10 = scalar_lea.vmem %s1117_s3, %s543_s17 }
  0x27   : > { %714 = vmatpush3.bf16.msra.mxu1 %v713_v35  ;;  %v745_v20 = vpack.c.bf16 %v254_v19, %v253_v18  ;;  %v271_v23 = vld [vmem:[%s1116_s2] sm:$0x1f] }
  0x28   : > { %337 = vmatmul.mubr.f32.vlgmr.msra.gmra.mrb[0].mxu0 %v169_v41 }
  0x29   : > { %718 = vmatpush3.bf16.msra.mxu0 %v717_v42  ;;  %476 = vmatprep.mubr.f32.mxu0 %v174_v49 }
  0x2a   : > { %407 = vmatmul.mubr.f32.vlgmr.msra.gmra.mrb[0].mxu1 %v171_v43  ;;  %720 = vmatprep.subr.bf16.mxu0 %v719_v44 }
  0x2d   : > { %722 = vmatpush3.bf16.msra.mxu0 %v721_v50 }
  0x2e   : > { %724 = vmatprep.subr.bf16.mxu0 %v723_v51 }
  0x31   : > { %726 = vmatpush3.bf16.msra.mxu0 %v725_v56 }
  0x32   : > { %728 = vmatprep.subr.bf16.mxu0 %v727_v57 }
  0x35   : > { %730 = vmatpush3.bf16.msra.mxu0 %v729_v62 }
  0x36   : > { %732 = vmatprep.subr.bf16.mxu0 %v731_v63 }
  0x39   : > { %734 = vmatpush3.bf16.msra.mxu0 %v733_v4 }
  0x3a   : > { %736 = vmatprep.subr.bf16.mxu0 %v735_v5 }
  0x3d   : > { %738 = vmatpush3.bf16.msra.mxu0 %v737_v10 }
  0x3e   : > { %740 = vmatprep.subr.bf16.mxu0 %v739_v11 }
  0x41   : > { %742 = vmatpush3.bf16.msra.mxu0 %v741_v16 }
  0x42   : > { %744 = vmatprep.subr.bf16.mxu0 %v743_v17 }
  0x45   : > { %746 = vmatpush3.bf16.msra.mxu0 %v745_v20 }
  0x48   : > { %477 = vmatmul.mubr.f32.vlgmr.msra.gmra.mrb[2].mxu0 %v173_v21 }
  0xfb   : > { %v578_v22 = vpop.f32.mrb[0].mxu0 }
  0xfc   : > { %v579_v24 = vpop.f32.mrb[1].mxu0 }
  0xfd   : > { %v613_v25 = vpop.f32.mrb[0].mxu1  ;;  %v580_v26 = vadd.f32 %v579_v24, %v578_v22 }
  0xfe   : > { %v614_v27 = vpop.f32.mrb[1].mxu1 }
  0xff   : > { %v615_v28 = vadd.f32 %v614_v27, %v613_v25  ;;  %v339_v29 = vadd.f32 %v580_v26, %v271_v23 }
 0x101   : > { %v409_v30 = vadd.f32 %v615_v28, %v339_v29 }
 0x11b   : > { %v648_v31 = vpop.f32.mrb[2].mxu0 }
 0x11c   : > { %v649_v32 = vpop.f32.mrb[3].mxu0 }
 0x11d   : > { %v650_v33 = vadd.f32 %v649_v32, %v648_v31 }
 0x11f   : > { %v479_v34 = vadd.f32 %v650_v33, %v409_v30 }
 0x121   : > { %483 = vst.msk [vmem:[%s168_s10] sm:$0x1f] %vm482_vm0, %v479_v34 }
 0x122 PF: > { %s13_s12 = sadd.s32 1, %s762_s12  }
 0x123   : > { %p10_p4 = scmp.ge.s32.totalorder %s13_s12, 4  }
 0x125   :  { %12 = sbr.rel (!%p10_p4) target bundleno = 1 (0x1), region = 62 }

// kernel: image_captioning_forward.8
= control target key start
LH: loop header
LB: loop body
LE: loop exit
PB: predicated region body
PF: predicated region fallthrough
CT: control target
= control target key end

     0   :  { %s2239_s25 = smov 0   ;;  %s2616_s0 = inlined_call_operand.vmem [shape: f32[2,5,64], index: 0, kind: input, shape index: {}]   ;;  %s2617_s1 = inlined_call_operand.vmem [shape: f32[1,64], index: 1, kind: input, shape index: {}]   ;;  %s2618_s2 = inlined_call_operand.vmem [shape: f32[1,64], index: 2, kind: input, shape index: {}]   ;;  %s2619_s3 = inlined_call_operand.vmem [shape: f32[64,192], index: 3, kind: input, shape index: {}]   ;;  %s2620_s4 = inlined_call_operand.vmem [shape: f32[1,192], index: 4, kind: input, shape index: {}]   ;;  %s2621_s5 = inlined_call_operand.vmem [shape: f32[64,64], index: 5, kind: input, shape index: {}]   ;;  %s2622_s6 = inlined_call_operand.vmem [shape: f32[1,64], index: 6, kind: input, shape index: {}]   ;;  %s2623_s7 = inlined_call_operand.vmem [shape: f32[1,64], index: 7, kind: input, shape index: {}]   ;;  %s2624_s8 = inlined_call_operand.vmem [shape: f32[1,64], index: 8, kind: input, shape index: {}]   ;;  %s2625_s9 = inlined_call_operand.vmem [shape: f32[64,256], index: 9, kind: input, shape index: {}]   ;;  %s2626_s10 = inlined_call_operand.vmem [shape: f32[1,256], index: 10, kind: input, shape index: {}]   ;;  %s2627_s11 = inlined_call_operand.vmem [shape: f32[256,64], index: 11, kind: input, shape index: {}]   ;;  %s2628_s12 = inlined_call_operand.vmem [shape: f32[1,64], index: 12, kind: input, shape index: {}]   ;;  %s2629_s13 = inlined_call_operand.vmem [shape: f32[2,5,64], index: 13, kind: output, shape index: {}]  }
   0x1 LB: > { %s1865_s26 = sadd.s32 4294967295, %s2157_s25   ;;  %p1869_p0 = scmp.ge.s32.totalorder %s2157_s25, 1  ;;  %s2157_s25 = sphi %s2239_s25, %s23_s25  }
   0x2   : > { %p386_p1 = scmp.lt.s32.totalorder %s2157_s25, 3 }
   0x4   : > { %p387_p2 = pnand %p1869_p0, %p386_p1 }
   0x5   : > { %p428_p3 = scmp.lt.s32.totalorder (!%p387_p2), %s1865_s26, 1  ;;  %vm439_vm0 = vcmask (!%p387_p2), 520192   ;;  %v469_v7 = vld [vmem:[%s2619_s3 + $0x8] sm:$0xff] (!%p387_p2)  ;;  %v471_v8 = vld [vmem:[%s2619_s3 + $0x18] sm:$0xff] (!%p387_p2)  ;;  %v468_v10 = vld [vmem:[%s2619_s3] sm:$0xff] (!%p387_p2)  ;;  %v2159_v20 = vmov (!%p387_p2), 0.0   ;;  %v486_v41 = vlaneseq (!%p387_p2) }
   0x6   : > { %390 = sbr.rel (%p387_p2) target bundleno = 3671 (0xe57), region = 72  ;;  %v2033_v9 = vpack.c.bf16 (!%p387_p2), %v471_v8, %v469_v7  ;;  %v470_v11 = vld [vmem:[%s2619_s3 + $0x10] sm:$0xff] (!%p387_p2)  ;;  %v473_v13 = vld [vmem:[%s2619_s3 + $0x28] sm:$0xff] (!%p387_p2)  ;;  %v475_v14 = vld [vmem:[%s2619_s3 + $0x38] sm:$0xff] (!%p387_p2)  ;;  %564 = vmatprep.mubr.f32.mxu0 (!%p387_p2), %v2159_v20  ;;  %1975 = vmatprep.subr.mxu1 (!%p387_p2), %v2159_v20  ;;  %vm496_vm1 = vcmask (!%p387_p2), 523264   ;;  %vm2160_vm2 = vmmov (!%p387_p2), 0  }
   0x7   : > { %v2035_v12 = vpack.c.bf16 (!%p387_p2), %v470_v11, %v468_v10  ;;  %v472_v15 = vld [vmem:[%s2619_s3 + $0x20] sm:$0xff] (!%p387_p2)  ;;  %v2037_v16 = vpack.c.bf16 (!%p387_p2), %v475_v14, %v473_v13  ;;  %v474_v17 = vld [vmem:[%s2619_s3 + $0x30] sm:$0xff] (!%p387_p2)  ;;  %v477_v18 = vld [vmem:[%s2619_s3 + $0x48] sm:$0xff] (!%p387_p2)  ;;  %v2319_v42 = vshrl.u32 (!%p387_p2), %v486_v41, 7  ;;  %1977 = vmatprep.mubr.msk.f32.mxu1 (!%p387_p2), %vm2160_vm2, %v2159_v20  ;;  %s2161_s24 = smov (!%p387_p2), 64   ;;  %s2162_s28 = smov (!%p387_p2), 48  }
   0x8   : > { %2034 = vmatprep.subr.bf16.mxu0 (!%p387_p2), %v2033_v9  ;;  %v479_v19 = vld [vmem:[%s2619_s3 + $0x58] sm:$0xff] (!%p387_p2)  ;;  %v2039_v21 = vpack.c.bf16 (!%p387_p2), %v474_v17, %v472_v15  ;;  %v476_v23 = vld [vmem:[%s2619_s3 + $0x40] sm:$0xff] (!%p387_p2)  ;;  %v478_v24 = vld [vmem:[%s2619_s3 + $0x50] sm:$0xff] (!%p387_p2)  ;;  %s2163_s29 = smov (!%p387_p2), 112   ;;  %vm583_vm3 = vcmask (!%p387_p2), 130048   ;;  %vm675_vm4 = vcmask (!%p387_p2), 1044480  }
   0x9   : > { %2036 = vmatpush1.bf16.msra.mxu0 (!%p387_p2), %v2035_v12  ;;  %v2041_v22 = vpack.c.bf16 (!%p387_p2), %v479_v19, %v477_v18  ;;  %v481_v25 = vld [vmem:[%s2619_s3 + $0x68] sm:$0xff] (!%p387_p2)  ;;  %v483_v26 = vld [vmem:[%s2619_s3 + $0x78] sm:$0xff] (!%p387_p2)  ;;  %v2043_v27 = vpack.c.bf16 (!%p387_p2), %v478_v24, %v476_v23  ;;  %v480_v29 = vld [vmem:[%s2619_s3 + $0x60] sm:$0xff] (!%p387_p2)  ;;  %v488_v43 = vsub.s32 (!%p387_p2), 0, %v2319_v42  ;;  %v492_v49 = vsub.s32 (!%p387_p2), 1, %v2319_v42  ;;  %s2165_s14 = smov (!%p387_p2), 96  }
   0xa   : > { %2038 = vmatprep.subr.bf16.mxu0 (!%p387_p2), %v2037_v16  ;;  %v2045_v28 = vpack.c.bf16 (!%p387_p2), %v483_v26, %v481_v25  ;;  %v482_v30 = vld [vmem:[%s2619_s3 + $0x70] sm:$0xff] (!%p387_p2)  ;;  %v1872_v36 = vld [vmem:[%s2617_s1] ss:$0 sm:$0xff] (!%p387_p2)  ;;  %vm659_vm5 = vcmask (!%p387_p2), 36864   ;;  %vm671_vm6 = vcmask (!%p387_p2), 39936   ;;  %v2166_v14 = vmov (!%p387_p2), 0.0|0.0  }
   0xb   : > { %v2047_v31 = vpack.c.bf16 (!%p387_p2), %v482_v30, %v480_v29  ;;  %v1873_v38 = vld [vmem:[%s2618_s2] ss:$0 sm:$0xff] (!%p387_p2)  ;;  %v572_v16 = vld [vmem:[%s2621_s5 + $0x8] sm:$0xff] (!%p387_p2)  ;;  %v573_v19 = vld [vmem:[%s2621_s5 + $0x10] sm:$0xff] (!%p387_p2)  ;;  %s2167_s23 = smov (!%p387_p2), 80  }
   0xc   : > { %v484_v44 = vld [vmem:[%s2620_s4] sm:$0x3] (!%p387_p2) }
   0xd   : > { %s2631_s26 = smov (!%p428_p3, %s1865_s26), 1  ;;  %2040 = vmatpush1.bf16.msra.mxu0 %v2039_v21  ;;  %v489_v45 = vrot.slane %v484_v44, %v488_v43  ;;  %v493_v50 = vrot.slane %v484_v44, %v492_v49  ;;  %v571_v15 = vld [vmem:[%s2621_s5] sm:$0xff]  ;;  %v574_v21 = vld [vmem:[%s2621_s5 + $0x18] sm:$0xff] }
   0xe   : > { %s1870_s27 = sshll.u32 %s2631_s26, 3  ;;  %2042 = vmatprep.subr.bf16.mxu0 %v2041_v22  ;;  %v2053_v17 = vpack.c.bf16 %v572_v16, %v571_v15  ;;  %v2050_v23 = vpack.c.bf16 %v574_v21, %v573_v19 }
   0xf   : > { %s431_s30 = scalar_lea.vmem %s2616_s0, %s1870_s27  ;;  %s435_s15 = scalar_lea.vmem %s2629_s13, %s1870_s27 }
  0x10   : > { %v2255_v0 = vld [vmem:[%s431_s30] sm:$0x1f]  ;;  %s2164_s30 = smov 32  }
  0x11   : > { %v440_v1 = vsel %vm439_vm0, %v2255_v0, 0.0  ;;  %2044 = vmatpush1.bf16.msra.mxu0 %v2043_v27 }
  0x12   : > { %441 = vadd.xlane.f32.xlu0 %v440_v1  ;;  %2046 = vmatprep.subr.bf16.mxu0 %v2045_v28 }
  0x15   : > { %2048 = vmatpush1.bf16.msra.mxu0 %v2047_v31 }
  0x16   : > { %1965 = vmatprep.subr.mxu0 %v2159_v20 }
  0x9f   : > { %v442_v2 = vpop.xlane.xlu0 %441 }
  0xa0   : > { %v444_v3 = vmul.f32 0.015625, %v442_v2 }
  0xa2   : > { %v445_v4 = vsub.f32 %v2255_v0, %v444_v3 }
  0xa4   : > { %v446_v5 = vmul.f32 %v445_v4, %v445_v4 }
  0xa6   : > { %v447_v6 = vsel %vm439_vm0, %v446_v5, 0.0 }
  0xa7   : > { %448 = vadd.xlane.f32.xlu0 %v447_v6 }
 0x134   : > { %v449_v32 = vpop.xlane.xlu0 %448 }
 0x135   : > { %v450_v33 = vmul.f32 0.015625, %v449_v32 }
 0x137   : > { %v451_v34 = vadd.f32 1e-06, %v450_v33 }
 0x139   : > { %2127 = vrsqrt.f32 %v451_v34 }
 0x143   : > { %v2128_v35 = vpop.eup %2127 }
 0x144   : > { %v453_v37 = vmul.f32 %v2128_v35, %v445_v4 }
 0x146   : > { %v460_v39 = vmul.f32 %v1872_v36, %v453_v37 }
 0x148   : > { %v467_v40 = vadd.f32 %v1873_v38, %v460_v39 }
 0x14a   : > { %1874 = vmatmul.mubr.msk.f32.vlgmr.msra.gmra.mrb[0].mxu0 %vm496_vm1, %v467_v40 }
 0x14b   : > { %1967 = vmatprep.mubr.msk.f32.mxu0 %vm2160_vm2, %v2159_v20 }
 0x21d   : > { %v566_v46 = vpop.f32.mrb[0].mxu0 }
 0x21e   : > { %v2331_v47 = vadd.f32 %v566_v46, %v489_v45  ;;  %v568_v48 = vpop.f32.mrb[1].mxu0 }
 0x21f   : > { %v2343_v53 = vadd.f32 %v568_v48, %v493_v50  ;;  %v575_v50 = vld [vmem:[%s2621_s5 + $0x20] sm:$0xff] }
 0x220   : > { %581 = vrot.lane.b32.xlu0 %v2331_v47, %s2161_s24  ;;  %751 = vrot.lane.b32.xlu1 %v2331_v47, %s2162_s28  ;;  %s2168_s24 = smov 16  }
 0x224   : > { %749 = vrot.lane.b32.xlu1 %v2331_v47, %s2163_s29 }
 0x292   : > { %v582_v51 = vpop.permute.xlu0 %581  ;;  %v752_v52 = vpop.permute.xlu1 %751 }
 0x293   : > { %1966 = vmatpush3.xpose.msk.msra.mxu0 %vm583_vm3, %v582_v51  ;;  %1976 = vmatpush3.xpose.msk.msra.mxu1 %vm583_vm3, %v752_v52  ;;  %v576_v51 = vld [vmem:[%s2621_s5 + $0x28] sm:$0xff] }
 0x294   : > { %1970 = vmatprep.subr.mxu0 %v2159_v20  ;;  %1980 = vmatprep.subr.mxu1 %v2159_v20  ;;  %v2056_v52 = vpack.c.bf16 %v576_v51, %v575_v50  ;;  %v1594_v50 = vld [vmem:[%s2625_s9 + $0x68] sm:$0xff]  ;;  %v1596_v51 = vld [vmem:[%s2625_s9 + $0x78] sm:$0xff] }
 0x296   : > { %1968 = vmatmul.mubr.msk.f32.vlgmr.msra.gmra.mrb[2].mxu0 %vm583_vm3, %v2331_v47  ;;  %v750_v54 = vpop.permute.xlu1 %749 }
 0x297   : > { %1971 = vmatpush3.msk.msra.mxu0 %vm675_vm4, %v2343_v53  ;;  %1978 = vmatmul.mubr.msk.f32.vlgmr.msra.gmra.mrb[0].mxu1 %vm583_vm3, %v750_v54 }
 0x298   : > { %1982 = vmatprep.mubr.msk.f32.mxu1 %vm2160_vm2, %v2159_v20  ;;  %1972 = vmatprep.mubr.msk.f32.mxu0 %vm2160_vm2, %v2159_v20 }
 0x299   : > { %2049 = vmatprep.subr.bf16.mxu0 %v2166_v14 }
 0x369   : > { %v654_v55 = vpop.f32.mrb[2].mxu0 }
 0x36a   : > { %v1969_v56 = vpop.f32.mrb[3].mxu0  ;;  %v823_v57 = vpop.f32.mrb[0].mxu1  ;;  %v658_v3 = vmul.f32 0.25, %v654_v55 }
 0x36b   : > { %v827_v58 = vmul.f32 0.25, %v823_v57  ;;  %v1979_v59 = vpop.f32.mrb[1].mxu1 }
 0x36c   : > { %v660_v5 = vsel %vm659_vm5, %v658_v3, -inf }
 0x36d   : > { %v828_v60 = vsel %vm659_vm5, %v827_v58, -inf }
 0x36e   : > { %829 = vmax.xlane.f32.xlu1 %v828_v60 }
 0x37f   : > { %839 = vrot.lane.b32.xlu1 %v2343_v53, %s2163_s29 }
 0x3fb   : > { %v830_v61 = vpop.xlane.xlu1 %829 }
 0x3fc   : > { %v831_v62 = vsub.f32 %v827_v58, %v830_v61 }
 0x3fe   : > { %v832_v63 = vmul.f32 1.442695, %v831_v62 }
 0x3ff   : > { %v840_v1 = vpop.permute.xlu1 %839 }
 0x400   : > { %2129 = vpow2.f32 %v832_v63  ;;  %1981 = vmatpush3.msk.msra.mxu1 %vm675_vm4, %v840_v1 }
 0x401   : > { %2052 = vmatprep.subr.bf16.mxu1 %v2166_v14 }
 0x40a   : > { %v2130_v2 = vpop.eup %2129 }
 0x40b   : > { %v834_v4 = vsel %vm659_vm5, %v2130_v2, 0.0 }
 0x40c   : > { %835 = vadd.xlane.f32.xlu0 %v834_v4 }
 0x410   : > { %661 = vmax.xlane.f32.xlu0 %v660_v5 }
 0x426   : > { %1064 = vrot.lane.b32.xlu0 %v2331_v47, %s2164_s30 }
 0x42a   : > { %1062 = vrot.lane.b32.xlu0 %v2331_v47, %s2165_s14 }
 0x499   : > { %v836_v6 = vpop.xlane.xlu0 %835 }
 0x49a   : > { %2131 = vrcp.f32 %v836_v6 }
 0x49d   : > { %v662_v7 = vpop.xlane.xlu0 %661 }
 0x49e   : > { %v663_v8 = vsub.f32 %v658_v3, %v662_v7  ;;  %v577_v7 = vld [vmem:[%s2621_s5 + $0x30] sm:$0xff] }
 0x4a0   : > { %v664_v9 = vmul.f32 1.442695, %v663_v8  ;;  %v578_v8 = vld [vmem:[%s2621_s5 + $0x38] sm:$0xff] }
 0x4a1   : > { %v1065_v25 = vpop.permute.xlu0 %1064 }
 0x4a2   : > { %2133 = vpow2.f32 %v664_v9 }
 0x4a4   : > { %v2132_v10 = vpop.eup %2131 }
 0x4a5   : > { %v838_v11 = vmul.f32 %v2132_v10, %v2130_v2  ;;  %v1063_v28 = vpop.permute.xlu0 %1062 }
 0x4a7   : > { %1983 = vmatmul.mubr.msk.f32.vlgmr.msra.gmra.mrb[2].mxu1 %vm671_vm6, %v838_v11 }
 0x4a8   : > { %1996 = vmatprep.mubr.msk.f32.mxu1 %vm2160_vm2, %v2159_v20  ;;  %2054 = vmatpush3.bf16.msra.mxu1 %v2053_v17  ;;  %v1895_v17 = vld [vmem:[%s2622_s6] ss:$0 sm:$0xff] }
 0x4a9   : > { %2004 = vmatprep.subr.mxu1 %v2159_v20 }
 0x4ac   : > { %v2134_v12 = vpop.eup %2133 }
 0x4ad   : > { %v666_v13 = vsel %vm659_vm5, %v2134_v12, 0.0 }
 0x4ae   : > { %667 = vadd.xlane.f32.xlu1 %v666_v13 }
 0x4bf   : > { %1152 = vrot.lane.b32.xlu1 %v2343_v53, %s2165_s14 }
 0x53b   : > { %v668_v18 = vpop.xlane.xlu1 %667 }
 0x53c   : > { %2135 = vrcp.f32 %v668_v18 }
 0x53f   : > { %v1153_v30 = vpop.permute.xlu1 %1152 }
 0x546   : > { %v2136_v22 = vpop.eup %2135 }
 0x547   : > { %v670_v24 = vmul.f32 %v2136_v22, %v2134_v12 }
 0x549   : > { %1973 = vmatmul.mubr.msk.f32.vlgmr.msra.gmra.mrb[4].mxu0 %vm671_vm6, %v670_v24 }
 0x54a   : > { %2051 = vmatpush3.bf16.msra.mxu0 %v2050_v23  ;;  %1989 = vmatprep.mubr.msk.f32.mxu0 %vm2160_vm2, %v2159_v20 }
 0x54b   : > { %1999 = vmatprep.subr.mxu0 %v2159_v20 }
 0x57a   : > { %v912_v26 = vpop.f32.mrb[2].mxu1 }
 0x57b   : > { %v1984_v27 = vpop.f32.mrb[3].mxu1  ;;  %1990 = vmatmul.mubr.msk.f32.vlgmr.msra.gmra.mrb[6].mxu0 %vm583_vm3, %v912_v26 }
 0x57c   : > { %2000 = vmatpush3.xpose.msk.msra.mxu0 %vm583_vm3, %v1065_v25  ;;  %2001 = vmatprep.mubr.msk.f32.mxu0 %vm2160_vm2, %v2159_v20 }
 0x57d   : > { %2055 = vmatprep.subr.bf16.mxu0 %v2166_v14 }
 0x57f   : > { %2002 = vmatmul.mubr.msk.f32.vlgmr.msra.gmra.mrb[8].mxu0 %vm583_vm3, %v1063_v28 }
 0x580   : > { %2013 = vmatprep.mubr.msk.f32.mxu0 %vm2160_vm2, %v2159_v20  ;;  %2057 = vmatpush3.bf16.msra.mxu0 %v2056_v52  ;;  %v2073_v52 = vpack.c.bf16 %v1596_v51, %v1594_v50  ;;  %v1715_v50 = vld [vmem:[%s2627_s11 + $0x70] sm:$0xff]  ;;  %v1716_v51 = vld [vmem:[%s2627_s11 + $0x78] sm:$0xff] }
 0x581   : > { %2021 = vmatprep.subr.mxu0 %v2159_v20 }
 0x61c   : > { %v745_v29 = vpop.f32.mrb[4].mxu0 }
 0x61d   : > { %v1974_v31 = vpop.f32.mrb[5].mxu0  ;;  %1997 = vmatmul.mubr.msk.f32.vlgmr.msra.gmra.mrb[4].mxu1 %vm583_vm3, %v745_v29  ;;  %v1582_v29 = vld [vmem:[%s2625_s9 + $0x8] sm:$0xff] }
 0x61e   : > { %2005 = vmatpush3.msk.msra.mxu1 %vm675_vm4, %v1153_v30  ;;  %2006 = vmatprep.mubr.msk.f32.mxu1 %vm2160_vm2, %v2159_v20  ;;  %v1581_v31 = vld [vmem:[%s2625_s9] sm:$0xff] }
 0x61f   : > { %2016 = vmatprep.subr.mxu1 %v2159_v20 }
 0x64e   : > { %v985_v32 = vpop.f32.mrb[6].mxu0 }
 0x64f   : > { %v1991_v33 = vpop.f32.mrb[7].mxu0 }
 0x652   : > { %v1136_v34 = vpop.f32.mrb[8].mxu0 }
 0x653   : > { %v1140_v35 = vmul.f32 0.25, %v1136_v34  ;;  %v2003_v36 = vpop.f32.mrb[9].mxu0  ;;  %v1586_v34 = vld [vmem:[%s2625_s9 + $0x28] sm:$0xff] }
 0x655   : > { %v1141_v37 = vsel %vm659_vm5, %v1140_v35, -inf }
 0x656   : > { %1142 = vmax.xlane.f32.xlu0 %v1141_v37  ;;  %v1585_v37 = vld [vmem:[%s2625_s9 + $0x20] sm:$0xff] }
 0x66c   : > { %1303 = vrot.lane.b32.xlu0 %v2331_v47, %s2167_s23 }
 0x6e3   : > { %v1143_v38 = vpop.xlane.xlu0 %1142 }
 0x6e4   : > { %v1144_v39 = vsub.f32 %v1140_v35, %v1143_v38  ;;  %v1588_v35 = vld [vmem:[%s2625_s9 + $0x38] sm:$0xff]  ;;  %v1587_v38 = vld [vmem:[%s2625_s9 + $0x30] sm:$0xff] }
 0x6e5   : > { %v2065_v36 = vpack.c.bf16 %v1588_v35, %v1586_v34  ;;  %v1711_v34 = vld [vmem:[%s2627_s11 + $0x50] sm:$0xff]  ;;  %v1712_v35 = vld [vmem:[%s2627_s11 + $0x58] sm:$0xff] }
 0x6e6   : > { %v1145_v40 = vmul.f32 1.442695, %v1144_v39  ;;  %v2067_v39 = vpack.c.bf16 %v1587_v38, %v1585_v37  ;;  %v1730_v37 = vld [vmem:[%s2627_s11 + $0xe8] sm:$0xff]  ;;  %v2099_v38 = vpack.c.bf16 %v1712_v35, %v1711_v34 }
 0x6e8   : > { %2137 = vpow2.f32 %v1145_v40  ;;  %v1590_v40 = vld [vmem:[%s2625_s9 + $0x48] sm:$0xff] }
 0x6f0   : > { %v1058_v41 = vpop.f32.mrb[4].mxu1 }
 0x6f1   : > { %v1059_v44 = vadd.f32 %v1058_v41, %v985_v32  ;;  %v1998_v45 = vpop.f32.mrb[5].mxu1  ;;  %v1583_v32 = vld [vmem:[%s2625_s9 + $0x10] sm:$0xff]  ;;  %v1592_v41 = vld [vmem:[%s2625_s9 + $0x58] sm:$0xff] }
 0x6f2   : > { %v2138_v46 = vpop.eup %2137  ;;  %v2063_v33 = vpack.c.bf16 %v1583_v32, %v1581_v31  ;;  %v1589_v45 = vld [vmem:[%s2625_s9 + $0x40] sm:$0xff]  ;;  %v1728_v31 = vld [vmem:[%s2627_s11 + $0xd8] sm:$0xff] }
 0x6f3   : > { %v1147_v48 = vsel %vm659_vm5, %v2138_v46, 0.0 }
 0x6f4   : > { %1148 = vadd.xlane.f32.xlu1 %v1147_v48 }
 0x705   : > { %1305 = vrot.lane.b32.xlu1 %v2331_v47, %s2168_s24  ;;  %v1304_v47 = vpop.permute.xlu0 %1303 }
 0x781   : > { %v1149_v54 = vpop.xlane.xlu1 %1148 }
 0x782   : > { %2139 = vrcp.f32 %v1149_v54  ;;  %v1593_v54 = vld [vmem:[%s2625_s9 + $0x60] sm:$0xff] }
 0x785   : > { %v1306_v57 = vpop.permute.xlu1 %1305 }
 0x78c   : > { %v2140_v55 = vpop.eup %2139 }
 0x78d   : > { %v1151_v56 = vmul.f32 %v2140_v55, %v2138_v46  ;;  %v1591_v46 = vld [vmem:[%s2625_s9 + $0x50] sm:$0xff] }
 0x78e   : > { %v2071_v48 = vpack.c.bf16 %v1591_v46, %v1589_v45  ;;  %v1595_v55 = vld [vmem:[%s2625_s9 + $0x70] sm:$0xff]  ;;  %v1732_v45 = vld [vmem:[%s2627_s11 + $0xf8] sm:$0xff] }
 0x78f   : > { %2007 = vmatmul.mubr.msk.f32.vlgmr.msra.gmra.mrb[6].mxu1 %vm671_vm6, %v1151_v56  ;;  %v2075_v56 = vpack.c.bf16 %v1595_v55, %v1593_v54  ;;  %v1597_v54 = vld [vmem:[%s2626_s10] sm:$0x3] }
 0x790   : > { %2017 = vmatpush3.xpose.msk.msra.mxu1 %vm583_vm3, %v1306_v57  ;;  %2018 = vmatprep.mubr.msk.f32.mxu1 %vm2160_vm2, %v2159_v20  ;;  %v1717_v57 = vld [vmem:[%s2627_s11 + $0x80] sm:$0xff]  ;;  %v1602_v55 = vrot.slane %v1597_v54, %v488_v43 }
 0x791   : > { %2058 = vmatprep.subr.bf16.mxu1 %v2166_v14 }
 0x793   : > { %2019 = vmatmul.mubr.msk.f32.vlgmr.msra.gmra.mrb[8].mxu1 %vm583_vm3, %v1304_v47  ;;  %v1718_v47 = vld [vmem:[%s2627_s11 + $0x88] sm:$0xff] }
 0x794   : > { %2030 = vmatprep.mubr.msk.f32.mxu1 %vm2160_vm2, %v2159_v20 }
 0x862   : > { %v1225_v58 = vpop.f32.mrb[6].mxu1 }
 0x863   : > { %v2008_v59 = vpop.f32.mrb[7].mxu1  ;;  %2014 = vmatmul.mubr.msk.f32.vlgmr.msra.gmra.mrb[10].mxu0 %vm583_vm3, %v1225_v58  ;;  %v1701_v58 = vld [vmem:[%s2627_s11] sm:$0xff] }
 0x864   : > { %2023 = vmatprep.mubr.msk.f32.mxu0 %vm2160_vm2, %v2159_v20  ;;  %v2077_v59 = vpack.c.bf16 %v1718_v47, %v1717_v57 }
 0x866   : > { %v1377_v60 = vpop.f32.mrb[8].mxu1 }
 0x867   : > { %v1381_v61 = vmul.f32 0.25, %v1377_v60  ;;  %v2020_v62 = vpop.f32.mrb[9].mxu1  ;;  %v1702_v60 = vld [vmem:[%s2627_s11 + $0x8] sm:$0xff] }
 0x869   : > { %v1382_v63 = vsel %vm659_vm5, %v1381_v61, -inf }
 0x86a   : > { %1383 = vmax.xlane.f32.xlu1 %v1382_v63 }
 0x87b   : > { %1393 = vrot.lane.b32.xlu1 %v2343_v53, %s2167_s23  ;;  %v2059_v53 = vpack.c.bf16 %v578_v8, %v577_v7  ;;  %v1719_v8 = vld [vmem:[%s2627_s11 + $0x90] sm:$0xff] }
 0x87d   : > { %2060 = vmatpush3.bf16.msra.mxu1 %v2059_v53  ;;  %v1720_v53 = vld [vmem:[%s2627_s11 + $0x98] sm:$0xff] }
 0x87e   : > { %2078 = vmatprep.subr.bf16.mxu1 %v2077_v59 }
 0x8f7   : > { %v1384_v1 = vpop.xlane.xlu1 %1383 }
 0x8f8   : > { %v1385_v2 = vsub.f32 %v1381_v61, %v1384_v1  ;;  %v2079_v61 = vpack.c.bf16 %v1702_v60, %v1701_v58 }
 0x8fa   : > { %v1386_v3 = vmul.f32 1.442695, %v1385_v2 }
 0x8fb   : > { %v1394_v4 = vpop.permute.xlu1 %1393 }
 0x8fc   : > { %2141 = vpow2.f32 %v1386_v3  ;;  %2022 = vmatpush3.msk.msra.mxu0 %vm675_vm4, %v1394_v4  ;;  %v1896_v3 = vld [vmem:[%s2623_s7] ss:$0 sm:$0xff] }
 0x906   : > { %v2142_v5 = vpop.eup %2141 }
 0x907   : > { %v1388_v6 = vsel %vm659_vm5, %v2142_v5, 0.0 }
 0x908   : > { %1389 = vadd.xlane.f32.xlu0 %v1388_v6 }
 0x936   : > { %v1298_v9 = vpop.f32.mrb[10].mxu0 }
 0x937   : > { %v1302_v10 = vadd.f32 %v1298_v9, %v1059_v44  ;;  %v2015_v11 = vpop.f32.mrb[11].mxu0  ;;  %v2069_v44 = vpack.c.bf16 %v1592_v41, %v1590_v40  ;;  %v2081_v9 = vpack.c.bf16 %v1720_v53, %v1719_v8  ;;  %v1713_v40 = vld [vmem:[%s2627_s11 + $0x60] sm:$0xff]  ;;  %v1714_v41 = vld [vmem:[%s2627_s11 + $0x68] sm:$0xff] }
 0x938   : > { %v1704_v11 = vld [vmem:[%s2627_s11 + $0x18] sm:$0xff]  ;;  %v2103_v46 = vpack.c.bf16 %v1714_v41, %v1713_v40 }
 0x995   : > { %v1390_v12 = vpop.xlane.xlu0 %1389 }
 0x996   : > { %2143 = vrcp.f32 %v1390_v12 }
 0x9a0   : > { %v2144_v13 = vpop.eup %2143 }
 0x9a1   : > { %v1392_v14 = vmul.f32 %v2144_v13, %v2142_v5  ;;  %v1897_v5 = vld [vmem:[%s2624_s8] ss:$0 sm:$0xff] }
 0x9a2   : > { %v1721_v13 = vld [vmem:[%s2627_s11 + $0xa0] sm:$0xff] }
 0x9a3   : > { %2024 = vmatmul.mubr.msk.f32.vlgmr.msra.gmra.mrb[12].mxu0 %vm671_vm6, %v1392_v14  ;;  %v1722_v14 = vld [vmem:[%s2627_s11 + $0xa8] sm:$0xff] }
 0x9a4   : > { %1676 = vmatprep.mubr.f32.mxu0 %v2159_v20 }
 0xa76   : > { %v1466_v15 = vpop.f32.mrb[12].mxu0 }
 0xa77   : > { %v2025_v16 = vpop.f32.mrb[13].mxu0  ;;  %2031 = vmatmul.mubr.msk.f32.vlgmr.msra.gmra.mrb[10].mxu1 %vm583_vm3, %v1466_v15  ;;  %v2085_v15 = vpack.c.bf16 %v1722_v14, %v1721_v13 }
 0xa78   : > { %2080 = vmatpush3.bf16.msra.mxu1 %v2079_v61  ;;  %v1705_v16 = vld [vmem:[%s2627_s11 + $0x20] sm:$0xff] }
 0xa79   : > { %2082 = vmatprep.subr.bf16.mxu1 %v2081_v9 }
 0xb4a   : > { %v1539_v18 = vpop.f32.mrb[10].mxu1 }
 0xb4b   : > { %v1543_v19 = vadd.f32 %v1539_v18, %v1302_v10  ;;  %v2032_v21 = vpop.f32.mrb[11].mxu1  ;;  %v1703_v10 = vld [vmem:[%s2627_s11 + $0x10] sm:$0xff] }
 0xb4c   : > { %v2083_v12 = vpack.c.bf16 %v1704_v11, %v1703_v10  ;;  %v1724_v21 = vld [vmem:[%s2627_s11 + $0xb8] sm:$0xff] }
 0xb4d   : > { %v1550_v22 = vadd.f32 %v1895_v17, %v1543_v19  ;;  %v1706_v17 = vld [vmem:[%s2627_s11 + $0x28] sm:$0xff]  ;;  %v1723_v19 = vld [vmem:[%s2627_s11 + $0xb0] sm:$0xff] }
 0xb4e   : > { %2084 = vmatpush3.bf16.msra.mxu1 %v2083_v12  ;;  %v2087_v18 = vpack.c.bf16 %v1706_v17, %v1705_v16  ;;  %v1899_v12 = vld [vmem:[%s2628_s12] ss:$0 sm:$0xff] }
 0xb4f   : > { %v2439_v23 = vadd.f32 %v1550_v22, %v2255_v0  ;;  %v1584_v0 = vld [vmem:[%s2625_s9 + $0x18] sm:$0xff]  ;;  %2086 = vmatprep.subr.bf16.mxu1 %v2085_v15  ;;  %v2089_v22 = vpack.c.bf16 %v1724_v21, %v1723_v19 }
 0xb50   : > { %v2061_v30 = vpack.c.bf16 %v1584_v0, %v1582_v29  ;;  %v1710_v29 = vld [vmem:[%s2627_s11 + $0x48] sm:$0xff] }
 0xb51   : > { %v1554_v24 = vsel %vm439_vm0, %v2439_v23, 0.0 }
 0xb52   : > { %1555 = vadd.xlane.f32.xlu0 %v1554_v24  ;;  %2062 = vmatprep.subr.bf16.mxu0 %v2061_v30  ;;  %v1707_v24 = vld [vmem:[%s2627_s11 + $0x30] sm:$0xff] }
 0xb53   : > { %2064 = vmatpush1.bf16.msra.mxu0 %v2063_v33  ;;  %2088 = vmatpush3.bf16.msra.mxu1 %v2087_v18  ;;  %v1727_v30 = vld [vmem:[%s2627_s11 + $0xd0] sm:$0xff] }
 0xb54   : > { %2066 = vmatprep.subr.bf16.mxu0 %v2065_v36  ;;  %2090 = vmatprep.subr.bf16.mxu1 %v2089_v22  ;;  %v2097_v33 = vpack.c.bf16 %v1728_v31, %v1727_v30  ;;  %v1729_v36 = vld [vmem:[%s2627_s11 + $0xe0] sm:$0xff] }
 0xb57   : > { %2068 = vmatpush1.bf16.msra.mxu0 %v2067_v39  ;;  %v2101_v39 = vpack.c.bf16 %v1730_v37, %v1729_v36 }
 0xb58   : > { %2070 = vmatprep.subr.bf16.mxu0 %v2069_v44  ;;  %v1731_v44 = vld [vmem:[%s2627_s11 + $0xf0] sm:$0xff] }
 0xb5b   : > { %2072 = vmatpush1.bf16.msra.mxu0 %v2071_v48  ;;  %v2105_v48 = vpack.c.bf16 %v1732_v45, %v1731_v44 }
 0xb5c   : > { %2074 = vmatprep.subr.bf16.mxu0 %v2073_v52  ;;  %v2107_v52 = vpack.c.bf16 %v1716_v51, %v1715_v50 }
 0xb5f   : > { %2076 = vmatpush1.bf16.msra.mxu0 %v2075_v56  ;;  %v1606_v56 = vrot.slane %v1597_v54, %v492_v49 }
 0xbdf   : > { %v1556_v20 = vpop.xlane.xlu0 %1555 }
 0xbe0   : > { %v1557_v25 = vmul.f32 0.015625, %v1556_v20  ;;  %v1708_v20 = vld [vmem:[%s2627_s11 + $0x38] sm:$0xff] }
 0xbe2   : > { %v1558_v26 = vsub.f32 %v2439_v23, %v1557_v25  ;;  %v1725_v25 = vld [vmem:[%s2627_s11 + $0xc0] sm:$0xff] }
 0xbe4   : > { %v1559_v27 = vmul.f32 %v1558_v26, %v1558_v26 }
 0xbe6   : > { %v1560_v28 = vsel %vm439_vm0, %v1559_v27, 0.0  ;;  %v1726_v27 = vld [vmem:[%s2627_s11 + $0xc8] sm:$0xff] }
 0xbe7   : > { %1561 = vadd.xlane.f32.xlu1 %v1560_v28  ;;  %v1709_v28 = vld [vmem:[%s2627_s11 + $0x40] sm:$0xff]  ;;  %v2093_v0 = vpack.c.bf16 %v1726_v27, %v1725_v25 }
 0xbe8   : > { %v2095_v32 = vpack.c.bf16 %v1710_v29, %v1709_v28 }
 0xc74   : > { %v1562_v62 = vpop.xlane.xlu1 %1561 }
 0xc75   : > { %v1563_v63 = vmul.f32 0.015625, %v1562_v62 }
 0xc77   : > { %v1564_v1 = vadd.f32 1e-06, %v1563_v63 }
 0xc79   : > { %2145 = vrsqrt.f32 %v1564_v1 }
 0xc83   : > { %v2146_v2 = vpop.eup %2145 }
 0xc84   : > { %v1566_v4 = vmul.f32 %v2146_v2, %v1558_v26  ;;  %v2091_v26 = vpack.c.bf16 %v1708_v20, %v1707_v24 }
 0xc86   : > { %v1573_v6 = vmul.f32 %v1896_v3, %v1566_v4  ;;  %2092 = vmatpush3.bf16.msra.mxu1 %v2091_v26 }
 0xc87   : > { %2094 = vmatprep.subr.bf16.mxu1 %v2093_v0 }
 0xc88   : > { %v1580_v7 = vadd.f32 %v1897_v5, %v1573_v6 }
 0xc8a   : > { %1898 = vmatmul.mubr.msk.f32.vlgmr.msra.gmra.mrb[14].mxu0 %vm496_vm1, %v1580_v7  ;;  %2096 = vmatpush3.bf16.msra.mxu1 %v2095_v32 }
 0xc8b   : > { %2098 = vmatprep.subr.bf16.mxu1 %v2097_v33 }
 0xc8e   : > { %2100 = vmatpush3.bf16.msra.mxu1 %v2099_v38 }
 0xc8f   : > { %2102 = vmatprep.subr.bf16.mxu1 %v2101_v39 }
 0xc92   : > { %2104 = vmatpush3.bf16.msra.mxu1 %v2103_v46 }
 0xc93   : > { %2106 = vmatprep.subr.bf16.mxu1 %v2105_v48 }
 0xc96   : > { %2108 = vmatpush3.bf16.msra.mxu1 %v2107_v52 }
 0xd5d   : > { %v1678_v57 = vpop.f32.mrb[14].mxu0 }
 0xd5e   : > { %v1679_v47 = vadd.f32 %v1678_v57, %v1602_v55  ;;  %v1680_v58 = vpop.f32.mrb[15].mxu0 }
 0xd5f   : > { %v1681_v59 = vadd.f32 %v1680_v58, %v1606_v56 }
 0xd60   : > { %v1685_v60 = vmul.f32 0.044715, %v1679_v47  ;;  %v1683_v53 = vmul.f32 0.5, %v1679_v47 }
 0xd61   : > { %v1686_v61 = vmul.f32 0.044715, %v1681_v59  ;;  %v1684_v7 = vmul.f32 0.5, %v1681_v59 }
 0xd62   : > { %v1687_v62 = vmul.f32 %v1685_v60, %v1679_v47 }
 0xd63   : > { %v1688_v63 = vmul.f32 %v1686_v61, %v1681_v59 }
 0xd64   : > { %v1689_v1 = vmul.f32 %v1687_v62, %v1679_v47 }
 0xd65   : > { %v1690_v2 = vmul.f32 %v1688_v63, %v1681_v59 }
 0xd66   : > { %v1691_v3 = vadd.f32 %v1689_v1, %v1679_v47 }
 0xd67   : > { %v1692_v4 = vadd.f32 %v1690_v2, %v1681_v59 }
 0xd68   : > { %v1693_v5 = vmul.f32 0.7978846, %v1691_v3 }
 0xd69   : > { %v1694_v6 = vmul.f32 0.7978846, %v1692_v4 }
 0xd6a   : > { %2147 = vtanh.f32 %v1693_v5 }
 0xd6b   : > { %2149 = vtanh.f32 %v1694_v6 }
 0xd74   : > { %v2148_v43 = vpop.eup %2147 }
 0xd75   : > { %v2150_v42 = vpop.eup %2149  ;;  %v1697_v49 = vadd.f32 1.0, %v2148_v43 }
 0xd76   : > { %v1698_v8 = vadd.f32 1.0, %v2150_v42 }
 0xd77   : > { %v1699_v10 = vmul.f32 %v1697_v49, %v1683_v53 }
 0xd78   : > { %v1700_v9 = vmul.f32 %v1698_v8, %v1684_v7 }
 0xd7a   : > { %1804 = vmatprep.mubr.f32.mxu1 %v1700_v9 }
 0xd7b   : > { %1805 = vmatmul.mubr.f32.vlgmr.msra.gmra.mrb[12].mxu1 %v1699_v10 }
 0xe4e   : > { %v1962_v11 = vpop.f32.mrb[12].mxu1 }
 0xe4f   : > { %v1963_v13 = vpop.f32.mrb[13].mxu1 }
 0xe50   : > { %v1964_v14 = vadd.f32 %v1963_v13, %v1962_v11 }
 0xe52   : > { %v1807_v15 = vadd.f32 %v1964_v14, %v1899_v12 }
 0xe54   : > { %v1810_v16 = vadd.f32 %v1807_v15, %v2439_v23 }
 0xe56   : > { %1811 = vst.msk [vmem:[%s435_s15] sm:$0x1f] %vm439_vm0, %v1810_v16 }
 0xe57 PF: > { %s23_s25 = sadd.s32 1, %s2157_s25  }
 0xe58   : > { %p20_p4 = scmp.ge.s32.totalorder %s23_s25, 4  }
 0xe5a   :  { %22 = sbr.rel (!%p20_p4) target bundleno = 1 (0x1), region = 102 }

// kernel: image_captioning_forward.13
= control target key start
LH: loop header
LB: loop body
LE: loop exit
PB: predicated region body
PF: predicated region fallthrough
CT: control target
= control target key end

     0   :  { %8 = vsyncpa [#allocation3], 0  ;;  %s639_s0 = inlined_call_operand.vmem [shape: f32[2,8,64], index: 0, kind: input, shape index: {}]   ;;  %s640_s1 = inlined_call_operand.vmem [shape: f32[64,128], index: 1, kind: input, shape index: {}]   ;;  %s641_s2 = inlined_call_operand.vmem [shape: f32[1,128], index: 2, kind: input, shape index: {}]   ;;  %s642_s3 = inlined_call_operand.hbm [shape: f32[2,8,128], index: 3, kind: output, shape index: {}]  }
   0x1   :  { %10 = vsyncpa [#allocation3 + $0x1], 0  ;;  %s512_s12 = smov 0   ;;  %s514_s13 = smov 0  }
   0x2   :  { %s516_s14 = smov 0   ;;  %s518_s15 = smov 0  }
   0x3 LB: > { %s533_s16 = sadd.s32 4294967295, %s486_s15   ;;  %s330_s17 = sadd.s32 4294967294, %s486_s15   ;;  %s486_s15 = sphi %s518_s15, %s648_s15   ;;  %s482_s14 = sphi %s516_s14, %s647_s14   ;;  %s478_s13 = sphi %s514_s13, %s646_s13   ;;  %s474_s12 = sphi %s512_s12, %s645_s12  }
   0x4   : > { %s537_s18 = sadd.s32 1, %s486_s15   ;;  %s91_s19 = sadd.s32 1, %s482_s14 }
   0x5   : > { %s88_s20 = ssub.s32 %s486_s15, %s537_s18  ;;  %p101_p0 = scmp.ne.s32.totalorder %s482_s14, %s478_s13 }
   0x6   : > { %p89_p1 = scmp.eq.s32.totalorder %s88_s20, 0  ;;  %p102_p2 = scmp.eq.s32.totalorder %s533_s16, 1 }
   0x7   : > { %p107_p3 = scmp.ne.s32.totalorder %s478_s13, %s474_s12  ;;  %p108_p4 = scmp.eq.s32.totalorder %s330_s17, 1 }
   0x8   : > { %s548_s21 = scalar_select %p89_p1, %s482_s14, %s91_s19  }
   0x9   : > { %p550_p5 = por %p102_p2, %p101_p0  ;;  %p554_p6 = por %p108_p4, %p107_p3 }
   0xa   : > { %p333_p7 = scmp.ge.s32.totalorder %s486_s15, 1  ;;  %p139_p8 = scmp.lt.s32.totalorder %s486_s15, 3 }
   0xc   : > { %p140_p9 = pnand %p333_p7, %p139_p8 }
   0xd   : > { %v167_v0 = vld [vmem:[%s640_s1] sm:$0xff] (!%p140_p9)  ;;  %v168_v1 = vld [vmem:[%s640_s1 + $0x8] sm:$0xff] (!%p140_p9)  ;;  %v169_v2 = vld [vmem:[%s640_s1 + $0x10] sm:$0xff] (!%p140_p9)  ;;  %v488_v3 = vmov (!%p140_p9), 0.0|0.0   ;;  %vm489_vm0 = vmmov (!%p140_p9), 0   ;;  %v490_v6 = vmov (!%p140_p9), 0.0  }
   0xe   : > { %143 = sbr.rel (%p140_p9) target bundleno = 259 (0x103), region = 32  ;;  %370 = vmatprep.subr.bf16.mxu0 (!%p140_p9), %v488_v3  ;;  %v371_v4 = vpack.c.bf16 (!%p140_p9), %v168_v1, %v167_v0  ;;  %v170_v5 = vld [vmem:[%s640_s1 + $0x18] sm:$0xff] (!%p140_p9)  ;;  %367 = vmatprep.mubr.msk.f32.mxu0 (!%p140_p9), %vm489_vm0, %v490_v6  ;;  %p162_p10 = scmp.lt.s32.totalorder (!%p140_p9), %s533_s16, 1  ;;  %v171_v8 = vld [vmem:[%s640_s1 + $0x20] sm:$0xff] (!%p140_p9)  ;;  %v172_v9 = vld [vmem:[%s640_s1 + $0x28] sm:$0xff] (!%p140_p9)  ;;  %vm182_vm1 = vcmask (!%p140_p9), 523264  }
   0xf   : > { %v374_v7 = vpack.c.bf16 (!%p140_p9), %v170_v5, %v169_v2  ;;  %v377_v10 = vpack.c.bf16 (!%p140_p9), %v172_v9, %v171_v8  ;;  %v173_v11 = vld [vmem:[%s640_s1 + $0x30] sm:$0xff] (!%p140_p9)  ;;  %v174_v12 = vld [vmem:[%s640_s1 + $0x38] sm:$0xff] (!%p140_p9)  ;;  %s159_s27 = sand.u32 (!%p140_p9), 1, %s478_s13   ;;  %v336_v15 = vld [vmem:[%s641_s2] ss:$0 sm:$0xff] (!%p140_p9)  ;;  %s339_s4 = sshll.u32 (!%p140_p9), %s533_s16, 7 }
  0x10   : > { %372 = vmatpush3.bf16.msra.mxu0 (!%p140_p9), %v371_v4  ;;  %v380_v13 = vpack.c.bf16 (!%p140_p9), %v174_v12, %v173_v11  ;;  %s334_s28 = sshll.u32 (!%p140_p9), %s159_s27, 3  ;;  %s258_s10 = scalar_lea.sflag (!%p140_p9), [#allocation3], %s159_s27 }
  0x11   : > { %373 = vmatprep.subr.bf16.mxu0 (!%p140_p9), %v488_v3  ;;  %s161_s5 = scalar_lea.vmem (!%p140_p9), [#allocation2], %s334_s28 }
  0x12   : > { %s271_s6 = sshll.u32 (!%p140_p9), %s161_s5, 4  ;;  %s599_s6 = int_to_ptr.vmem [resolvable:$true] %s271_s6 }
  0x13   : > { %s424_s11 = scalar_lea.vmem (!%p140_p9), %s599_s6, 128 }
  0x14   : > { %375 = vmatpush3.bf16.msra.mxu0 (!%p140_p9), %v374_v7  ;;  %p425_p11 = scmp.ne.s32.totalorder (!%p140_p9), %s599_s6, %s424_s11 }
  0x15   : > { %s163_s9 = scalar_select %p162_p10, %s533_s16, 1  ;;  %376 = vmatprep.subr.bf16.mxu0 %v488_v3 }
  0x16   : > { %p426_p12 = pnand %p425_p11, %p550_p5  ;;  %s491_s16 = smov [#allocation2]  }
  0x17   : > { %s335_s20 = sshll.u32 %s163_s9, 3  ;;  %s597_s9 = scalar_lea.hbm %s642_s3, %s339_s4 }
  0x18   : > { %378 = vmatpush3.bf16.msra.mxu0 %v377_v10  ;;  %s165_s26 = scalar_lea.vmem %s639_s0, %s335_s20  ;;  %p427_p13 = pneg %p426_p12 }
  0x19   : > { %379 = vmatprep.subr.bf16.mxu0 %v488_v3  ;;  %v166_v14 = vld [vmem:[%s165_s26] sm:$0xff]  ;;  %s428_s17 = sshll.u32 %s491_s16, 4  ;;  %s429_s17 = int_to_ptr.vmem [resolvable:$false] %s428_s17 }
  0x1a   : > { %s430_s19 = scalar_lea.vmem %s429_s17, 256  ;;  %p431_p0 = scmp.lt.s32.totalorder %s599_s6, %s429_s17 }
  0x1b   : > { %p432_p1 = scmp.lt.s32.totalorder %s430_s19, %s424_s11 }
  0x1c   : > { %381 = vmatpush3.bf16.msra.mxu0 %v380_v13 }
  0x1d   : > { %p433_p2 = por %p432_p1, %p431_p0 }
  0x1f   : > { %368 = vmatmul.mubr.msk.f32.vlgmr.msra.gmra.mrb[0].mxu0 %vm182_vm1, %v166_v14  ;;  %p434_p3 = pnand %p433_p2, %p427_p13 }
  0xf2   : > { %v252_v16 = vpop.f32.mrb[0].mxu0 }
  0xf3   : > { %v253_v17 = vadd.f32 %v336_v15, %v252_v16  ;;  %v369_v18 = vpop.f32.mrb[1].mxu0 }
  0xf5   : > { %256 = vst [vmem:[%s161_s5] sm:$0xff] %v253_v17 }
  0xf6   : > { %437 = shalt.err (!%p434_p3)
}
  0xf7   : > { %s438_s20 = scalar_lea.hbm %s597_s9, 128  ;;  %s442_s26 = scalar_lea.hbm %s642_s3, 256 }
  0xf8   : > { %p439_p4 = scmp.ne.s32.totalorder %s597_s9, %s438_s20  ;;  %p443_p9 = scmp.lt.u32.totalorder %s597_s9, %s642_s3 }
  0xf9   : > { %p444_p10 = scmp.lt.u32.totalorder %s442_s26, %s438_s20  ;;  %p446_p12 = scmp.lt.u32.totalorder %s438_s20, %s597_s9 }
  0xfa   : > { %p440_p7 = pnand %p439_p4, %p550_p5 }
  0xfb   : > { %p445_p11 = por %p444_p10, %p443_p9 }
  0xfc   : > { %p441_p8 = pneg %p440_p7 }
  0xfd   : > { %p447_p13 = por %p446_p12, %p445_p11 }
  0xff   : > { %p448_p0 = pnand %p447_p13, %p441_p8 }
 0x101   : > { %451 = shalt.err (!%p448_p0)
}
 0x102   : > { %382 = dma.vmem_to_hbm [thread:$0]  (%p550_p5), %s599_s6, 128, %s597_s9, %s258_s10  }
 0x103 PF: > { %p388_p1 = scmp.ge.s32.totalorder %s486_s15, 2  ;;  %s283_s29 = sand.u32 1, %s474_s12  }
 0x104   : > { %s284_s30 = scalar_lea.sflag [#allocation3], %s283_s29 }
 0x105   : > { %p385_p2 = pnand %p388_p1, %p554_p6 }
 0x107   : > { %469 = dma.done.wait (!%p385_p2), %s284_s30, 128  }
 0x108   : > { %471 = vsyncadd (!%p385_p2), %s284_s30, 4294967168  ;;  %p13_p3 = scmp.ge.s32.totalorder %s537_s18, 4   ;;  %s645_s12 = smov %s478_s13 }
 0x109   : > { %s646_s13 = smov %s482_s14  ;;  %s647_s14 = smov %s548_s21 }
 0x10a   : > { %s648_s15 = smov %s537_s18  ;;  %15 = sbr.rel (!%p13_p3) target bundleno = 3 (0x3), region = 67 }
 0x111   :  { %289 = vsyncpa [#allocation3], 1 }
 0x112   :  { %291 = vsyncpa [#allocation3 + $0x1], 1 }

// kernel: image_captioning_forward.11
= control target key start
LH: loop header
LB: loop body
LE: loop exit
PB: predicated region body
PF: predicated region fallthrough
CT: control target
= control target key end

     0   :  { %s4480_s0 = inlined_call_operand.vmem [shape: f32[2,8,64], index: 0, kind: input, shape index: {}]   ;;  %s4481_s1 = inlined_call_operand.vmem [shape: f32[2,5,64], index: 1, kind: input, shape index: {}]   ;;  %s4482_s2 = inlined_call_operand.vmem [shape: f32[64,192], index: 2, kind: input, shape index: {}]   ;;  %s4483_s3 = inlined_call_operand.vmem [shape: f32[1,192], index: 3, kind: input, shape index: {}]   ;;  %s4484_s4 = inlined_call_operand.vmem [shape: f32[64,64], index: 4, kind: input, shape index: {}]   ;;  %s4485_s5 = inlined_call_operand.vmem [shape: f32[1,64], index: 5, kind: input, shape index: {}]   ;;  %s4486_s6 = inlined_call_operand.vmem [shape: f32[64,64], index: 6, kind: input, shape index: {}]   ;;  %s4487_s7 = inlined_call_operand.vmem [shape: f32[1,64], index: 7, kind: input, shape index: {}]   ;;  %s4488_s8 = inlined_call_operand.vmem [shape: f32[64,128], index: 8, kind: input, shape index: {}]   ;;  %s4489_s9 = inlined_call_operand.vmem [shape: f32[1,128], index: 9, kind: input, shape index: {}]   ;;  %s4490_s10 = inlined_call_operand.vmem [shape: f32[64,64], index: 10, kind: input, shape index: {}]   ;;  %s4491_s11 = inlined_call_operand.vmem [shape: f32[1,64], index: 11, kind: input, shape index: {}]   ;;  %s4492_s12 = inlined_call_operand.vmem [shape: f32[1,64], index: 12, kind: input, shape index: {}]   ;;  %s4493_s13 = inlined_call_operand.vmem [shape: f32[1,64], index: 13, kind: input, shape index: {}]   ;;  %s4494_s14 = inlined_call_operand.vmem [shape: f32[1,64], index: 14, kind: input, shape index: {}]   ;;  %s4495_s15 = inlined_call_operand.vmem [shape: f32[1,64], index: 15, kind: input, shape index: {}]   ;;  %s4496_s16 = inlined_call_operand.vmem [shape: f32[1,64], index: 16, kind: input, shape index: {}]   ;;  %s4497_s17 = inlined_call_operand.vmem [shape: f32[1,64], index: 17, kind: input, shape index: {}]   ;;  %s4498_s18 = inlined_call_operand.vmem [shape: f32[64,128], index: 18, kind: input, shape index: {}]   ;;  %s4499_s19 = inlined_call_operand.vmem [shape: f32[1,128], index: 19, kind: input, shape index: {}]   ;;  %s4500_s20 = inlined_call_operand.vmem [shape: f32[128,64], index: 20, kind: input, shape index: {}]   ;;  %s4501_s21 = inlined_call_operand.vmem [shape: f32[1,64], index: 21, kind: input, shape index: {}]   ;;  %s4502_s22 = inlined_call_operand.vmem [shape: f32[2,8,64], index: 22, kind: output, shape index: {}]  }
   0x1   :  { %4517 = sst [smem:[#allocation2_spill]] %s4480_s0 }
   0x2   :  { %4518 = sst [smem:[#allocation3_spill]] %s4481_s1 }
   0x3   :  { %4519 = sst [smem:[#allocation4_spill]] %s4482_s2 }
   0x4   :  { %4520 = sst [smem:[#allocation5_spill]] %s4483_s3  ;;  %s3958_s3 = smov 0  }
   0x5   :  { %4521 = sst [smem:[#allocation6_spill]] %s4484_s4 }
   0x6   :  { %4522 = sst [smem:[#allocation7_spill]] %s4485_s5 }
   0x7   :  { %4523 = sst [smem:[#allocation8_spill]] %s4486_s6 }
   0x8 LB: > { %s3277_s28 = sadd.s32 4294967295, %s3830_s3   ;;  %p3281_p0 = scmp.ge.s32.totalorder %s3830_s3, 1  ;;  %s3830_s3 = sphi %s3958_s3, %s32_s3  }
   0x9   : > { %p620_p1 = scmp.lt.s32.totalorder %s3830_s3, 3 }
   0xb   : > { %p621_p2 = pnand %p3281_p0, %p620_p1 }
   0xc   : > { %s4524_s4 = sld [smem:[#allocation4_spill]] (!%p621_p2)  ;;  %v3832_v7 = vmov (!%p621_p2), 0.0   ;;  %p684_p3 = scmp.lt.s32.totalorder (!%p621_p2), %s3277_s28, 1  ;;  %vm726_vm0 = vcmask (!%p621_p2), 523264   ;;  %v716_v26 = vlaneseq (!%p621_p2)  ;;  %vm3833_vm1 = vmmov (!%p621_p2), 0  }
   0xd   : > { %624 = sbr.rel (%p621_p2) target bundleno = 6545 (0x1991), region = 108  ;;  %794 = vmatprep.mubr.f32.mxu0 (!%p621_p2), %v3832_v7  ;;  %3449 = vmatprep.subr.mxu1 (!%p621_p2), %v3832_v7  ;;  %s4525_s27 = sld [smem:[#allocation2_spill]] (!%p621_p2)  ;;  %vm819_vm2 = vcmask (!%p621_p2), 130048   ;;  %v3837_v44 = vmov (!%p621_p2), -1e+09   ;;  %vm896_vm4 = vcmask (!%p621_p2), 64512  }
   0xe   : > { %v717_v27 = vshrl.u32 (!%p621_p2), %v716_v26, 7  ;;  %3451 = vmatprep.mubr.msk.f32.mxu1 (!%p621_p2), %vm3833_vm1, %v3832_v7  ;;  %s4526_s0 = sld [smem:[#allocation5_spill]] (!%p621_p2)  ;;  %s4513_s23 = smov (!%p621_p2), 64   ;;  %v813_v40 = vand.u32 (!%p621_p2), 127, %v716_v26  ;;  %v3840_v63 = vmov (!%p621_p2), 0.0|0.0   ;;  %vm2077_vm5 = vcmask (!%p621_p2), 39936  }
   0xf   : > { %s4510_s1 = smov (!%p621_p2), 48   ;;  %s4514_s5 = smov (!%p621_p2), 112   ;;  %vm2094_vm6 = vcmask (!%p621_p2), 1044480  }
  0x10   : > { %v718_v28 = vsub.s32 (!%p621_p2), 0, %v717_v27  ;;  %v722_v34 = vsub.s32 (!%p621_p2), 1, %v717_v27  ;;  %vm814_vm3 = vcmp.ge.s32.totalorder (!%p621_p2), %v717_v27, %v813_v40  ;;  %s4509_s24 = smov (!%p621_p2), 32   ;;  %s4511_s6 = smov (!%p621_p2), 96  }
  0x11   : > { %v4060_v45 = vsel (!%p621_p2), %vm814_vm3, 0.0, %v3837_v44  ;;  %s4528_s26 = sld [smem:[#allocation7_spill]] (!%p621_p2)  ;;  %s4531_s30 = smov (!%p621_p2), 112  }
  0x12   : > { %v699_v0 = vld [vmem:[%s4524_s4 + $0x8] sm:$0xff] (!%p621_p2)  ;;  %v701_v1 = vld [vmem:[%s4524_s4 + $0x18] sm:$0xff] (!%p621_p2)  ;;  %v698_v2 = vld [vmem:[%s4524_s4] sm:$0xff] (!%p621_p2) }
  0x13   : > { %v3667_v3 = vpack.c.bf16 (!%p621_p2), %v701_v1, %v699_v0  ;;  %v700_v4 = vld [vmem:[%s4524_s4 + $0x10] sm:$0xff] (!%p621_p2)  ;;  %v703_v5 = vld [vmem:[%s4524_s4 + $0x28] sm:$0xff] (!%p621_p2)  ;;  %v705_v6 = vld [vmem:[%s4524_s4 + $0x38] sm:$0xff] (!%p621_p2) }
  0x14   : > { %v3669_v8 = vpack.c.bf16 %v700_v4, %v698_v2  ;;  %v3671_v9 = vpack.c.bf16 %v705_v6, %v703_v5  ;;  %v702_v10 = vld [vmem:[%s4524_s4 + $0x20] sm:$0xff]  ;;  %v704_v11 = vld [vmem:[%s4524_s4 + $0x30] sm:$0xff]  ;;  %v707_v12 = vld [vmem:[%s4524_s4 + $0x48] sm:$0xff]  ;;  %s4539_s28 = smov (!%p684_p3, %s3277_s28), 1 }
  0x15   : > { %3668 = vmatprep.subr.bf16.mxu0 %v3667_v3  ;;  %v709_v13 = vld [vmem:[%s4524_s4 + $0x58] sm:$0xff]  ;;  %v3673_v14 = vpack.c.bf16 %v704_v11, %v702_v10  ;;  %v706_v16 = vld [vmem:[%s4524_s4 + $0x40] sm:$0xff]  ;;  %v708_v17 = vld [vmem:[%s4524_s4 + $0x50] sm:$0xff]  ;;  %s4020_s25 = sshll.u32 %s4539_s28, 3  ;;  %s4506_s28 = smov 16  }
  0x16   : > { %3670 = vmatpush1.bf16.msra.mxu0 %v3669_v8  ;;  %v3675_v15 = vpack.c.bf16 %v709_v13, %v707_v12  ;;  %v711_v18 = vld [vmem:[%s4524_s4 + $0x68] sm:$0xff]  ;;  %v713_v19 = vld [vmem:[%s4524_s4 + $0x78] sm:$0xff]  ;;  %v3677_v20 = vpack.c.bf16 %v708_v17, %v706_v16  ;;  %v710_v22 = vld [vmem:[%s4524_s4 + $0x60] sm:$0xff]  ;;  %s687_s29 = scalar_lea.vmem %s4525_s27, %s4020_s25  ;;  %s4527_s27 = sld [smem:[#allocation6_spill]] }
  0x17   : > { %3672 = vmatprep.subr.bf16.mxu0 %v3671_v9  ;;  %v3679_v21 = vpack.c.bf16 %v713_v19, %v711_v18  ;;  %v712_v23 = vld [vmem:[%s4524_s4 + $0x70] sm:$0xff]  ;;  %v4026_v25 = vld [vmem:[%s687_s29] sm:$0xff]  ;;  %s4507_s29 = smov 80   ;;  %s4534_s4 = smov 48  }
  0x18   : > { %v3681_v24 = vpack.c.bf16 %v712_v23, %v710_v22  ;;  %v714_v29 = vld [vmem:[%s4526_s0] sm:$0x3] }
  0x19   : > { %v719_v30 = vrot.slane %v714_v29, %v718_v28  ;;  %v723_v35 = vrot.slane %v714_v29, %v722_v34 }
  0x1a   : > { %3674 = vmatpush1.bf16.msra.mxu0 %v3673_v14 }
  0x1b   : > { %3676 = vmatprep.subr.bf16.mxu0 %v3675_v15 }
  0x1c   : > { %v803_v5 = vld [vmem:[%s4527_s27 + $0x10] sm:$0xff]  ;;  %v804_v6 = vld [vmem:[%s4527_s27 + $0x18] sm:$0xff]  ;;  %v801_v11 = vld [vmem:[%s4527_s27] sm:$0xff] }
  0x1d   : > { %v3684_v9 = vpack.c.bf16 %v804_v6, %v803_v5  ;;  %v802_v12 = vld [vmem:[%s4527_s27 + $0x8] sm:$0xff]  ;;  %v3302_v6 = vld [vmem:[%s4528_s26] ss:$0 sm:$0xff]  ;;  %s4537_s26 = smov 16  }
  0x1e   : > { %3678 = vmatpush1.bf16.msra.mxu0 %v3677_v20  ;;  %v3687_v13 = vpack.c.bf16 %v802_v12, %v801_v11  ;;  %v806_v40 = vld [vmem:[%s4527_s27 + $0x28] sm:$0xff] }
  0x1f   : > { %3680 = vmatprep.subr.bf16.mxu0 %v3679_v21 }
  0x22   : > { %3682 = vmatpush1.bf16.msra.mxu0 %v3681_v24 }
  0x23   : > { %3439 = vmatprep.subr.mxu0 %v3832_v7 }
  0x25   : > { %3285 = vmatmul.mubr.msk.f32.vlgmr.msra.gmra.mrb[0].mxu0 %vm726_vm0, %v4026_v25 }
  0x26   : > { %3441 = vmatprep.mubr.msk.f32.mxu0 %vm3833_vm1, %v3832_v7 }
  0xf8   : > { %v796_v31 = vpop.f32.mrb[0].mxu0 }
  0xf9   : > { %v4038_v32 = vadd.f32 %v796_v31, %v719_v30  ;;  %v798_v33 = vpop.f32.mrb[1].mxu0 }
  0xfa   : > { %v4050_v38 = vadd.f32 %v798_v33, %v723_v35 }
  0xfb   : > { %817 = vrot.lane.b32.xlu1 %v4038_v32, %s4513_s23  ;;  %983 = vrot.lane.b32.xlu0 %v4038_v32, %s4510_s1  ;;  %s4532_s1 = smov 64  }
  0xff   : > { %981 = vrot.lane.b32.xlu0 %v4038_v32, %s4514_s5 }
 0x16d   : > { %v818_v36 = vpop.permute.xlu1 %817  ;;  %v984_v37 = vpop.permute.xlu0 %983 }
 0x16e   : > { %3440 = vmatpush3.xpose.msk.msra.mxu0 %vm819_vm2, %v818_v36  ;;  %3450 = vmatpush3.xpose.msk.msra.mxu1 %vm819_vm2, %v984_v37 }
 0x16f   : > { %3444 = vmatprep.subr.mxu0 %v3832_v7  ;;  %3454 = vmatprep.subr.mxu1 %v3832_v7 }
 0x171   : > { %3442 = vmatmul.mubr.msk.f32.vlgmr.msra.gmra.mrb[2].mxu0 %vm819_vm2, %v4038_v32  ;;  %v982_v39 = vpop.permute.xlu0 %981 }
 0x172   : > { %3445 = vmatpush3.msra.mxu0 %v4050_v38  ;;  %3452 = vmatmul.mubr.msk.f32.vlgmr.msra.gmra.mrb[0].mxu1 %vm819_vm2, %v982_v39  ;;  %v805_v39 = vld [vmem:[%s4527_s27 + $0x20] sm:$0xff] }
 0x173   : > { %3456 = vmatprep.mubr.msk.f32.mxu1 %vm3833_vm1, %v3832_v7  ;;  %3446 = vmatprep.mubr.msk.f32.mxu0 %vm3833_vm1, %v3832_v7 }
 0x174   : > { %3683 = vmatprep.subr.bf16.mxu0 %v3840_v63 }
 0x244   : > { %v890_v41 = vpop.f32.mrb[2].mxu0 }
 0x245   : > { %v3443_v42 = vpop.f32.mrb[3].mxu0  ;;  %v1055_v43 = vpop.f32.mrb[0].mxu1  ;;  %v894_v46 = vmul.f32 0.25, %v890_v41  ;;  %v3690_v41 = vpack.c.bf16 %v806_v40, %v805_v39 }
 0x246   : > { %v1059_v47 = vmul.f32 0.25, %v1055_v43  ;;  %v3453_v48 = vpop.f32.mrb[1].mxu1 }
 0x247   : > { %v895_v51 = vadd.f32 %v894_v46, %v4060_v45 }
 0x248   : > { %v1060_v49 = vadd.f32 %v1059_v47, %v4060_v45 }
 0x249   : > { %v897_v52 = vsel %vm896_vm4, %v895_v51, -inf }
 0x24a   : > { %v1061_v50 = vsel %vm896_vm4, %v1060_v49, -inf }
 0x24b   : > { %1062 = vmax.xlane.f32.xlu1 %v1061_v50 }
 0x24f   : > { %898 = vmax.xlane.f32.xlu1 %v897_v52 }
 0x2d8   : > { %v1063_v53 = vpop.xlane.xlu1 %1062 }
 0x2d9   : > { %v1064_v54 = vsub.f32 %v1060_v49, %v1063_v53 }
 0x2db   : > { %v1065_v55 = vmul.f32 1.442695, %v1064_v54 }
 0x2dc   : > { %v899_v56 = vpop.xlane.xlu1 %898 }
 0x2dd   : > { %3786 = vpow2.f32 %v1065_v55  ;;  %v900_v57 = vsub.f32 %v895_v51, %v899_v56 }
 0x2df   : > { %v901_v58 = vmul.f32 1.442695, %v900_v57 }
 0x2e1   : > { %3788 = vpow2.f32 %v901_v58 }
 0x2e7   : > { %v3787_v59 = vpop.eup %3786 }
 0x2e8   : > { %v1067_v60 = vsel %vm896_vm4, %v3787_v59, 0.0 }
 0x2e9   : > { %1068 = vadd.xlane.f32.xlu0 %v1067_v60 }
 0x2eb   : > { %v3789_v61 = vpop.eup %3788 }
 0x2ec   : > { %v903_v62 = vsel %vm896_vm4, %v3789_v61, 0.0 }
 0x2ed   : > { %904 = vadd.xlane.f32.xlu1 %v903_v62 }
 0x2fe   : > { %1297 = vrot.lane.b32.xlu1 %v4038_v32, %s4509_s24  ;;  %s4533_s24 = smov 96  }
 0x2ff   : > { %1073 = vrot.lane.b32.xlu0 %v4050_v38, %s4514_s5 }
 0x303   : > { %1295 = vrot.lane.b32.xlu0 %v4038_v32, %s4511_s6 }
 0x376   : > { %v1069_v0 = vpop.xlane.xlu0 %1068 }
 0x377   : > { %3790 = vrcp.f32 %v1069_v0 }
 0x37a   : > { %v1074_v1 = vpop.permute.xlu0 %1073  ;;  %v905_v2 = vpop.xlane.xlu1 %904 }
 0x37b   : > { %3792 = vrcp.f32 %v905_v2  ;;  %3455 = vmatpush3.msra.mxu1 %v1074_v1 }
 0x37c   : > { %3686 = vmatprep.subr.bf16.mxu1 %v3840_v63 }
 0x37e   : > { %v1298_v15 = vpop.permute.xlu1 %1297  ;;  %v1296_v17 = vpop.permute.xlu0 %1295 }
 0x381   : > { %v3791_v3 = vpop.eup %3790 }
 0x382   : > { %v1071_v4 = vmul.f32 %v3791_v3, %v3787_v59  ;;  %v807_v59 = vld [vmem:[%s4527_s27 + $0x30] sm:$0xff] }
 0x384   : > { %3457 = vmatmul.mubr.msk.f32.vlgmr.msra.gmra.mrb[2].mxu1 %vm896_vm4, %v1071_v4 }
 0x385   : > { %v3793_v8 = vpop.eup %3792  ;;  %3470 = vmatprep.mubr.msk.f32.mxu1 %vm3833_vm1, %v3832_v7  ;;  %3688 = vmatpush3.bf16.msra.mxu1 %v3687_v13 }
 0x386   : > { %v907_v10 = vmul.f32 %v3793_v8, %v3789_v61  ;;  %3478 = vmatprep.subr.mxu1 %v3832_v7 }
 0x388   : > { %3447 = vmatmul.mubr.msk.f32.vlgmr.msra.gmra.mrb[4].mxu0 %vm896_vm4, %v907_v10 }
 0x389   : > { %3685 = vmatpush3.bf16.msra.mxu0 %v3684_v9  ;;  %3463 = vmatprep.mubr.msk.f32.mxu0 %vm3833_vm1, %v3832_v7 }
 0x38a   : > { %3473 = vmatprep.subr.mxu0 %v3832_v7 }
 0x457   : > { %v1145_v14 = vpop.f32.mrb[2].mxu1 }
 0x458   : > { %v3458_v16 = vpop.f32.mrb[3].mxu1  ;;  %3464 = vmatmul.mubr.msk.f32.vlgmr.msra.gmra.mrb[6].mxu0 %vm819_vm2, %v1145_v14 }
 0x459   : > { %3474 = vmatpush3.xpose.msk.msra.mxu0 %vm819_vm2, %v1298_v15  ;;  %3475 = vmatprep.mubr.msk.f32.mxu0 %vm3833_vm1, %v3832_v7 }
 0x45a   : > { %3689 = vmatprep.subr.bf16.mxu0 %v3840_v63 }
 0x45b   : > { %v977_v18 = vpop.f32.mrb[4].mxu0 }
 0x45c   : > { %v3448_v19 = vpop.f32.mrb[5].mxu0  ;;  %3471 = vmatmul.mubr.msk.f32.vlgmr.msra.gmra.mrb[4].mxu1 %vm819_vm2, %v977_v18  ;;  %3476 = vmatmul.mubr.msk.f32.vlgmr.msra.gmra.mrb[8].mxu0 %vm819_vm2, %v1296_v17 }
 0x45d   : > { %3480 = vmatprep.mubr.msk.f32.mxu1 %vm3833_vm1, %v3832_v7  ;;  %3487 = vmatprep.mubr.msk.f32.mxu0 %vm3833_vm1, %v3832_v7  ;;  %v1903_v19 = vld [vmem:[%s4488_s8] sm:$0xff] }
 0x45e   : > { %3691 = vmatpush3.bf16.msra.mxu0 %v3690_v41 }
 0x45f   : > { %3495 = vmatprep.subr.mxu0 %v3832_v7 }
 0x52b   : > { %v1218_v20 = vpop.f32.mrb[6].mxu0 }
 0x52c   : > { %v3465_v21 = vpop.f32.mrb[7].mxu0 }
 0x52f   : > { %v1291_v22 = vpop.f32.mrb[4].mxu1  ;;  %v1369_v23 = vpop.f32.mrb[8].mxu0 }
 0x530   : > { %v4107_v24 = vadd.f32 %v1291_v22, %v1218_v20  ;;  %v1373_v26 = vmul.f32 0.25, %v1369_v23  ;;  %v3472_v27 = vpop.f32.mrb[5].mxu1  ;;  %v3477_v28 = vpop.f32.mrb[9].mxu0  ;;  %v1904_v20 = vld [vmem:[%s4488_s8 + $0x8] sm:$0xff]  ;;  %v1906_v22 = vld [vmem:[%s4488_s8 + $0x18] sm:$0xff] }
 0x531   : > { %v3708_v21 = vpack.c.bf16 %v1904_v20, %v1903_v19  ;;  %v1907_v28 = vld [vmem:[%s4488_s8 + $0x20] sm:$0xff] }
 0x532   : > { %v1374_v29 = vadd.f32 %v1373_v26, %v4060_v45 }
 0x534   : > { %v1375_v30 = vsel %vm896_vm4, %v1374_v29, -inf }
 0x535   : > { %1376 = vmax.xlane.f32.xlu0 %v1375_v30 }
 0x54b   : > { %1386 = vrot.lane.b32.xlu0 %v4050_v38, %s4511_s6 }
 0x54f   : > { %1536 = vrot.lane.b32.xlu0 %v4038_v32, %s4507_s29 }
 0x5c2   : > { %v1377_v31 = vpop.xlane.xlu0 %1376 }
 0x5c3   : > { %v1378_v33 = vsub.f32 %v1374_v29, %v1377_v31  ;;  %v1908_v29 = vld [vmem:[%s4488_s8 + $0x28] sm:$0xff] }
 0x5c4   : > { %v3714_v31 = vpack.c.bf16 %v1908_v29, %v1907_v28  ;;  %v1991_v28 = vld [vmem:[%s4490_s10] sm:$0xff]  ;;  %v1992_v29 = vld [vmem:[%s4490_s10 + $0x8] sm:$0xff] }
 0x5c5   : > { %v1379_v34 = vmul.f32 1.442695, %v1378_v33 }
 0x5c6   : > { %v1387_v35 = vpop.permute.xlu0 %1386 }
 0x5c7   : > { %3794 = vpow2.f32 %v1379_v34  ;;  %3479 = vmatpush3.msra.mxu1 %v1387_v35  ;;  %v1909_v35 = vld [vmem:[%s4488_s8 + $0x30] sm:$0xff] }
 0x5c8   : > { %3490 = vmatprep.subr.mxu1 %v3832_v7 }
 0x5d1   : > { %v3795_v36 = vpop.eup %3794 }
 0x5d2   : > { %v1381_v37 = vsel %vm896_vm4, %v3795_v36, 0.0 }
 0x5d3   : > { %1382 = vadd.xlane.f32.xlu1 %v1381_v37 }
 0x5e4   : > { %1538 = vrot.lane.b32.xlu1 %v4038_v32, %s4506_s28  ;;  %v1537_v32 = vpop.permute.xlu0 %1536  ;;  %s4529_s28 = sld [smem:[#allocation8_spill]] }
 0x5ea   : > { %v1815_v23 = vld [vmem:[%s4529_s28] sm:$0xff]  ;;  %v1816_v26 = vld [vmem:[%s4529_s28 + $0x8] sm:$0xff]  ;;  %v1817_v30 = vld [vmem:[%s4529_s28 + $0x10] sm:$0xff] }
 0x5eb   : > { %v3696_v27 = vpack.c.bf16 %v1816_v26, %v1815_v23  ;;  %v1818_v33 = vld [vmem:[%s4529_s28 + $0x18] sm:$0xff]  ;;  %v1819_v37 = vld [vmem:[%s4529_s28 + $0x20] sm:$0xff]  ;;  %v1820_v40 = vld [vmem:[%s4529_s28 + $0x28] sm:$0xff] }
 0x5ec   : > { %v3699_v34 = vpack.c.bf16 %v1818_v33, %v1817_v30  ;;  %v3702_v41 = vpack.c.bf16 %v1820_v40, %v1819_v37  ;;  %v1994_v23 = vld [vmem:[%s4490_s10 + $0x18] sm:$0xff] }
 0x660   : > { %v1383_v42 = vpop.xlane.xlu1 %1382 }
 0x661   : > { %3796 = vrcp.f32 %v1383_v42  ;;  %v1821_v42 = vld [vmem:[%s4529_s28 + $0x30] sm:$0xff] }
 0x664   : > { %v1539_v46 = vpop.permute.xlu1 %1538 }
 0x66b   : > { %v3797_v43 = vpop.eup %3796 }
 0x66c   : > { %v1385_v44 = vmul.f32 %v3797_v43, %v3795_v36  ;;  %v1910_v36 = vld [vmem:[%s4488_s8 + $0x38] sm:$0xff] }
 0x66d   : > { %v3717_v39 = vpack.c.bf16 %v1910_v36, %v1909_v35  ;;  %v1822_v43 = vld [vmem:[%s4529_s28 + $0x38] sm:$0xff] }
 0x66e   : > { %3481 = vmatmul.mubr.msk.f32.vlgmr.msra.gmra.mrb[6].mxu1 %vm896_vm4, %v1385_v44 }
 0x66f   : > { %3491 = vmatpush3.xpose.msk.msra.mxu1 %vm819_vm2, %v1539_v46  ;;  %3492 = vmatprep.mubr.msk.f32.mxu1 %vm3833_vm1, %v3832_v7  ;;  %v3705_v46 = vpack.c.bf16 %v1822_v43, %v1821_v42 }
 0x670   : > { %3692 = vmatprep.subr.bf16.mxu1 %v3840_v63 }
 0x672   : > { %3493 = vmatmul.mubr.msk.f32.vlgmr.msra.gmra.mrb[8].mxu1 %vm819_vm2, %v1537_v32 }
 0x673   : > { %3504 = vmatprep.mubr.msk.f32.mxu1 %vm3833_vm1, %v3832_v7 }
 0x741   : > { %v1458_v47 = vpop.f32.mrb[6].mxu1 }
 0x742   : > { %v3482_v48 = vpop.f32.mrb[7].mxu1  ;;  %3488 = vmatmul.mubr.msk.f32.vlgmr.msra.gmra.mrb[10].mxu0 %vm819_vm2, %v1458_v47 }
 0x743   : > { %3497 = vmatprep.mubr.msk.f32.mxu0 %vm3833_vm1, %v3832_v7 }
 0x745   : > { %v1610_v49 = vpop.f32.mrb[8].mxu1 }
 0x746   : > { %v1614_v50 = vmul.f32 0.25, %v1610_v49  ;;  %v3494_v51 = vpop.f32.mrb[9].mxu1 }
 0x748   : > { %v1615_v52 = vadd.f32 %v1614_v50, %v4060_v45  ;;  %v808_v45 = vld [vmem:[%s4527_s27 + $0x38] sm:$0xff]  ;;  %v3303_v50 = vld [vmem:[%s4492_s12] ss:$0 sm:$0xff] }
 0x749   : > { %v3693_v60 = vpack.c.bf16 %v808_v45, %v807_v59  ;;  %v3305_v59 = vld [vmem:[%s4487_s7] ss:$0 sm:$0xff] }
 0x74a   : > { %v1616_v53 = vsel %vm896_vm4, %v1615_v52, -inf }
 0x74b   : > { %1617 = vmax.xlane.f32.xlu1 %v1616_v53  ;;  %3694 = vmatpush3.bf16.msra.mxu1 %v3693_v60 }
 0x74c   : > { %3707 = vmatprep.subr.bf16.mxu1 %v3840_v63 }
 0x7d8   : > { %v1618_v54 = vpop.xlane.xlu1 %1617 }
 0x7d9   : > { %v1619_v55 = vsub.f32 %v1615_v52, %v1618_v54  ;;  %v3304_v52 = vld [vmem:[%s4493_s13] ss:$0 sm:$0xff] }
 0x7db   : > { %v1620_v56 = vmul.f32 1.442695, %v1619_v55  ;;  %v3307_v55 = vld [vmem:[%s4489_s9] ss:$0 sm:$0xff] }
 0x7dd   : > { %3798 = vpow2.f32 %v1620_v56 }
 0x7e7   : > { %v3799_v57 = vpop.eup %3798 }
 0x7e8   : > { %v1622_v58 = vsel %vm896_vm4, %v3799_v57, 0.0 }
 0x7e9   : > { %1623 = vadd.xlane.f32.xlu0 %v1622_v58 }
 0x7ff   : > { %1627 = vrot.lane.b32.xlu0 %v4050_v38, %s4507_s29  ;;  %s4530_s29 = sld [smem:[#allocation3_spill]] }
 0x805   : > { %s691_s5 = scalar_lea.vmem %s4530_s29, %s4020_s25  ;;  %s695_s29 = scalar_lea.vmem %s4502_s22, %s4020_s25 }
 0x806   : > { %v697_v44 = vld [vmem:[%s691_s5] sm:$0x1f] }
 0x815   : > { %v1531_v61 = vpop.f32.mrb[10].mxu0 }
 0x816   : > { %v1535_v62 = vadd.f32 %v1531_v61, %v4107_v24  ;;  %v3489_v0 = vpop.f32.mrb[11].mxu0 }
 0x876   : > { %v1624_v1 = vpop.xlane.xlu0 %1623 }
 0x877   : > { %3800 = vrcp.f32 %v1624_v1 }
 0x87a   : > { %v1628_v2 = vpop.permute.xlu0 %1627 }
 0x87b   : > { %3496 = vmatpush3.msra.mxu0 %v1628_v2 }
 0x87c   : > { %3695 = vmatprep.subr.bf16.mxu0 %v3840_v63 }
 0x881   : > { %v3801_v38 = vpop.eup %3800 }
 0x882   : > { %v1626_v3 = vmul.f32 %v3801_v38, %v3799_v57 }
 0x884   : > { %3498 = vmatmul.mubr.msk.f32.vlgmr.msra.gmra.mrb[12].mxu0 %vm896_vm4, %v1626_v3 }
 0x885   : > { %3523 = vmatprep.mubr.msk.f32.mxu0 %vm3833_vm1, %v3832_v7  ;;  %3697 = vmatpush3.bf16.msra.mxu0 %v3696_v27 }
 0x886   : > { %3698 = vmatprep.subr.bf16.mxu0 %v3840_v63 }
 0x889   : > { %3700 = vmatpush3.bf16.msra.mxu0 %v3699_v34 }
 0x88a   : > { %3701 = vmatprep.subr.bf16.mxu0 %v3840_v63 }
 0x88d   : > { %3703 = vmatpush3.bf16.msra.mxu0 %v3702_v41 }
 0x88e   : > { %3704 = vmatprep.subr.bf16.mxu0 %v3840_v63 }
 0x891   : > { %3706 = vmatpush3.bf16.msra.mxu0 %v3705_v46 }
 0x892   : > { %3545 = vmatprep.subr.mxu0 %v3832_v7 }
 0x957   : > { %v1699_v4 = vpop.f32.mrb[12].mxu0 }
 0x958   : > { %v3499_v5 = vpop.f32.mrb[13].mxu0  ;;  %3505 = vmatmul.mubr.msk.f32.vlgmr.msra.gmra.mrb[10].mxu1 %vm819_vm2, %v1699_v4 }
 0x959   : > { %3542 = vmatprep.mubr.msk.f32.mxu1 %vm3833_vm1, %v3832_v7  ;;  %3709 = vmatpush3.bf16.msra.mxu1 %v3708_v21 }
 0x95a   : > { %3710 = vmatprep.subr.bf16.mxu1 %v3840_v63 }
 0xa2b   : > { %v1772_v8 = vpop.f32.mrb[10].mxu1 }
 0xa2c   : > { %v1776_v9 = vadd.f32 %v1772_v8, %v1535_v62  ;;  %v3506_v10 = vpop.f32.mrb[11].mxu1 }
 0xa2e   : > { %v1783_v11 = vadd.f32 %v3302_v6, %v1776_v9 }
 0xa30   : > { %v1784_v12 = vadd.f32 %v1783_v11, %v4026_v25  ;;  %v1905_v25 = vld [vmem:[%s4488_s8 + $0x10] sm:$0xff] }
 0xa31   : > { %v3711_v24 = vpack.c.bf16 %v1906_v22, %v1905_v25  ;;  %v1993_v22 = vld [vmem:[%s4490_s10 + $0x10] sm:$0xff] }
 0xa32   : > { %v1787_v13 = vsel %vm726_vm0, %v1784_v12, 0.0 }
 0xa33   : > { %1788 = vadd.xlane.f32.xlu1 %v1787_v13  ;;  %3712 = vmatpush3.bf16.msra.mxu1 %v3711_v24  ;;  %v3720_v24 = vpack.c.bf16 %v1994_v23, %v1993_v22  ;;  %v3329_v23 = vld [vmem:[%s4491_s11] ss:$0 sm:$0xff] }
 0xa34   : > { %3713 = vmatprep.subr.bf16.mxu1 %v3840_v63 }
 0xa37   : > { %3715 = vmatpush3.bf16.msra.mxu1 %v3714_v31  ;;  %v3723_v31 = vpack.c.bf16 %v1992_v29, %v1991_v28 }
 0xa38   : > { %3716 = vmatprep.subr.bf16.mxu1 %v3840_v63 }
 0xa3b   : > { %3718 = vmatpush3.bf16.msra.mxu1 %v3717_v39 }
 0xa3c   : > { %3550 = vmatprep.subr.mxu1 %v3832_v7 }
 0xa3e   : > { %3543 = vmatmul.mubr.msk.f32.vlgmr.msra.gmra.mrb[12].mxu1 %vm726_vm0, %v697_v44 }
 0xa3f   : > { %3552 = vmatprep.mubr.msk.f32.mxu1 %vm3833_vm1, %v3832_v7 }
 0xac0   : > { %v1789_v14 = vpop.xlane.xlu1 %1788 }
 0xac1   : > { %v1791_v15 = vmul.f32 0.015625, %v1789_v14 }
 0xac3   : > { %v1792_v16 = vsub.f32 %v1784_v12, %v1791_v15 }
 0xac5   : > { %v1793_v17 = vmul.f32 %v1792_v16, %v1792_v16 }
 0xac7   : > { %v1794_v18 = vsel %vm726_vm0, %v1793_v17, 0.0 }
 0xac8   : > { %1795 = vadd.xlane.f32.xlu1 %v1794_v18 }
 0xb11   : > { %v1987_v56 = vpop.f32.mrb[12].mxu1 }
 0xb12   : > { %v4241_v57 = vadd.f32 %v3307_v55, %v1987_v56  ;;  %v3544_v58 = vpop.f32.mrb[13].mxu1 }
 0xb13   : > { %v1995_v58 = vld [vmem:[%s4490_s10 + $0x20] sm:$0xff] }
 0xb14   : > { %2169 = vrot.lane.b32.xlu1 %v4241_v57, %s4531_s30 }
 0xb55   : > { %v1796_v32 = vpop.xlane.xlu1 %1795 }
 0xb56   : > { %v1797_v47 = vmul.f32 0.015625, %v1796_v32 }
 0xb58   : > { %v1798_v48 = vadd.f32 1e-05, %v1797_v47 }
 0xb5a   : > { %3802 = vrsqrt.f32 %v1798_v48 }
 0xb64   : > { %v3803_v49 = vpop.eup %3802 }
 0xb65   : > { %v1800_v51 = vmul.f32 %v3803_v49, %v1792_v16 }
 0xb67   : > { %v1807_v53 = vmul.f32 %v3303_v50, %v1800_v51 }
 0xb69   : > { %v4232_v54 = vadd.f32 %v3304_v52, %v1807_v53 }
 0xb6b   : > { %3524 = vmatmul.mubr.msk.f32.vlgmr.msra.gmra.mrb[14].mxu0 %vm726_vm0, %v4232_v54 }
 0xb6c   : > { %3547 = vmatprep.mubr.msk.f32.mxu0 %vm3833_vm1, %v3832_v7  ;;  %3546 = vmatpush3.xpose.msk.msra.mxu0 %vm819_vm2, %v4241_v57 }
 0xb6d   : > { %3555 = vmatprep.subr.mxu0 %v3832_v7 }
 0xb86   : > { %v2170_v62 = vpop.permute.xlu1 %2169 }
 0xc3e   : > { %v1899_v45 = vpop.f32.mrb[14].mxu0 }
 0xc3f   : > { %v4251_v60 = vadd.f32 %v3305_v59, %v1899_v45  ;;  %v3525_v61 = vpop.f32.mrb[15].mxu0  ;;  %v1996_v59 = vld [vmem:[%s4490_s10 + $0x28] sm:$0xff] }
 0xc40   : > { %v3726_v45 = vpack.c.bf16 %v1996_v59, %v1995_v58  ;;  %v3094_v59 = vld [vmem:[%s4500_s20 + $0x30] sm:$0xff] }
 0xc41   : > { %2167 = vrot.lane.b32.xlu0 %v4251_v60, %s4531_s30  ;;  %3548 = vmatmul.mubr.msk.f32.vlgmr.msra.gmra.mrb[16].mxu0 %vm819_vm2, %v4251_v60 }
 0xc42   : > { %3556 = vmatpush3.xpose.msk.msra.mxu0 %vm819_vm2, %v2170_v62  ;;  %3557 = vmatprep.mubr.msk.f32.mxu0 %vm3833_vm1, %v3832_v7 }
 0xc43   : > { %3719 = vmatprep.subr.bf16.mxu0 %v3840_v63 }
 0xcb3   : > { %v2168_v0 = vpop.permute.xlu0 %2167 }
 0xcb4   : > { %3558 = vmatmul.mubr.msk.f32.vlgmr.msra.gmra.mrb[18].mxu0 %vm819_vm2, %v2168_v0 }
 0xcb5   : > { %3569 = vmatprep.mubr.msk.f32.mxu0 %vm3833_vm1, %v3832_v7  ;;  %3721 = vmatpush3.bf16.msra.mxu0 %v3720_v24 }
 0xcb6   : > { %3579 = vmatprep.subr.mxu0 %v3832_v7 }
 0xd14   : > { %v2072_v1 = vpop.f32.mrb[16].mxu0 }
 0xd15   : > { %v2076_v2 = vmul.f32 0.25, %v2072_v1  ;;  %v3549_v38 = vpop.f32.mrb[17].mxu0 }
 0xd17   : > { %v2078_v3 = vsel %vm2077_vm5, %v2076_v2, -inf }
 0xd18   : > { %2079 = vmax.xlane.f32.xlu0 %v2078_v3 }
 0xd87   : > { %v2241_v4 = vpop.f32.mrb[18].mxu0 }
 0xd88   : > { %v2245_v5 = vmul.f32 0.25, %v2241_v4  ;;  %v3559_v6 = vpop.f32.mrb[19].mxu0 }
 0xd8a   : > { %v2246_v8 = vsel %vm2077_vm5, %v2245_v5, -inf }
 0xd8b   : > { %2247 = vmax.xlane.f32.xlu1 %v2246_v8 }
 0xd9c   : > { %2089 = vrot.lane.b32.xlu1 %v4241_v57, %s4532_s1  ;;  %s4535_s1 = smov 32  }
 0xda0   : > { %2482 = vrot.lane.b32.xlu1 %v4241_v57, %s4533_s24 }
 0xda4   : > { %2480 = vrot.lane.b32.xlu1 %v4251_v60, %s4533_s24  ;;  %s4536_s24 = smov 80  }
 0xda5   : > { %v2080_v9 = vpop.xlane.xlu0 %2079 }
 0xda6   : > { %v2081_v10 = vsub.f32 %v2076_v2, %v2080_v9 }
 0xda8   : > { %v2082_v11 = vmul.f32 1.442695, %v2081_v10 }
 0xdaa   : > { %3804 = vpow2.f32 %v2082_v11 }
 0xdb4   : > { %v3805_v12 = vpop.eup %3804 }
 0xdb5   : > { %v2084_v13 = vsel %vm2077_vm5, %v3805_v12, 0.0 }
 0xdb6   : > { %2085 = vadd.xlane.f32.xlu0 %v2084_v13  ;;  %v1997_v13 = vld [vmem:[%s4490_s10 + $0x30] sm:$0xff] }
 0xe18   : > { %v2248_v14 = vpop.xlane.xlu1 %2247 }
 0xe19   : > { %v2249_v15 = vsub.f32 %v2245_v5, %v2248_v14  ;;  %v1998_v14 = vld [vmem:[%s4490_s10 + $0x38] sm:$0xff] }
 0xe1b   : > { %v2250_v16 = vmul.f32 1.442695, %v2249_v15  ;;  %v3729_v15 = vpack.c.bf16 %v1998_v14, %v1997_v13  ;;  %v3331_v13 = vld [vmem:[%s4495_s15] ss:$0 sm:$0xff] }
 0xe1c   : > { %v2090_v17 = vpop.permute.xlu1 %2089 }
 0xe1d   : > { %3806 = vpow2.f32 %v2250_v16  ;;  %3551 = vmatpush3.msk.msra.mxu1 %vm2094_vm6, %v2090_v17 }
 0xe1e   : > { %3560 = vmatprep.subr.mxu1 %v3832_v7 }
 0xe20   : > { %v2483_v36 = vpop.permute.xlu1 %2482 }
 0xe24   : > { %v2481_v40 = vpop.permute.xlu1 %2480 }
 0xe27   : > { %v3807_v18 = vpop.eup %3806 }
 0xe28   : > { %v2252_v19 = vsel %vm2077_vm5, %v3807_v18, 0.0 }
 0xe29   : > { %2253 = vadd.xlane.f32.xlu0 %v2252_v19 }
 0xe3f   : > { %2257 = vrot.lane.b32.xlu0 %v4241_v57, %s4534_s4 }
 0xe43   : > { %v2086_v20 = vpop.xlane.xlu0 %2085 }
 0xe44   : > { %3808 = vrcp.f32 %v2086_v20 }
 0xe4e   : > { %v3809_v21 = vpop.eup %3808 }
 0xe4f   : > { %v2088_v25 = vmul.f32 %v3809_v21, %v3805_v12 }
 0xe51   : > { %3553 = vmatmul.mubr.msk.f32.vlgmr.msra.gmra.mrb[14].mxu1 %vm2077_vm5, %v2088_v25 }
 0xe52   : > { %3562 = vmatprep.mubr.msk.f32.mxu1 %vm3833_vm1, %v3832_v7 }
 0xeb6   : > { %v2254_v26 = vpop.xlane.xlu0 %2253 }
 0xeb7   : > { %3810 = vrcp.f32 %v2254_v26 }
 0xeba   : > { %v2258_v27 = vpop.permute.xlu0 %2257 }
 0xebb   : > { %3561 = vmatpush3.msk.msra.mxu1 %vm2094_vm6, %v2258_v27 }
 0xebc   : > { %3722 = vmatprep.subr.bf16.mxu1 %v3840_v63 }
 0xec1   : > { %v3811_v30 = vpop.eup %3810 }
 0xec2   : > { %v2256_v33 = vmul.f32 %v3811_v30, %v3807_v18 }
 0xec4   : > { %3563 = vmatmul.mubr.msk.f32.vlgmr.msra.gmra.mrb[16].mxu1 %vm2077_vm5, %v2256_v33 }
 0xec5   : > { %3724 = vmatpush3.bf16.msra.mxu1 %v3723_v31  ;;  %3576 = vmatprep.mubr.msk.f32.mxu1 %vm3833_vm1, %v3832_v7 }
 0xec6   : > { %3584 = vmatprep.subr.mxu1 %v3832_v7 }
 0xf24   : > { %v2163_v34 = vpop.f32.mrb[14].mxu1 }
 0xf25   : > { %v3554_v35 = vpop.f32.mrb[15].mxu1  ;;  %3577 = vmatmul.mubr.msk.f32.vlgmr.msra.gmra.mrb[18].mxu1 %vm819_vm2, %v2163_v34 }
 0xf26   : > { %3586 = vmatprep.mubr.msk.f32.mxu1 %vm3833_vm1, %v3832_v7 }
 0xf97   : > { %v2330_v37 = vpop.f32.mrb[16].mxu1 }
 0xf98   : > { %v3564_v39 = vpop.f32.mrb[17].mxu1  ;;  %3570 = vmatmul.mubr.msk.f32.vlgmr.msra.gmra.mrb[20].mxu0 %vm819_vm2, %v2330_v37 }
 0xf99   : > { %3580 = vmatpush3.xpose.msk.msra.mxu0 %vm819_vm2, %v2483_v36  ;;  %3581 = vmatprep.mubr.msk.f32.mxu0 %vm3833_vm1, %v3832_v7  ;;  %v2999_v36 = vld [vmem:[%s4498_s18] sm:$0xff]  ;;  %v3001_v39 = vld [vmem:[%s4498_s18 + $0x10] sm:$0xff] }
 0xf9a   : > { %3725 = vmatprep.subr.bf16.mxu0 %v3840_v63 }
 0xf9c   : > { %3582 = vmatmul.mubr.msk.f32.vlgmr.msra.gmra.mrb[22].mxu0 %vm819_vm2, %v2481_v40  ;;  %v3002_v40 = vld [vmem:[%s4498_s18 + $0x18] sm:$0xff] }
 0xf9d   : > { %3593 = vmatprep.mubr.msk.f32.mxu0 %vm3833_vm1, %v3832_v7  ;;  %3727 = vmatpush3.bf16.msra.mxu0 %v3726_v45  ;;  %v3095_v45 = vld [vmem:[%s4500_s20 + $0x38] sm:$0xff] }
 0xf9e   : > { %3601 = vmatprep.subr.mxu0 %v3832_v7 }
 0xff8   : > { %v2476_v41 = vpop.f32.mrb[18].mxu1 }
 0xff9   : > { %v3578_v42 = vpop.f32.mrb[19].mxu1 }
 0xffa   : > { %v3003_v42 = vld [vmem:[%s4498_s18 + $0x20] sm:$0xff] }
0x106b   : > { %v2403_v43 = vpop.f32.mrb[20].mxu0 }
0x106c   : > { %v2477_v44 = vadd.f32 %v2476_v41, %v2403_v43  ;;  %v3571_v46 = vpop.f32.mrb[21].mxu0  ;;  %v3735_v41 = vpack.c.bf16 %v3002_v40, %v3001_v39  ;;  %v3004_v43 = vld [vmem:[%s4498_s18 + $0x28] sm:$0xff]  ;;  %v3336_v39 = vld [vmem:[%s4497_s17] ss:$0 sm:$0xff] }
0x106d   : > { %v3005_v46 = vld [vmem:[%s4498_s18 + $0x30] sm:$0xff] }
0x106f   : > { %v2554_v32 = vpop.f32.mrb[22].mxu0 }
0x1070   : > { %v2558_v47 = vmul.f32 0.25, %v2554_v32  ;;  %v3583_v48 = vpop.f32.mrb[23].mxu0  ;;  %v3006_v32 = vld [vmem:[%s4498_s18 + $0x38] sm:$0xff] }
0x1071   : > { %v3088_v48 = vld [vmem:[%s4500_s20] sm:$0xff] }
0x1072   : > { %v2559_v49 = vsel %vm2077_vm5, %v2558_v47, -inf }
0x1073   : > { %2560 = vmax.xlane.f32.xlu0 %v2559_v49  ;;  %v3089_v49 = vld [vmem:[%s4500_s20 + $0x8] sm:$0xff] }
0x1089   : > { %2570 = vrot.lane.b32.xlu0 %v4241_v57, %s4535_s1 }
0x108d   : > { %2721 = vrot.lane.b32.xlu0 %v4251_v60, %s4536_s24 }
0x1100   : > { %v2561_v50 = vpop.xlane.xlu0 %2560 }
0x1101   : > { %v2562_v51 = vsub.f32 %v2558_v47, %v2561_v50  ;;  %v3741_v47 = vpack.c.bf16 %v3006_v32, %v3005_v46  ;;  %v3090_v50 = vld [vmem:[%s4500_s20 + $0x10] sm:$0xff] }
0x1103   : > { %v2563_v52 = vmul.f32 1.442695, %v2562_v51  ;;  %v3744_v51 = vpack.c.bf16 %v3089_v49, %v3088_v48 }
0x1104   : > { %v2571_v53 = vpop.permute.xlu0 %2570 }
0x1105   : > { %3812 = vpow2.f32 %v2563_v52  ;;  %3585 = vmatpush3.msk.msra.mxu1 %vm2094_vm6, %v2571_v53  ;;  %v3091_v52 = vld [vmem:[%s4500_s20 + $0x18] sm:$0xff] }
0x1106   : > { %3596 = vmatprep.subr.mxu1 %v3832_v7  ;;  %v3747_v53 = vpack.c.bf16 %v3091_v52, %v3090_v50 }
0x1108   : > { %v2722_v1 = vpop.permute.xlu0 %2721 }
0x110f   : > { %v3813_v55 = vpop.eup %3812 }
0x1110   : > { %v2565_v56 = vsel %vm2077_vm5, %v3813_v55, 0.0 }
0x1111   : > { %2566 = vadd.xlane.f32.xlu1 %v2565_v56  ;;  %v3093_v56 = vld [vmem:[%s4500_s20 + $0x28] sm:$0xff] }
0x1122   : > { %2723 = vrot.lane.b32.xlu1 %v4241_v57, %s4536_s24 }
0x119e   : > { %v2567_v60 = vpop.xlane.xlu1 %2566 }
0x119f   : > { %3814 = vrcp.f32 %v2567_v60  ;;  %v3753_v60 = vpack.c.bf16 %v3095_v45, %v3094_v59 }
0x11a2   : > { %v2724_v0 = vpop.permute.xlu1 %2723 }
0x11a9   : > { %v3815_v61 = vpop.eup %3814 }
0x11aa   : > { %v2569_v62 = vmul.f32 %v3815_v61, %v3813_v55  ;;  %v3092_v55 = vld [vmem:[%s4500_s20 + $0x20] sm:$0xff] }
0x11ab   : > { %v3750_v58 = vpack.c.bf16 %v3093_v56, %v3092_v55  ;;  %v3096_v61 = vld [vmem:[%s4500_s20 + $0x40] sm:$0xff] }
0x11ac   : > { %3587 = vmatmul.mubr.msk.f32.vlgmr.msra.gmra.mrb[20].mxu1 %vm2077_vm5, %v2569_v62  ;;  %v3097_v62 = vld [vmem:[%s4500_s20 + $0x48] sm:$0xff] }
0x11ad   : > { %3597 = vmatpush3.xpose.msk.msra.mxu1 %vm819_vm2, %v2724_v0  ;;  %3598 = vmatprep.mubr.msk.f32.mxu1 %vm3833_vm1, %v3832_v7  ;;  %v3756_v0 = vpack.c.bf16 %v3097_v62, %v3096_v61 }
0x11ae   : > { %3728 = vmatprep.subr.bf16.mxu1 %v3840_v63 }
0x11b0   : > { %3599 = vmatmul.mubr.msk.f32.vlgmr.msra.gmra.mrb[22].mxu1 %vm819_vm2, %v2722_v1  ;;  %v3098_v1 = vld [vmem:[%s4500_s20 + $0x50] sm:$0xff] }
0x11b1   : > { %3610 = vmatprep.mubr.msk.f32.mxu1 %vm3833_vm1, %v3832_v7  ;;  %3730 = vmatpush3.bf16.msra.mxu1 %v3729_v15 }
0x11b2   : > { %3743 = vmatprep.subr.bf16.mxu1 %v3840_v63 }
0x127f   : > { %v2643_v2 = vpop.f32.mrb[20].mxu1 }
0x1280   : > { %v3588_v38 = vpop.f32.mrb[21].mxu1  ;;  %3594 = vmatmul.mubr.msk.f32.vlgmr.msra.gmra.mrb[24].mxu0 %vm819_vm2, %v2643_v2  ;;  %v3099_v2 = vld [vmem:[%s4500_s20 + $0x58] sm:$0xff] }
0x1281   : > { %3603 = vmatprep.mubr.msk.f32.mxu0 %vm3833_vm1, %v3832_v7  ;;  %v3759_v38 = vpack.c.bf16 %v3099_v2, %v3098_v1 }
0x1283   : > { %v2795_v3 = vpop.f32.mrb[22].mxu1 }
0x1284   : > { %v2799_v4 = vmul.f32 0.25, %v2795_v3  ;;  %v3600_v5 = vpop.f32.mrb[23].mxu1  ;;  %v3100_v3 = vld [vmem:[%s4500_s20 + $0x60] sm:$0xff] }
0x1286   : > { %v2800_v6 = vsel %vm2077_vm5, %v2799_v4, -inf }
0x1287   : > { %2801 = vmax.xlane.f32.xlu1 %v2800_v6 }
0x1314   : > { %v2802_v8 = vpop.xlane.xlu1 %2801 }
0x1315   : > { %v2803_v9 = vsub.f32 %v2799_v4, %v2802_v8  ;;  %v3101_v4 = vld [vmem:[%s4500_s20 + $0x68] sm:$0xff] }
0x1316   : > { %v3762_v5 = vpack.c.bf16 %v3101_v4, %v3100_v3 }
0x1317   : > { %v2804_v10 = vmul.f32 1.442695, %v2803_v9 }
0x1319   : > { %3816 = vpow2.f32 %v2804_v10 }
0x1323   : > { %v3817_v11 = vpop.eup %3816 }
0x1324   : > { %v2806_v12 = vsel %vm2077_vm5, %v3817_v11, 0.0 }
0x1325   : > { %2807 = vadd.xlane.f32.xlu0 %v2806_v12 }
0x133b   : > { %2811 = vrot.lane.b32.xlu0 %v4241_v57, %s4537_s26 }
0x1353   : > { %v2716_v16 = vpop.f32.mrb[24].mxu0 }
0x1354   : > { %v2720_v17 = vadd.f32 %v2716_v16, %v2477_v44  ;;  %v3595_v18 = vpop.f32.mrb[25].mxu0  ;;  %v3738_v44 = vpack.c.bf16 %v3004_v43, %v3003_v42  ;;  %v3103_v16 = vld [vmem:[%s4500_s20 + $0x78] sm:$0xff] }
0x1355   : > { %v3332_v18 = vld [vmem:[%s4499_s19] ss:$0 sm:$0xff] }
0x13b2   : > { %v2808_v19 = vpop.xlane.xlu0 %2807 }
0x13b3   : > { %3818 = vrcp.f32 %v2808_v19 }
0x13b6   : > { %v2812_v20 = vpop.permute.xlu0 %2811 }
0x13b7   : > { %3602 = vmatpush3.msk.msra.mxu0 %vm2094_vm6, %v2812_v20 }
0x13b8   : > { %3731 = vmatprep.subr.bf16.mxu0 %v3840_v63 }
0x13bd   : > { %v3819_v57 = vpop.eup %3818 }
0x13be   : > { %v2810_v21 = vmul.f32 %v3819_v57, %v3817_v11  ;;  %v3330_v11 = vld [vmem:[%s4494_s14] ss:$0 sm:$0xff] }
0x13c0   : > { %3604 = vmatmul.mubr.msk.f32.vlgmr.msra.gmra.mrb[26].mxu0 %vm2077_vm5, %v2810_v21 }
0x13c1   : > { %3629 = vmatprep.mubr.msk.f32.mxu0 %vm3833_vm1, %v3832_v7 }
0x1493   : > { %v2884_v25 = vpop.f32.mrb[26].mxu0 }
0x1494   : > { %v3605_v22 = vpop.f32.mrb[27].mxu0  ;;  %3611 = vmatmul.mubr.msk.f32.vlgmr.msra.gmra.mrb[24].mxu1 %vm819_vm2, %v2884_v25  ;;  %v3334_v25 = vld [vmem:[%s4501_s21] ss:$0 sm:$0xff] }
0x1495   : > { %3664 = vmatprep.mubr.msk.f32.mxu1 %vm3833_vm1, %v3832_v7  ;;  %3745 = vmatpush3.bf16.msra.mxu1 %v3744_v51 }
0x1496   : > { %3746 = vmatprep.subr.bf16.mxu1 %v3840_v63 }
0x1499   : > { %3748 = vmatpush3.bf16.msra.mxu1 %v3747_v53 }
0x149a   : > { %3749 = vmatprep.subr.bf16.mxu1 %v3840_v63 }
0x149d   : > { %3751 = vmatpush3.bf16.msra.mxu1 %v3750_v58 }
0x149e   : > { %3752 = vmatprep.subr.bf16.mxu1 %v3840_v63 }
0x14a1   : > { %3754 = vmatpush3.bf16.msra.mxu1 %v3753_v60 }
0x14a2   : > { %3755 = vmatprep.subr.bf16.mxu1 %v3840_v63 }
0x14a5   : > { %3757 = vmatpush3.bf16.msra.mxu1 %v3756_v0 }
0x14a6   : > { %3758 = vmatprep.subr.bf16.mxu1 %v3840_v63 }
0x14a9   : > { %3760 = vmatpush3.bf16.msra.mxu1 %v3759_v38 }
0x14aa   : > { %3761 = vmatprep.subr.bf16.mxu1 %v3840_v63 }
0x14ad   : > { %3763 = vmatpush3.bf16.msra.mxu1 %v3762_v5 }
0x14ae   : > { %3764 = vmatprep.subr.bf16.mxu1 %v3840_v63 }
0x1567   : > { %v2957_v24 = vpop.f32.mrb[24].mxu1 }
0x1568   : > { %v2961_v26 = vadd.f32 %v2957_v24, %v2720_v17  ;;  %v3612_v27 = vpop.f32.mrb[25].mxu1 }
0x156a   : > { %v2968_v28 = vadd.f32 %v3329_v23, %v2961_v26 }
0x156c   : > { %v2969_v29 = vadd.f32 %v2968_v28, %v4232_v54  ;;  %v3000_v54 = vld [vmem:[%s4498_s18 + $0x8] sm:$0xff] }
0x156d   : > { %v3732_v37 = vpack.c.bf16 %v3000_v54, %v2999_v36  ;;  %v3335_v54 = vld [vmem:[%s4496_s16] ss:$0 sm:$0xff] }
0x156e   : > { %v2972_v30 = vsel %vm726_vm0, %v2969_v29, 0.0 }
0x156f   : > { %2973 = vadd.xlane.f32.xlu1 %v2972_v30  ;;  %3733 = vmatpush3.bf16.msra.mxu0 %v3732_v37 }
0x1570   : > { %3734 = vmatprep.subr.bf16.mxu0 %v3840_v63 }
0x1573   : > { %3736 = vmatpush3.bf16.msra.mxu0 %v3735_v41 }
0x1574   : > { %3737 = vmatprep.subr.bf16.mxu0 %v3840_v63 }
0x1577   : > { %3739 = vmatpush3.bf16.msra.mxu0 %v3738_v44 }
0x1578   : > { %3740 = vmatprep.subr.bf16.mxu0 %v3840_v63  ;;  %v3102_v63 = vld [vmem:[%s4500_s20 + $0x70] sm:$0xff] }
0x1579   : > { %v3765_v17 = vpack.c.bf16 %v3103_v16, %v3102_v63 }
0x157b   : > { %3742 = vmatpush3.bf16.msra.mxu0 %v3741_v47  ;;  %3766 = vmatpush3.bf16.msra.mxu1 %v3765_v17 }
0x15fc   : > { %v2974_v31 = vpop.xlane.xlu1 %2973 }
0x15fd   : > { %v2975_v33 = vmul.f32 0.015625, %v2974_v31 }
0x15ff   : > { %v4363_v34 = vsub.f32 %v2969_v29, %v2975_v33 }
0x1601   : > { %v2977_v7 = vmul.f32 %v4363_v34, %v4363_v34 }
0x1603   : > { %v2978_v35 = vsel %vm726_vm0, %v2977_v7, 0.0 }
0x1604   : > { %2979 = vadd.xlane.f32.xlu1 %v2978_v35 }
0x1691   : > { %v2980_v6 = vpop.xlane.xlu1 %2979 }
0x1692   : > { %v2981_v8 = vmul.f32 0.015625, %v2980_v6 }
0x1694   : > { %v2982_v9 = vadd.f32 1e-05, %v2981_v8 }
0x1696   : > { %3820 = vrsqrt.f32 %v2982_v9 }
0x16a0   : > { %v3821_v10 = vpop.eup %3820 }
0x16a1   : > { %v2984_v12 = vmul.f32 %v3821_v10, %v4363_v34 }
0x16a3   : > { %v2991_v14 = vmul.f32 %v3330_v11, %v2984_v12 }
0x16a5   : > { %v2998_v15 = vadd.f32 %v3331_v13, %v2991_v14 }
0x16a7   : > { %3630 = vmatmul.mubr.msk.f32.vlgmr.msra.gmra.mrb[28].mxu0 %vm726_vm0, %v2998_v15 }
0x177a   : > { %v3083_v19 = vpop.f32.mrb[28].mxu0 }
0x177b   : > { %v3084_v20 = vadd.f32 %v3332_v18, %v3083_v19  ;;  %v3631_v57 = vpop.f32.mrb[29].mxu0 }
0x177d   : > { %v3087_v21 = vmax.f32 %v3084_v20, 0.0 }
0x177f   : > { %3665 = vmatmul.mubr.f32.vlgmr.msra.gmra.mrb[26].mxu1 %v3087_v21 }
0x1852   : > { %v3177_v22 = vpop.f32.mrb[26].mxu1 }
0x1853   : > { %v3178_v23 = vadd.f32 %v3334_v25, %v3177_v22  ;;  %v3666_v24 = vpop.f32.mrb[27].mxu1 }
0x1855   : > { %v3181_v26 = vadd.f32 %v3178_v23, %v2998_v15 }
0x1857   : > { %v3184_v27 = vsel %vm726_vm0, %v3181_v26, 0.0 }
0x1858   : > { %3185 = vadd.xlane.f32.xlu1 %v3184_v27 }
0x18e5   : > { %v3186_v28 = vpop.xlane.xlu1 %3185 }
0x18e6   : > { %v3187_v29 = vmul.f32 0.015625, %v3186_v28 }
0x18e8   : > { %v3188_v30 = vsub.f32 %v3181_v26, %v3187_v29 }
0x18ea   : > { %v3189_v31 = vmul.f32 %v3188_v30, %v3188_v30 }
0x18ec   : > { %v3190_v33 = vsel %vm726_vm0, %v3189_v31, 0.0 }
0x18ed   : > { %3191 = vadd.xlane.f32.xlu1 %v3190_v33 }
0x197a   : > { %v3192_v34 = vpop.xlane.xlu1 %3191 }
0x197b   : > { %v3193_v7 = vmul.f32 0.015625, %v3192_v34 }
0x197d   : > { %v3194_v35 = vadd.f32 1e-05, %v3193_v7 }
0x197f   : > { %3822 = vrsqrt.f32 %v3194_v35 }
0x1989   : > { %v3823_v36 = vpop.eup %3822 }
0x198a   : > { %v3196_v37 = vmul.f32 %v3823_v36, %v3188_v30 }
0x198c   : > { %v3203_v40 = vmul.f32 %v3335_v54, %v3196_v37 }
0x198e   : > { %v3210_v41 = vadd.f32 %v3336_v39, %v3203_v40 }
0x1990   : > { %3211 = vst.msk [vmem:[%s695_s29] sm:$0xff] %vm726_vm0, %v3210_v41 }
0x1991 PF: > { %s32_s3 = sadd.s32 1, %s3830_s3  }
0x1992   : > { %p29_p4 = scmp.ge.s32.totalorder %s32_s3, 4  }
0x1994   :  { %31 = sbr.rel (!%p29_p4) target bundleno = 8 (0x8), region = 141 }

// kernel: image_captioning_forward.12
= control target key start
LH: loop header
LB: loop body
LE: loop exit
PB: predicated region body
PF: predicated region fallthrough
CT: control target
= control target key end

     0   :  { %s4583_s0 = inlined_call_operand.vmem [shape: f32[2,8,64], index: 0, kind: input, shape index: {}]   ;;  %s4584_s1 = inlined_call_operand.vmem [shape: f32[2,5,64], index: 1, kind: input, shape index: {}]   ;;  %s4585_s2 = inlined_call_operand.vmem [shape: f32[64,192], index: 2, kind: input, shape index: {}]   ;;  %s4586_s3 = inlined_call_operand.vmem [shape: f32[1,192], index: 3, kind: input, shape index: {}]   ;;  %s4587_s4 = inlined_call_operand.vmem [shape: f32[64,64], index: 4, kind: input, shape index: {}]   ;;  %s4588_s5 = inlined_call_operand.vmem [shape: f32[1,64], index: 5, kind: input, shape index: {}]   ;;  %s4589_s6 = inlined_call_operand.vmem [shape: f32[64,64], index: 6, kind: input, shape index: {}]   ;;  %s4590_s7 = inlined_call_operand.vmem [shape: f32[1,64], index: 7, kind: input, shape index: {}]   ;;  %s4591_s8 = inlined_call_operand.vmem [shape: f32[64,128], index: 8, kind: input, shape index: {}]   ;;  %s4592_s9 = inlined_call_operand.vmem [shape: f32[1,128], index: 9, kind: input, shape index: {}]   ;;  %s4593_s10 = inlined_call_operand.vmem [shape: f32[64,64], index: 10, kind: input, shape index: {}]   ;;  %s4594_s11 = inlined_call_operand.vmem [shape: f32[1,64], index: 11, kind: input, shape index: {}]   ;;  %s4595_s12 = inlined_call_operand.vmem [shape: f32[1,64], index: 12, kind: input, shape index: {}]   ;;  %s4596_s13 = inlined_call_operand.vmem [shape: f32[1,64], index: 13, kind: input, shape index: {}]   ;;  %s4597_s14 = inlined_call_operand.vmem [shape: f32[1,64], index: 14, kind: input, shape index: {}]   ;;  %s4598_s15 = inlined_call_operand.vmem [shape: f32[1,64], index: 15, kind: input, shape index: {}]   ;;  %s4599_s16 = inlined_call_operand.vmem [shape: f32[1,64], index: 16, kind: input, shape index: {}]   ;;  %s4600_s17 = inlined_call_operand.vmem [shape: f32[1,64], index: 17, kind: input, shape index: {}]   ;;  %s4601_s18 = inlined_call_operand.vmem [shape: f32[64,128], index: 18, kind: input, shape index: {}]   ;;  %s4602_s19 = inlined_call_operand.vmem [shape: f32[1,128], index: 19, kind: input, shape index: {}]   ;;  %s4603_s20 = inlined_call_operand.vmem [shape: f32[128,64], index: 20, kind: input, shape index: {}]   ;;  %s4604_s21 = inlined_call_operand.hbm [shape: f32[1,64], index: 21, kind: input, shape index: {}]   ;;  %s4605_s22 = inlined_call_operand.vmem [shape: f32[2,8,64], index: 22, kind: output, shape index: {}]  }
   0x1   :  { %4622 = sst [smem:[#allocation5_spill]] %s4583_s0 }
   0x2   :  { %4623 = sst [smem:[#allocation6_spill]] %s4584_s1 }
   0x3   :  { %4624 = sst [smem:[#allocation7_spill]] %s4585_s2 }
   0x4   :  { %4625 = sst [smem:[#allocation8_spill]] %s4586_s3 }
   0x5   :  { %4626 = sst [smem:[#allocation9_spill]] %s4587_s4 }
   0x6   :  { %4627 = sst [smem:[#allocation10_spill]] %s4588_s5 }
   0x7   :  { %4628 = sst [smem:[#allocation11_spill]] %s4589_s6 }
   0x8   :  { %27 = vsyncpa [#allocation3], 0  ;;  %s4029_s3 = smov 0  }
   0x9 LB: > { %s4035_s28 = sadd.s32 4294967295, %s3900_s3   ;;  %p3304_p0 = scmp.ge.s32.totalorder %s3900_s3, 1  ;;  %s3900_s3 = sphi %s4029_s3, %s33_s3  }
   0xa   : > { %p536_p1 = scmp.lt.s32.totalorder %s3900_s3, 3  ;;  %p4609_p3 = scmp.eq.s32.totalorder %s4035_s28, 0 }
   0xb   : > { %s3902_s30 = smov [#allocation2]   ;;  %s3862_s5 = scalar_lea.hbm %s4604_s21, 16 }
   0xc   : > { %p4039_p2 = pnand %p3304_p0, %p536_p1  ;;  %s606_s4 = sshll.u32 %s3902_s30, 4  ;;  %s607_s4 = int_to_ptr.vmem [resolvable:$true] %s606_s4 }
   0xd   : > { %p3863_p6 = scmp.ne.s32.totalorder %s4604_s21, %s3862_s5  ;;  %p3869_p10 = scmp.lt.u32.totalorder %s3862_s5, %s4604_s21 }
   0xe   : > { %s4629_s29 = scalar_select %p4039_p2, 1, 0 }
   0xf   : > { %p3798_p4 = pneg %p4039_p2 }
  0x11   : > { %p4048_p5 = pnand %p4609_p3, %p3798_p4 }
  0x13   : > { %p3864_p7 = pneg %p4048_p5 }
  0x15   : > { %p3865_p8 = pnand %p3864_p7, %p3863_p6 }
  0x17   : > { %p3866_p9 = pneg %p3865_p8 }
  0x19   : > { %p3871_p11 = pnand %p3869_p10, %p3866_p9 }
  0x1b   : > { %3874 = shalt.err (!%p3871_p11)
}
  0x1c   : > { %s3875_s2 = scalar_lea.vmem %s607_s4, 16  ;;  %s3882_s27 = scalar_lea.vmem %s607_s4, 32 }
  0x1d   : > { %p3876_p12 = scmp.ne.s32.totalorder %s607_s4, %s3875_s2  ;;  %p3883_p1 = scmp.lt.s32.totalorder %s607_s4, %s607_s4 }
  0x1e   : > { %p3884_p4 = scmp.lt.s32.totalorder %s3882_s27, %s3875_s2 }
  0x1f   : > { %p3878_p13 = pnand %p3876_p12, %p3864_p7 }
  0x20   : > { %p3885_p3 = por %p3884_p4, %p3883_p1 }
  0x21   : > { %p3879_p0 = pneg %p3878_p13 }
  0x23   : > { %p3886_p2 = pnand %p3885_p3, %p3879_p0 }
  0x25   : > { %3889 = shalt.err (!%p3886_p2)
}
  0x26   : > { %3801 = dma.hbm_to_vmem [thread:$0]  (!%p4048_p5), %s4604_s21, 16, %s607_s4, [#allocation3]  }
  0x27   : > { %p4631_p6 = scmp.ne.s32.totalorder %s4629_s29, 0 }
  0x28   : > { %p4632_p8 = scmp.eq.s32.totalorder (!%p4631_p6), %s4035_s28, 0 }
  0x29   : > { %633 = sbr.rel (%p4631_p6) target bundleno = 6582 (0x19b6), region = 108 }
  0x30   : > { %3895 = dma.done.wait (%p4632_p8), [#allocation3], 16   ;;  %p4633_p7 = pmov %p4632_p8 }
  0x31   : > { %v3903_v0 = vmov 0.0   ;;  %s4634_s5 = sld [smem:[#allocation7_spill]]  ;;  %p697_p2 = scmp.lt.s32.totalorder %s4035_s28, 1  ;;  %vm739_vm0 = vcmask 523264   ;;  %v729_v26 = vlaneseq  ;;  %vm3904_vm1 = vmmov 0  }
  0x32   : > { %3897 = vsyncadd (%p4633_p7), [#allocation3], 4294967280  ;;  %807 = vmatprep.mubr.f32.mxu0 %v3903_v0  ;;  %3476 = vmatprep.subr.mxu1 %v3903_v0  ;;  %s4635_s23 = sld [smem:[#allocation5_spill]]  ;;  %s4636_s4 = sld [smem:[#allocation8_spill]]  ;;  %vm832_vm2 = vcmask 130048   ;;  %vm909_vm4 = vcmask 64512  }
  0x33   : > { %s4649_s28 = smov (!%p697_p2, %s4035_s28), 1  ;;  %v730_v27 = vshrl.u32 %v729_v26, 7  ;;  %3478 = vmatprep.mubr.msk.f32.mxu1 %vm3904_vm1, %v3903_v0  ;;  %s4618_s24 = smov 64   ;;  %v826_v40 = vand.u32 127, %v729_v26  ;;  %v3908_v44 = vmov -1e+09  }
  0x34   : > { %s4126_s2 = sshll.u32 %s4649_s28, 3  ;;  %s4615_s29 = smov 48   ;;  %v3911_v63 = vmov 0.0|0.0   ;;  %vm2090_vm5 = vcmask 39936   ;;  %vm2107_vm6 = vcmask 1044480  }
  0x35   : > { %v731_v28 = vsub.s32 0, %v730_v27  ;;  %s4619_s6 = smov 112   ;;  %v735_v34 = vsub.s32 1, %v730_v27  ;;  %vm827_vm3 = vcmp.ge.s32.totalorder %v730_v27, %v826_v40  ;;  %s4614_s25 = smov 32  }
  0x36   : > { %v4166_v45 = vsel %vm827_vm3, 0.0, %v3908_v44  ;;  %s4616_s26 = smov 96   ;;  %s4611_s28 = smov 16  }
  0x37   : > { %v712_v1 = vld [vmem:[%s4634_s5 + $0x8] sm:$0xff]  ;;  %v714_v2 = vld [vmem:[%s4634_s5 + $0x18] sm:$0xff]  ;;  %v711_v3 = vld [vmem:[%s4634_s5] sm:$0xff]  ;;  %s4638_s27 = sld [smem:[#allocation10_spill]]  ;;  %s4641_s1 = smov 112  }
  0x38   : > { %v3694_v4 = vpack.c.bf16 %v714_v2, %v712_v1  ;;  %v713_v5 = vld [vmem:[%s4634_s5 + $0x10] sm:$0xff]  ;;  %v716_v6 = vld [vmem:[%s4634_s5 + $0x28] sm:$0xff]  ;;  %v718_v7 = vld [vmem:[%s4634_s5 + $0x38] sm:$0xff]  ;;  %s700_s0 = scalar_lea.vmem %s4635_s23, %s4126_s2  ;;  %s4637_s23 = sld [smem:[#allocation9_spill]] }
  0x39   : > { %v3696_v8 = vpack.c.bf16 %v713_v5, %v711_v3  ;;  %v3698_v9 = vpack.c.bf16 %v718_v7, %v716_v6  ;;  %v715_v10 = vld [vmem:[%s4634_s5 + $0x20] sm:$0xff]  ;;  %v717_v11 = vld [vmem:[%s4634_s5 + $0x30] sm:$0xff]  ;;  %v720_v12 = vld [vmem:[%s4634_s5 + $0x48] sm:$0xff]  ;;  %s708_s30 = scalar_lea.vmem %s4605_s22, %s4126_s2 }
  0x3a   : > { %3695 = vmatprep.subr.bf16.mxu0 %v3694_v4  ;;  %v722_v13 = vld [vmem:[%s4634_s5 + $0x58] sm:$0xff]  ;;  %v3700_v14 = vpack.c.bf16 %v717_v11, %v715_v10  ;;  %v719_v16 = vld [vmem:[%s4634_s5 + $0x40] sm:$0xff]  ;;  %v721_v17 = vld [vmem:[%s4634_s5 + $0x50] sm:$0xff] }
  0x3b   : > { %3697 = vmatpush1.bf16.msra.mxu0 %v3696_v8  ;;  %v3702_v15 = vpack.c.bf16 %v722_v13, %v720_v12  ;;  %v724_v18 = vld [vmem:[%s4634_s5 + $0x68] sm:$0xff]  ;;  %v726_v19 = vld [vmem:[%s4634_s5 + $0x78] sm:$0xff]  ;;  %v3704_v20 = vpack.c.bf16 %v721_v17, %v719_v16  ;;  %v723_v22 = vld [vmem:[%s4634_s5 + $0x60] sm:$0xff] }
  0x3c   : > { %3699 = vmatprep.subr.bf16.mxu0 %v3698_v9  ;;  %v3706_v21 = vpack.c.bf16 %v726_v19, %v724_v18  ;;  %v725_v23 = vld [vmem:[%s4634_s5 + $0x70] sm:$0xff]  ;;  %v4132_v25 = vld [vmem:[%s700_s0] sm:$0xff]  ;;  %s4612_s0 = smov 80   ;;  %s4644_s5 = smov 48  }
  0x3d   : > { %v3708_v24 = vpack.c.bf16 %v725_v23, %v723_v22  ;;  %v727_v29 = vld [vmem:[%s4636_s4] sm:$0x3] }
  0x3e   : > { %v732_v30 = vrot.slane %v727_v29, %v731_v28  ;;  %v736_v35 = vrot.slane %v727_v29, %v735_v34  ;;  %v816_v6 = vld [vmem:[%s4637_s23 + $0x10] sm:$0xff]  ;;  %v817_v7 = vld [vmem:[%s4637_s23 + $0x18] sm:$0xff]  ;;  %v814_v11 = vld [vmem:[%s4637_s23] sm:$0xff] }
  0x3f   : > { %3701 = vmatpush1.bf16.msra.mxu0 %v3700_v14  ;;  %v3711_v9 = vpack.c.bf16 %v817_v7, %v816_v6  ;;  %v815_v12 = vld [vmem:[%s4637_s23 + $0x8] sm:$0xff]  ;;  %v3329_v7 = vld [vmem:[%s4638_s27] ss:$0 sm:$0xff]  ;;  %s4647_s27 = smov 16  }
  0x40   : > { %3703 = vmatprep.subr.bf16.mxu0 %v3702_v15  ;;  %v3714_v13 = vpack.c.bf16 %v815_v12, %v814_v11  ;;  %v819_v40 = vld [vmem:[%s4637_s23 + $0x28] sm:$0xff] }
  0x43   : > { %3705 = vmatpush1.bf16.msra.mxu0 %v3704_v20 }
  0x44   : > { %3707 = vmatprep.subr.bf16.mxu0 %v3706_v21 }
  0x47   : > { %3709 = vmatpush1.bf16.msra.mxu0 %v3708_v24 }
  0x48   : > { %3466 = vmatprep.subr.mxu0 %v3903_v0 }
  0x4a   : > { %3312 = vmatmul.mubr.msk.f32.vlgmr.msra.gmra.mrb[0].mxu0 %vm739_vm0, %v4132_v25 }
  0x4b   : > { %3468 = vmatprep.mubr.msk.f32.mxu0 %vm3904_vm1, %v3903_v0 }
 0x11d   : > { %v809_v31 = vpop.f32.mrb[0].mxu0 }
 0x11e   : > { %v4144_v32 = vadd.f32 %v809_v31, %v732_v30  ;;  %v811_v33 = vpop.f32.mrb[1].mxu0 }
 0x11f   : > { %v4156_v38 = vadd.f32 %v811_v33, %v736_v35 }
 0x120   : > { %830 = vrot.lane.b32.xlu1 %v4144_v32, %s4618_s24  ;;  %996 = vrot.lane.b32.xlu0 %v4144_v32, %s4615_s29  ;;  %s4642_s29 = smov 64  }
 0x124   : > { %994 = vrot.lane.b32.xlu0 %v4144_v32, %s4619_s6 }
 0x192   : > { %v831_v36 = vpop.permute.xlu1 %830  ;;  %v997_v37 = vpop.permute.xlu0 %996 }
 0x193   : > { %3467 = vmatpush3.xpose.msk.msra.mxu0 %vm832_vm2, %v831_v36  ;;  %3477 = vmatpush3.xpose.msk.msra.mxu1 %vm832_vm2, %v997_v37 }
 0x194   : > { %3471 = vmatprep.subr.mxu0 %v3903_v0  ;;  %3481 = vmatprep.subr.mxu1 %v3903_v0 }
 0x196   : > { %3469 = vmatmul.mubr.msk.f32.vlgmr.msra.gmra.mrb[2].mxu0 %vm832_vm2, %v4144_v32  ;;  %v995_v39 = vpop.permute.xlu0 %994 }
 0x197   : > { %3472 = vmatpush3.msra.mxu0 %v4156_v38  ;;  %3479 = vmatmul.mubr.msk.f32.vlgmr.msra.gmra.mrb[0].mxu1 %vm832_vm2, %v995_v39  ;;  %v818_v39 = vld [vmem:[%s4637_s23 + $0x20] sm:$0xff] }
 0x198   : > { %3483 = vmatprep.mubr.msk.f32.mxu1 %vm3904_vm1, %v3903_v0  ;;  %3473 = vmatprep.mubr.msk.f32.mxu0 %vm3904_vm1, %v3903_v0 }
 0x199   : > { %3710 = vmatprep.subr.bf16.mxu0 %v3911_v63 }
 0x269   : > { %v903_v41 = vpop.f32.mrb[2].mxu0 }
 0x26a   : > { %v3470_v42 = vpop.f32.mrb[3].mxu0  ;;  %v1068_v43 = vpop.f32.mrb[0].mxu1  ;;  %v907_v46 = vmul.f32 0.25, %v903_v41  ;;  %v3717_v41 = vpack.c.bf16 %v819_v40, %v818_v39 }
 0x26b   : > { %v1072_v47 = vmul.f32 0.25, %v1068_v43  ;;  %v3480_v48 = vpop.f32.mrb[1].mxu1 }
 0x26c   : > { %v908_v51 = vadd.f32 %v907_v46, %v4166_v45 }
 0x26d   : > { %v1073_v49 = vadd.f32 %v1072_v47, %v4166_v45 }
 0x26e   : > { %v910_v52 = vsel %vm909_vm4, %v908_v51, -inf }
 0x26f   : > { %v1074_v50 = vsel %vm909_vm4, %v1073_v49, -inf }
 0x270   : > { %1075 = vmax.xlane.f32.xlu1 %v1074_v50 }
 0x274   : > { %911 = vmax.xlane.f32.xlu1 %v910_v52 }
 0x2fd   : > { %v1076_v53 = vpop.xlane.xlu1 %1075 }
 0x2fe   : > { %v1077_v54 = vsub.f32 %v1073_v49, %v1076_v53 }
 0x300   : > { %v1078_v55 = vmul.f32 1.442695, %v1077_v54 }
 0x301   : > { %v912_v56 = vpop.xlane.xlu1 %911 }
 0x302   : > { %3824 = vpow2.f32 %v1078_v55  ;;  %v913_v57 = vsub.f32 %v908_v51, %v912_v56 }
 0x304   : > { %v914_v58 = vmul.f32 1.442695, %v913_v57 }
 0x306   : > { %3826 = vpow2.f32 %v914_v58 }
 0x30c   : > { %v3825_v59 = vpop.eup %3824 }
 0x30d   : > { %v1080_v60 = vsel %vm909_vm4, %v3825_v59, 0.0 }
 0x30e   : > { %1081 = vadd.xlane.f32.xlu0 %v1080_v60 }
 0x310   : > { %v3827_v61 = vpop.eup %3826 }
 0x311   : > { %v916_v62 = vsel %vm909_vm4, %v3827_v61, 0.0 }
 0x312   : > { %917 = vadd.xlane.f32.xlu1 %v916_v62 }
 0x323   : > { %1310 = vrot.lane.b32.xlu1 %v4144_v32, %s4614_s25  ;;  %s4643_s25 = smov 96  }
 0x324   : > { %1086 = vrot.lane.b32.xlu0 %v4156_v38, %s4619_s6 }
 0x328   : > { %1308 = vrot.lane.b32.xlu0 %v4144_v32, %s4616_s26 }
 0x39b   : > { %v1082_v1 = vpop.xlane.xlu0 %1081 }
 0x39c   : > { %3828 = vrcp.f32 %v1082_v1 }
 0x39f   : > { %v1087_v2 = vpop.permute.xlu0 %1086  ;;  %v918_v3 = vpop.xlane.xlu1 %917 }
 0x3a0   : > { %3830 = vrcp.f32 %v918_v3  ;;  %3482 = vmatpush3.msra.mxu1 %v1087_v2 }
 0x3a1   : > { %3713 = vmatprep.subr.bf16.mxu1 %v3911_v63 }
 0x3a3   : > { %v1311_v15 = vpop.permute.xlu1 %1310  ;;  %v1309_v17 = vpop.permute.xlu0 %1308 }
 0x3a6   : > { %v3829_v4 = vpop.eup %3828 }
 0x3a7   : > { %v1084_v5 = vmul.f32 %v3829_v4, %v3825_v59  ;;  %v820_v59 = vld [vmem:[%s4637_s23 + $0x30] sm:$0xff] }
 0x3a9   : > { %3484 = vmatmul.mubr.msk.f32.vlgmr.msra.gmra.mrb[2].mxu1 %vm909_vm4, %v1084_v5 }
 0x3aa   : > { %v3831_v8 = vpop.eup %3830  ;;  %3497 = vmatprep.mubr.msk.f32.mxu1 %vm3904_vm1, %v3903_v0  ;;  %3715 = vmatpush3.bf16.msra.mxu1 %v3714_v13 }
 0x3ab   : > { %v920_v10 = vmul.f32 %v3831_v8, %v3827_v61  ;;  %3505 = vmatprep.subr.mxu1 %v3903_v0 }
 0x3ad   : > { %3474 = vmatmul.mubr.msk.f32.vlgmr.msra.gmra.mrb[4].mxu0 %vm909_vm4, %v920_v10 }
 0x3ae   : > { %3712 = vmatpush3.bf16.msra.mxu0 %v3711_v9  ;;  %3490 = vmatprep.mubr.msk.f32.mxu0 %vm3904_vm1, %v3903_v0 }
 0x3af   : > { %3500 = vmatprep.subr.mxu0 %v3903_v0 }
 0x47c   : > { %v1158_v14 = vpop.f32.mrb[2].mxu1 }
 0x47d   : > { %v3485_v16 = vpop.f32.mrb[3].mxu1  ;;  %3491 = vmatmul.mubr.msk.f32.vlgmr.msra.gmra.mrb[6].mxu0 %vm832_vm2, %v1158_v14 }
 0x47e   : > { %3501 = vmatpush3.xpose.msk.msra.mxu0 %vm832_vm2, %v1311_v15  ;;  %3502 = vmatprep.mubr.msk.f32.mxu0 %vm3904_vm1, %v3903_v0 }
 0x47f   : > { %3716 = vmatprep.subr.bf16.mxu0 %v3911_v63 }
 0x480   : > { %v990_v18 = vpop.f32.mrb[4].mxu0 }
 0x481   : > { %v3475_v19 = vpop.f32.mrb[5].mxu0  ;;  %3498 = vmatmul.mubr.msk.f32.vlgmr.msra.gmra.mrb[4].mxu1 %vm832_vm2, %v990_v18  ;;  %3503 = vmatmul.mubr.msk.f32.vlgmr.msra.gmra.mrb[8].mxu0 %vm832_vm2, %v1309_v17 }
 0x482   : > { %3507 = vmatprep.mubr.msk.f32.mxu1 %vm3904_vm1, %v3903_v0  ;;  %3514 = vmatprep.mubr.msk.f32.mxu0 %vm3904_vm1, %v3903_v0  ;;  %v1916_v19 = vld [vmem:[%s4591_s8] sm:$0xff] }
 0x483   : > { %3718 = vmatpush3.bf16.msra.mxu0 %v3717_v41 }
 0x484   : > { %3522 = vmatprep.subr.mxu0 %v3903_v0 }
 0x550   : > { %v1231_v20 = vpop.f32.mrb[6].mxu0 }
 0x551   : > { %v3492_v21 = vpop.f32.mrb[7].mxu0 }
 0x554   : > { %v1304_v22 = vpop.f32.mrb[4].mxu1  ;;  %v1382_v23 = vpop.f32.mrb[8].mxu0 }
 0x555   : > { %v4213_v24 = vadd.f32 %v1304_v22, %v1231_v20  ;;  %v1386_v26 = vmul.f32 0.25, %v1382_v23  ;;  %v3499_v27 = vpop.f32.mrb[5].mxu1  ;;  %v3504_v28 = vpop.f32.mrb[9].mxu0  ;;  %v1917_v20 = vld [vmem:[%s4591_s8 + $0x8] sm:$0xff]  ;;  %v1919_v22 = vld [vmem:[%s4591_s8 + $0x18] sm:$0xff] }
 0x556   : > { %v3735_v21 = vpack.c.bf16 %v1917_v20, %v1916_v19  ;;  %v1920_v28 = vld [vmem:[%s4591_s8 + $0x20] sm:$0xff] }
 0x557   : > { %v1387_v29 = vadd.f32 %v1386_v26, %v4166_v45 }
 0x559   : > { %v1388_v30 = vsel %vm909_vm4, %v1387_v29, -inf }
 0x55a   : > { %1389 = vmax.xlane.f32.xlu0 %v1388_v30 }
 0x570   : > { %1399 = vrot.lane.b32.xlu0 %v4156_v38, %s4616_s26 }
 0x574   : > { %1549 = vrot.lane.b32.xlu0 %v4144_v32, %s4612_s0 }
 0x5e7   : > { %v1390_v31 = vpop.xlane.xlu0 %1389 }
 0x5e8   : > { %v1391_v33 = vsub.f32 %v1387_v29, %v1390_v31  ;;  %v1921_v29 = vld [vmem:[%s4591_s8 + $0x28] sm:$0xff] }
 0x5e9   : > { %v3741_v31 = vpack.c.bf16 %v1921_v29, %v1920_v28  ;;  %v2004_v28 = vld [vmem:[%s4593_s10] sm:$0xff]  ;;  %v2005_v29 = vld [vmem:[%s4593_s10 + $0x8] sm:$0xff] }
 0x5ea   : > { %v1392_v34 = vmul.f32 1.442695, %v1391_v33 }
 0x5eb   : > { %v1400_v35 = vpop.permute.xlu0 %1399 }
 0x5ec   : > { %3832 = vpow2.f32 %v1392_v34  ;;  %3506 = vmatpush3.msra.mxu1 %v1400_v35  ;;  %v1922_v35 = vld [vmem:[%s4591_s8 + $0x30] sm:$0xff] }
 0x5ed   : > { %3517 = vmatprep.subr.mxu1 %v3903_v0 }
 0x5f6   : > { %v3833_v36 = vpop.eup %3832 }
 0x5f7   : > { %v1394_v37 = vsel %vm909_vm4, %v3833_v36, 0.0 }
 0x5f8   : > { %1395 = vadd.xlane.f32.xlu1 %v1394_v37 }
 0x609   : > { %1551 = vrot.lane.b32.xlu1 %v4144_v32, %s4611_s28  ;;  %v1550_v32 = vpop.permute.xlu0 %1549  ;;  %s4639_s28 = sld [smem:[#allocation11_spill]] }
 0x60f   : > { %v1828_v23 = vld [vmem:[%s4639_s28] sm:$0xff]  ;;  %v1829_v26 = vld [vmem:[%s4639_s28 + $0x8] sm:$0xff]  ;;  %v1830_v30 = vld [vmem:[%s4639_s28 + $0x10] sm:$0xff] }
 0x610   : > { %v3723_v27 = vpack.c.bf16 %v1829_v26, %v1828_v23  ;;  %v1831_v33 = vld [vmem:[%s4639_s28 + $0x18] sm:$0xff]  ;;  %v1832_v37 = vld [vmem:[%s4639_s28 + $0x20] sm:$0xff]  ;;  %v1833_v40 = vld [vmem:[%s4639_s28 + $0x28] sm:$0xff] }
 0x611   : > { %v3726_v34 = vpack.c.bf16 %v1831_v33, %v1830_v30  ;;  %v3729_v41 = vpack.c.bf16 %v1833_v40, %v1832_v37  ;;  %v2007_v23 = vld [vmem:[%s4593_s10 + $0x18] sm:$0xff] }
 0x685   : > { %v1396_v42 = vpop.xlane.xlu1 %1395 }
 0x686   : > { %3834 = vrcp.f32 %v1396_v42  ;;  %v1834_v42 = vld [vmem:[%s4639_s28 + $0x30] sm:$0xff] }
 0x689   : > { %v1552_v46 = vpop.permute.xlu1 %1551 }
 0x690   : > { %v3835_v43 = vpop.eup %3834 }
 0x691   : > { %v1398_v44 = vmul.f32 %v3835_v43, %v3833_v36  ;;  %v1923_v36 = vld [vmem:[%s4591_s8 + $0x38] sm:$0xff] }
 0x692   : > { %v3744_v39 = vpack.c.bf16 %v1923_v36, %v1922_v35  ;;  %v1835_v43 = vld [vmem:[%s4639_s28 + $0x38] sm:$0xff] }
 0x693   : > { %3508 = vmatmul.mubr.msk.f32.vlgmr.msra.gmra.mrb[6].mxu1 %vm909_vm4, %v1398_v44 }
 0x694   : > { %3518 = vmatpush3.xpose.msk.msra.mxu1 %vm832_vm2, %v1552_v46  ;;  %3519 = vmatprep.mubr.msk.f32.mxu1 %vm3904_vm1, %v3903_v0  ;;  %v3732_v46 = vpack.c.bf16 %v1835_v43, %v1834_v42 }
 0x695   : > { %3719 = vmatprep.subr.bf16.mxu1 %v3911_v63 }
 0x697   : > { %3520 = vmatmul.mubr.msk.f32.vlgmr.msra.gmra.mrb[8].mxu1 %vm832_vm2, %v1550_v32 }
 0x698   : > { %3531 = vmatprep.mubr.msk.f32.mxu1 %vm3904_vm1, %v3903_v0 }
 0x766   : > { %v1471_v47 = vpop.f32.mrb[6].mxu1 }
 0x767   : > { %v3509_v48 = vpop.f32.mrb[7].mxu1  ;;  %3515 = vmatmul.mubr.msk.f32.vlgmr.msra.gmra.mrb[10].mxu0 %vm832_vm2, %v1471_v47 }
 0x768   : > { %3524 = vmatprep.mubr.msk.f32.mxu0 %vm3904_vm1, %v3903_v0 }
 0x76a   : > { %v1623_v49 = vpop.f32.mrb[8].mxu1 }
 0x76b   : > { %v1627_v50 = vmul.f32 0.25, %v1623_v49  ;;  %v3521_v51 = vpop.f32.mrb[9].mxu1 }
 0x76d   : > { %v1628_v52 = vadd.f32 %v1627_v50, %v4166_v45  ;;  %v821_v45 = vld [vmem:[%s4637_s23 + $0x38] sm:$0xff]  ;;  %v3330_v50 = vld [vmem:[%s4595_s12] ss:$0 sm:$0xff] }
 0x76e   : > { %v3720_v60 = vpack.c.bf16 %v821_v45, %v820_v59  ;;  %v3332_v59 = vld [vmem:[%s4590_s7] ss:$0 sm:$0xff] }
 0x76f   : > { %v1629_v53 = vsel %vm909_vm4, %v1628_v52, -inf }
 0x770   : > { %1630 = vmax.xlane.f32.xlu1 %v1629_v53  ;;  %3721 = vmatpush3.bf16.msra.mxu1 %v3720_v60 }
 0x771   : > { %3734 = vmatprep.subr.bf16.mxu1 %v3911_v63 }
 0x7fd   : > { %v1631_v54 = vpop.xlane.xlu1 %1630 }
 0x7fe   : > { %v1632_v55 = vsub.f32 %v1628_v52, %v1631_v54  ;;  %v3331_v52 = vld [vmem:[%s4596_s13] ss:$0 sm:$0xff] }
 0x800   : > { %v1633_v56 = vmul.f32 1.442695, %v1632_v55  ;;  %v3334_v55 = vld [vmem:[%s4592_s9] ss:$0 sm:$0xff] }
 0x802   : > { %3836 = vpow2.f32 %v1633_v56 }
 0x80c   : > { %v3837_v57 = vpop.eup %3836 }
 0x80d   : > { %v1635_v58 = vsel %vm909_vm4, %v3837_v57, 0.0 }
 0x80e   : > { %1636 = vadd.xlane.f32.xlu0 %v1635_v58 }
 0x824   : > { %1640 = vrot.lane.b32.xlu0 %v4156_v38, %s4612_s0  ;;  %s4640_s0 = sld [smem:[#allocation6_spill]] }
 0x82a   : > { %s704_s6 = scalar_lea.vmem %s4640_s0, %s4126_s2 }
 0x82b   : > { %v710_v44 = vld [vmem:[%s704_s6] sm:$0x1f] }
 0x83a   : > { %v1544_v61 = vpop.f32.mrb[10].mxu0 }
 0x83b   : > { %v1548_v62 = vadd.f32 %v1544_v61, %v4213_v24  ;;  %v3516_v1 = vpop.f32.mrb[11].mxu0 }
 0x89b   : > { %v1637_v2 = vpop.xlane.xlu0 %1636 }
 0x89c   : > { %3838 = vrcp.f32 %v1637_v2 }
 0x89f   : > { %v1641_v3 = vpop.permute.xlu0 %1640 }
 0x8a0   : > { %3523 = vmatpush3.msra.mxu0 %v1641_v3 }
 0x8a1   : > { %3722 = vmatprep.subr.bf16.mxu0 %v3911_v63 }
 0x8a6   : > { %v3839_v38 = vpop.eup %3838 }
 0x8a7   : > { %v1639_v4 = vmul.f32 %v3839_v38, %v3837_v57 }
 0x8a9   : > { %3525 = vmatmul.mubr.msk.f32.vlgmr.msra.gmra.mrb[12].mxu0 %vm909_vm4, %v1639_v4 }
 0x8aa   : > { %3550 = vmatprep.mubr.msk.f32.mxu0 %vm3904_vm1, %v3903_v0  ;;  %3724 = vmatpush3.bf16.msra.mxu0 %v3723_v27 }
 0x8ab   : > { %3725 = vmatprep.subr.bf16.mxu0 %v3911_v63 }
 0x8ae   : > { %3727 = vmatpush3.bf16.msra.mxu0 %v3726_v34 }
 0x8af   : > { %3728 = vmatprep.subr.bf16.mxu0 %v3911_v63 }
 0x8b2   : > { %3730 = vmatpush3.bf16.msra.mxu0 %v3729_v41 }
 0x8b3   : > { %3731 = vmatprep.subr.bf16.mxu0 %v3911_v63 }
 0x8b6   : > { %3733 = vmatpush3.bf16.msra.mxu0 %v3732_v46 }
 0x8b7   : > { %3572 = vmatprep.subr.mxu0 %v3903_v0 }
 0x97c   : > { %v1712_v5 = vpop.f32.mrb[12].mxu0 }
 0x97d   : > { %v3526_v6 = vpop.f32.mrb[13].mxu0  ;;  %3532 = vmatmul.mubr.msk.f32.vlgmr.msra.gmra.mrb[10].mxu1 %vm832_vm2, %v1712_v5 }
 0x97e   : > { %3569 = vmatprep.mubr.msk.f32.mxu1 %vm3904_vm1, %v3903_v0  ;;  %3736 = vmatpush3.bf16.msra.mxu1 %v3735_v21 }
 0x97f   : > { %3737 = vmatprep.subr.bf16.mxu1 %v3911_v63 }
 0xa50   : > { %v1785_v8 = vpop.f32.mrb[10].mxu1 }
 0xa51   : > { %v1789_v9 = vadd.f32 %v1785_v8, %v1548_v62  ;;  %v3533_v10 = vpop.f32.mrb[11].mxu1 }
 0xa53   : > { %v1796_v11 = vadd.f32 %v3329_v7, %v1789_v9 }
 0xa55   : > { %v1797_v12 = vadd.f32 %v1796_v11, %v4132_v25  ;;  %v1918_v25 = vld [vmem:[%s4591_s8 + $0x10] sm:$0xff] }
 0xa56   : > { %v3738_v24 = vpack.c.bf16 %v1919_v22, %v1918_v25  ;;  %v2006_v22 = vld [vmem:[%s4593_s10 + $0x10] sm:$0xff] }
 0xa57   : > { %v1800_v13 = vsel %vm739_vm0, %v1797_v12, 0.0 }
 0xa58   : > { %1801 = vadd.xlane.f32.xlu1 %v1800_v13  ;;  %3739 = vmatpush3.bf16.msra.mxu1 %v3738_v24  ;;  %v3747_v24 = vpack.c.bf16 %v2007_v23, %v2006_v22  ;;  %v3356_v23 = vld [vmem:[%s4594_s11] ss:$0 sm:$0xff] }
 0xa59   : > { %3740 = vmatprep.subr.bf16.mxu1 %v3911_v63 }
 0xa5c   : > { %3742 = vmatpush3.bf16.msra.mxu1 %v3741_v31  ;;  %v3750_v31 = vpack.c.bf16 %v2005_v29, %v2004_v28 }
 0xa5d   : > { %3743 = vmatprep.subr.bf16.mxu1 %v3911_v63 }
 0xa60   : > { %3745 = vmatpush3.bf16.msra.mxu1 %v3744_v39 }
 0xa61   : > { %3577 = vmatprep.subr.mxu1 %v3903_v0 }
 0xa63   : > { %3570 = vmatmul.mubr.msk.f32.vlgmr.msra.gmra.mrb[12].mxu1 %vm739_vm0, %v710_v44 }
 0xa64   : > { %3579 = vmatprep.mubr.msk.f32.mxu1 %vm3904_vm1, %v3903_v0 }
 0xae5   : > { %v1802_v14 = vpop.xlane.xlu1 %1801 }
 0xae6   : > { %v1804_v15 = vmul.f32 0.015625, %v1802_v14 }
 0xae8   : > { %v1805_v16 = vsub.f32 %v1797_v12, %v1804_v15 }
 0xaea   : > { %v1806_v17 = vmul.f32 %v1805_v16, %v1805_v16 }
 0xaec   : > { %v1807_v18 = vsel %vm739_vm0, %v1806_v17, 0.0 }
 0xaed   : > { %1808 = vadd.xlane.f32.xlu1 %v1807_v18 }
 0xb36   : > { %v2000_v56 = vpop.f32.mrb[12].mxu1 }
 0xb37   : > { %v4347_v57 = vadd.f32 %v3334_v55, %v2000_v56  ;;  %v3571_v58 = vpop.f32.mrb[13].mxu1 }
 0xb38   : > { %v2008_v58 = vld [vmem:[%s4593_s10 + $0x20] sm:$0xff] }
 0xb39   : > { %2182 = vrot.lane.b32.xlu1 %v4347_v57, %s4641_s1 }
 0xb7a   : > { %v1809_v32 = vpop.xlane.xlu1 %1808 }
 0xb7b   : > { %v1810_v47 = vmul.f32 0.015625, %v1809_v32 }
 0xb7d   : > { %v1811_v48 = vadd.f32 1e-05, %v1810_v47 }
 0xb7f   : > { %3840 = vrsqrt.f32 %v1811_v48 }
 0xb89   : > { %v3841_v49 = vpop.eup %3840 }
 0xb8a   : > { %v1813_v51 = vmul.f32 %v3841_v49, %v1805_v16 }
 0xb8c   : > { %v1820_v53 = vmul.f32 %v3330_v50, %v1813_v51 }
 0xb8e   : > { %v4338_v54 = vadd.f32 %v3331_v52, %v1820_v53 }
 0xb90   : > { %3551 = vmatmul.mubr.msk.f32.vlgmr.msra.gmra.mrb[14].mxu0 %vm739_vm0, %v4338_v54 }
 0xb91   : > { %3574 = vmatprep.mubr.msk.f32.mxu0 %vm3904_vm1, %v3903_v0  ;;  %3573 = vmatpush3.xpose.msk.msra.mxu0 %vm832_vm2, %v4347_v57 }
 0xb92   : > { %3582 = vmatprep.subr.mxu0 %v3903_v0 }
 0xbab   : > { %v2183_v62 = vpop.permute.xlu1 %2182 }
 0xc63   : > { %v1912_v45 = vpop.f32.mrb[14].mxu0 }
 0xc64   : > { %v4357_v60 = vadd.f32 %v3332_v59, %v1912_v45  ;;  %v3552_v61 = vpop.f32.mrb[15].mxu0  ;;  %v2009_v59 = vld [vmem:[%s4593_s10 + $0x28] sm:$0xff] }
 0xc65   : > { %v3753_v45 = vpack.c.bf16 %v2009_v59, %v2008_v58  ;;  %v3107_v59 = vld [vmem:[%s4603_s20 + $0x30] sm:$0xff] }
 0xc66   : > { %2180 = vrot.lane.b32.xlu0 %v4357_v60, %s4641_s1  ;;  %3575 = vmatmul.mubr.msk.f32.vlgmr.msra.gmra.mrb[16].mxu0 %vm832_vm2, %v4357_v60 }
 0xc67   : > { %3583 = vmatpush3.xpose.msk.msra.mxu0 %vm832_vm2, %v2183_v62  ;;  %3584 = vmatprep.mubr.msk.f32.mxu0 %vm3904_vm1, %v3903_v0 }
 0xc68   : > { %3746 = vmatprep.subr.bf16.mxu0 %v3911_v63 }
 0xcd8   : > { %v2181_v1 = vpop.permute.xlu0 %2180 }
 0xcd9   : > { %3585 = vmatmul.mubr.msk.f32.vlgmr.msra.gmra.mrb[18].mxu0 %vm832_vm2, %v2181_v1 }
 0xcda   : > { %3596 = vmatprep.mubr.msk.f32.mxu0 %vm3904_vm1, %v3903_v0  ;;  %3748 = vmatpush3.bf16.msra.mxu0 %v3747_v24 }
 0xcdb   : > { %3606 = vmatprep.subr.mxu0 %v3903_v0 }
 0xd39   : > { %v2085_v2 = vpop.f32.mrb[16].mxu0 }
 0xd3a   : > { %v2089_v3 = vmul.f32 0.25, %v2085_v2  ;;  %v3576_v38 = vpop.f32.mrb[17].mxu0 }
 0xd3c   : > { %v2091_v4 = vsel %vm2090_vm5, %v2089_v3, -inf }
 0xd3d   : > { %2092 = vmax.xlane.f32.xlu0 %v2091_v4 }
 0xdac   : > { %v2254_v5 = vpop.f32.mrb[18].mxu0 }
 0xdad   : > { %v2258_v6 = vmul.f32 0.25, %v2254_v5  ;;  %v3586_v7 = vpop.f32.mrb[19].mxu0 }
 0xdaf   : > { %v2259_v8 = vsel %vm2090_vm5, %v2258_v6, -inf }
 0xdb0   : > { %2260 = vmax.xlane.f32.xlu1 %v2259_v8 }
 0xdc1   : > { %2102 = vrot.lane.b32.xlu1 %v4347_v57, %s4642_s29  ;;  %s4645_s29 = smov 32  }
 0xdc5   : > { %2495 = vrot.lane.b32.xlu1 %v4347_v57, %s4643_s25 }
 0xdc9   : > { %2493 = vrot.lane.b32.xlu1 %v4357_v60, %s4643_s25  ;;  %s4646_s25 = smov 80  }
 0xdca   : > { %v2093_v9 = vpop.xlane.xlu0 %2092 }
 0xdcb   : > { %v2094_v10 = vsub.f32 %v2089_v3, %v2093_v9 }
 0xdcd   : > { %v2095_v11 = vmul.f32 1.442695, %v2094_v10 }
 0xdcf   : > { %3842 = vpow2.f32 %v2095_v11 }
 0xdd9   : > { %v3843_v12 = vpop.eup %3842 }
 0xdda   : > { %v2097_v13 = vsel %vm2090_vm5, %v3843_v12, 0.0 }
 0xddb   : > { %2098 = vadd.xlane.f32.xlu0 %v2097_v13  ;;  %v2010_v13 = vld [vmem:[%s4593_s10 + $0x30] sm:$0xff] }
 0xe3d   : > { %v2261_v14 = vpop.xlane.xlu1 %2260 }
 0xe3e   : > { %v2262_v15 = vsub.f32 %v2258_v6, %v2261_v14  ;;  %v2011_v14 = vld [vmem:[%s4593_s10 + $0x38] sm:$0xff] }
 0xe40   : > { %v2263_v16 = vmul.f32 1.442695, %v2262_v15  ;;  %v3756_v15 = vpack.c.bf16 %v2011_v14, %v2010_v13  ;;  %v3358_v13 = vld [vmem:[%s4598_s15] ss:$0 sm:$0xff] }
 0xe41   : > { %v2103_v17 = vpop.permute.xlu1 %2102 }
 0xe42   : > { %3844 = vpow2.f32 %v2263_v16  ;;  %3578 = vmatpush3.msk.msra.mxu1 %vm2107_vm6, %v2103_v17 }
 0xe43   : > { %3587 = vmatprep.subr.mxu1 %v3903_v0 }
 0xe45   : > { %v2496_v36 = vpop.permute.xlu1 %2495 }
 0xe49   : > { %v2494_v40 = vpop.permute.xlu1 %2493 }
 0xe4c   : > { %v3845_v18 = vpop.eup %3844 }
 0xe4d   : > { %v2265_v19 = vsel %vm2090_vm5, %v3845_v18, 0.0 }
 0xe4e   : > { %2266 = vadd.xlane.f32.xlu0 %v2265_v19 }
 0xe64   : > { %2270 = vrot.lane.b32.xlu0 %v4347_v57, %s4644_s5 }
 0xe68   : > { %v2099_v20 = vpop.xlane.xlu0 %2098 }
 0xe69   : > { %3846 = vrcp.f32 %v2099_v20 }
 0xe73   : > { %v3847_v21 = vpop.eup %3846 }
 0xe74   : > { %v2101_v25 = vmul.f32 %v3847_v21, %v3843_v12 }
 0xe76   : > { %3580 = vmatmul.mubr.msk.f32.vlgmr.msra.gmra.mrb[14].mxu1 %vm2090_vm5, %v2101_v25 }
 0xe77   : > { %3589 = vmatprep.mubr.msk.f32.mxu1 %vm3904_vm1, %v3903_v0 }
 0xedb   : > { %v2267_v26 = vpop.xlane.xlu0 %2266 }
 0xedc   : > { %3848 = vrcp.f32 %v2267_v26 }
 0xedf   : > { %v2271_v27 = vpop.permute.xlu0 %2270 }
 0xee0   : > { %3588 = vmatpush3.msk.msra.mxu1 %vm2107_vm6, %v2271_v27 }
 0xee1   : > { %3749 = vmatprep.subr.bf16.mxu1 %v3911_v63 }
 0xee6   : > { %v3849_v30 = vpop.eup %3848 }
 0xee7   : > { %v2269_v33 = vmul.f32 %v3849_v30, %v3845_v18 }
 0xee9   : > { %3590 = vmatmul.mubr.msk.f32.vlgmr.msra.gmra.mrb[16].mxu1 %vm2090_vm5, %v2269_v33 }
 0xeea   : > { %3751 = vmatpush3.bf16.msra.mxu1 %v3750_v31  ;;  %3603 = vmatprep.mubr.msk.f32.mxu1 %vm3904_vm1, %v3903_v0 }
 0xeeb   : > { %3611 = vmatprep.subr.mxu1 %v3903_v0 }
 0xf49   : > { %v2176_v34 = vpop.f32.mrb[14].mxu1 }
 0xf4a   : > { %v3581_v35 = vpop.f32.mrb[15].mxu1  ;;  %3604 = vmatmul.mubr.msk.f32.vlgmr.msra.gmra.mrb[18].mxu1 %vm832_vm2, %v2176_v34 }
 0xf4b   : > { %3613 = vmatprep.mubr.msk.f32.mxu1 %vm3904_vm1, %v3903_v0 }
 0xfbc   : > { %v2343_v37 = vpop.f32.mrb[16].mxu1 }
 0xfbd   : > { %v3591_v39 = vpop.f32.mrb[17].mxu1  ;;  %3597 = vmatmul.mubr.msk.f32.vlgmr.msra.gmra.mrb[20].mxu0 %vm832_vm2, %v2343_v37 }
 0xfbe   : > { %3607 = vmatpush3.xpose.msk.msra.mxu0 %vm832_vm2, %v2496_v36  ;;  %3608 = vmatprep.mubr.msk.f32.mxu0 %vm3904_vm1, %v3903_v0  ;;  %v3012_v36 = vld [vmem:[%s4601_s18] sm:$0xff]  ;;  %v3014_v39 = vld [vmem:[%s4601_s18 + $0x10] sm:$0xff] }
 0xfbf   : > { %3752 = vmatprep.subr.bf16.mxu0 %v3911_v63 }
 0xfc1   : > { %3609 = vmatmul.mubr.msk.f32.vlgmr.msra.gmra.mrb[22].mxu0 %vm832_vm2, %v2494_v40  ;;  %v3015_v40 = vld [vmem:[%s4601_s18 + $0x18] sm:$0xff] }
 0xfc2   : > { %3620 = vmatprep.mubr.msk.f32.mxu0 %vm3904_vm1, %v3903_v0  ;;  %3754 = vmatpush3.bf16.msra.mxu0 %v3753_v45  ;;  %v3108_v45 = vld [vmem:[%s4603_s20 + $0x38] sm:$0xff] }
 0xfc3   : > { %3628 = vmatprep.subr.mxu0 %v3903_v0 }
0x101d   : > { %v2489_v41 = vpop.f32.mrb[18].mxu1 }
0x101e   : > { %v3605_v42 = vpop.f32.mrb[19].mxu1 }
0x101f   : > { %v3016_v42 = vld [vmem:[%s4601_s18 + $0x20] sm:$0xff] }
0x1090   : > { %v2416_v43 = vpop.f32.mrb[20].mxu0 }
0x1091   : > { %v2490_v44 = vadd.f32 %v2489_v41, %v2416_v43  ;;  %v3598_v46 = vpop.f32.mrb[21].mxu0  ;;  %v3762_v41 = vpack.c.bf16 %v3015_v40, %v3014_v39  ;;  %v3017_v43 = vld [vmem:[%s4601_s18 + $0x28] sm:$0xff]  ;;  %v3363_v39 = vld [vmem:[%s4600_s17] ss:$0 sm:$0xff] }
0x1092   : > { %v3018_v46 = vld [vmem:[%s4601_s18 + $0x30] sm:$0xff] }
0x1094   : > { %v2567_v32 = vpop.f32.mrb[22].mxu0 }
0x1095   : > { %v2571_v47 = vmul.f32 0.25, %v2567_v32  ;;  %v3610_v48 = vpop.f32.mrb[23].mxu0  ;;  %v3019_v32 = vld [vmem:[%s4601_s18 + $0x38] sm:$0xff] }
0x1096   : > { %v3101_v48 = vld [vmem:[%s4603_s20] sm:$0xff] }
0x1097   : > { %v2572_v49 = vsel %vm2090_vm5, %v2571_v47, -inf }
0x1098   : > { %2573 = vmax.xlane.f32.xlu0 %v2572_v49  ;;  %v3102_v49 = vld [vmem:[%s4603_s20 + $0x8] sm:$0xff] }
0x10ae   : > { %2583 = vrot.lane.b32.xlu0 %v4347_v57, %s4645_s29 }
0x10b2   : > { %2734 = vrot.lane.b32.xlu0 %v4357_v60, %s4646_s25 }
0x1125   : > { %v2574_v50 = vpop.xlane.xlu0 %2573 }
0x1126   : > { %v2575_v51 = vsub.f32 %v2571_v47, %v2574_v50  ;;  %v3768_v47 = vpack.c.bf16 %v3019_v32, %v3018_v46  ;;  %v3103_v50 = vld [vmem:[%s4603_s20 + $0x10] sm:$0xff] }
0x1128   : > { %v2576_v52 = vmul.f32 1.442695, %v2575_v51  ;;  %v3771_v51 = vpack.c.bf16 %v3102_v49, %v3101_v48 }
0x1129   : > { %v2584_v53 = vpop.permute.xlu0 %2583 }
0x112a   : > { %3850 = vpow2.f32 %v2576_v52  ;;  %3612 = vmatpush3.msk.msra.mxu1 %vm2107_vm6, %v2584_v53  ;;  %v3104_v52 = vld [vmem:[%s4603_s20 + $0x18] sm:$0xff] }
0x112b   : > { %3623 = vmatprep.subr.mxu1 %v3903_v0  ;;  %v3774_v53 = vpack.c.bf16 %v3104_v52, %v3103_v50 }
0x112d   : > { %v2735_v2 = vpop.permute.xlu0 %2734 }
0x1134   : > { %v3851_v55 = vpop.eup %3850 }
0x1135   : > { %v2578_v56 = vsel %vm2090_vm5, %v3851_v55, 0.0 }
0x1136   : > { %2579 = vadd.xlane.f32.xlu1 %v2578_v56  ;;  %v3106_v56 = vld [vmem:[%s4603_s20 + $0x28] sm:$0xff] }
0x1147   : > { %2736 = vrot.lane.b32.xlu1 %v4347_v57, %s4646_s25 }
0x11c3   : > { %v2580_v60 = vpop.xlane.xlu1 %2579 }
0x11c4   : > { %3852 = vrcp.f32 %v2580_v60  ;;  %v3780_v60 = vpack.c.bf16 %v3108_v45, %v3107_v59 }
0x11c7   : > { %v2737_v1 = vpop.permute.xlu1 %2736 }
0x11ce   : > { %v3853_v61 = vpop.eup %3852 }
0x11cf   : > { %v2582_v62 = vmul.f32 %v3853_v61, %v3851_v55  ;;  %v3105_v55 = vld [vmem:[%s4603_s20 + $0x20] sm:$0xff] }
0x11d0   : > { %v3777_v58 = vpack.c.bf16 %v3106_v56, %v3105_v55  ;;  %v3109_v61 = vld [vmem:[%s4603_s20 + $0x40] sm:$0xff] }
0x11d1   : > { %3614 = vmatmul.mubr.msk.f32.vlgmr.msra.gmra.mrb[20].mxu1 %vm2090_vm5, %v2582_v62  ;;  %v3110_v62 = vld [vmem:[%s4603_s20 + $0x48] sm:$0xff] }
0x11d2   : > { %3624 = vmatpush3.xpose.msk.msra.mxu1 %vm832_vm2, %v2737_v1  ;;  %3625 = vmatprep.mubr.msk.f32.mxu1 %vm3904_vm1, %v3903_v0  ;;  %v3783_v1 = vpack.c.bf16 %v3110_v62, %v3109_v61 }
0x11d3   : > { %3755 = vmatprep.subr.bf16.mxu1 %v3911_v63 }
0x11d5   : > { %3626 = vmatmul.mubr.msk.f32.vlgmr.msra.gmra.mrb[22].mxu1 %vm832_vm2, %v2735_v2  ;;  %v3111_v2 = vld [vmem:[%s4603_s20 + $0x50] sm:$0xff] }
0x11d6   : > { %3637 = vmatprep.mubr.msk.f32.mxu1 %vm3904_vm1, %v3903_v0  ;;  %3757 = vmatpush3.bf16.msra.mxu1 %v3756_v15 }
0x11d7   : > { %3770 = vmatprep.subr.bf16.mxu1 %v3911_v63 }
0x12a4   : > { %v2656_v3 = vpop.f32.mrb[20].mxu1 }
0x12a5   : > { %v3615_v38 = vpop.f32.mrb[21].mxu1  ;;  %3621 = vmatmul.mubr.msk.f32.vlgmr.msra.gmra.mrb[24].mxu0 %vm832_vm2, %v2656_v3  ;;  %v3112_v3 = vld [vmem:[%s4603_s20 + $0x58] sm:$0xff] }
0x12a6   : > { %3630 = vmatprep.mubr.msk.f32.mxu0 %vm3904_vm1, %v3903_v0  ;;  %v3786_v38 = vpack.c.bf16 %v3112_v3, %v3111_v2 }
0x12a8   : > { %v2808_v4 = vpop.f32.mrb[22].mxu1 }
0x12a9   : > { %v2812_v5 = vmul.f32 0.25, %v2808_v4  ;;  %v3627_v6 = vpop.f32.mrb[23].mxu1  ;;  %v3113_v4 = vld [vmem:[%s4603_s20 + $0x60] sm:$0xff] }
0x12ab   : > { %v2813_v7 = vsel %vm2090_vm5, %v2812_v5, -inf }
0x12ac   : > { %2814 = vmax.xlane.f32.xlu1 %v2813_v7 }
0x1339   : > { %v2815_v8 = vpop.xlane.xlu1 %2814 }
0x133a   : > { %v2816_v9 = vsub.f32 %v2812_v5, %v2815_v8  ;;  %v3114_v5 = vld [vmem:[%s4603_s20 + $0x68] sm:$0xff] }
0x133b   : > { %v3789_v6 = vpack.c.bf16 %v3114_v5, %v3113_v4 }
0x133c   : > { %v2817_v10 = vmul.f32 1.442695, %v2816_v9 }
0x133e   : > { %3854 = vpow2.f32 %v2817_v10 }
0x1348   : > { %v3855_v11 = vpop.eup %3854 }
0x1349   : > { %v2819_v12 = vsel %vm2090_vm5, %v3855_v11, 0.0 }
0x134a   : > { %2820 = vadd.xlane.f32.xlu0 %v2819_v12 }
0x1360   : > { %2824 = vrot.lane.b32.xlu0 %v4347_v57, %s4647_s27 }
0x1378   : > { %v2729_v16 = vpop.f32.mrb[24].mxu0 }
0x1379   : > { %v2733_v17 = vadd.f32 %v2729_v16, %v2490_v44  ;;  %v3622_v18 = vpop.f32.mrb[25].mxu0  ;;  %v3765_v44 = vpack.c.bf16 %v3017_v43, %v3016_v42  ;;  %v3116_v16 = vld [vmem:[%s4603_s20 + $0x78] sm:$0xff] }
0x137a   : > { %v3359_v18 = vld [vmem:[%s4602_s19] ss:$0 sm:$0xff] }
0x13d7   : > { %v2821_v19 = vpop.xlane.xlu0 %2820 }
0x13d8   : > { %3856 = vrcp.f32 %v2821_v19 }
0x13db   : > { %v2825_v20 = vpop.permute.xlu0 %2824 }
0x13dc   : > { %3629 = vmatpush3.msk.msra.mxu0 %vm2107_vm6, %v2825_v20 }
0x13dd   : > { %3758 = vmatprep.subr.bf16.mxu0 %v3911_v63 }
0x13e2   : > { %v3857_v57 = vpop.eup %3856 }
0x13e3   : > { %v2823_v21 = vmul.f32 %v3857_v57, %v3855_v11  ;;  %v3357_v11 = vld [vmem:[%s4597_s14] ss:$0 sm:$0xff] }
0x13e5   : > { %3631 = vmatmul.mubr.msk.f32.vlgmr.msra.gmra.mrb[26].mxu0 %vm2090_vm5, %v2823_v21 }
0x13e6   : > { %3656 = vmatprep.mubr.msk.f32.mxu0 %vm3904_vm1, %v3903_v0 }
0x14b8   : > { %v2897_v25 = vpop.f32.mrb[26].mxu0 }
0x14b9   : > { %v3632_v22 = vpop.f32.mrb[27].mxu0  ;;  %3638 = vmatmul.mubr.msk.f32.vlgmr.msra.gmra.mrb[24].mxu1 %vm832_vm2, %v2897_v25  ;;  %v3361_v25 = vld [vmem:[#allocation2] ss:$0 sm:$0xff] }
0x14ba   : > { %3691 = vmatprep.mubr.msk.f32.mxu1 %vm3904_vm1, %v3903_v0  ;;  %3772 = vmatpush3.bf16.msra.mxu1 %v3771_v51 }
0x14bb   : > { %3773 = vmatprep.subr.bf16.mxu1 %v3911_v63 }
0x14be   : > { %3775 = vmatpush3.bf16.msra.mxu1 %v3774_v53 }
0x14bf   : > { %3776 = vmatprep.subr.bf16.mxu1 %v3911_v63 }
0x14c2   : > { %3778 = vmatpush3.bf16.msra.mxu1 %v3777_v58 }
0x14c3   : > { %3779 = vmatprep.subr.bf16.mxu1 %v3911_v63 }
0x14c6   : > { %3781 = vmatpush3.bf16.msra.mxu1 %v3780_v60 }
0x14c7   : > { %3782 = vmatprep.subr.bf16.mxu1 %v3911_v63 }
0x14ca   : > { %3784 = vmatpush3.bf16.msra.mxu1 %v3783_v1 }
0x14cb   : > { %3785 = vmatprep.subr.bf16.mxu1 %v3911_v63 }
0x14ce   : > { %3787 = vmatpush3.bf16.msra.mxu1 %v3786_v38 }
0x14cf   : > { %3788 = vmatprep.subr.bf16.mxu1 %v3911_v63 }
0x14d2   : > { %3790 = vmatpush3.bf16.msra.mxu1 %v3789_v6 }
0x14d3   : > { %3791 = vmatprep.subr.bf16.mxu1 %v3911_v63 }
0x158c   : > { %v2970_v24 = vpop.f32.mrb[24].mxu1 }
0x158d   : > { %v2974_v26 = vadd.f32 %v2970_v24, %v2733_v17  ;;  %v3639_v27 = vpop.f32.mrb[25].mxu1 }
0x158f   : > { %v2981_v28 = vadd.f32 %v3356_v23, %v2974_v26 }
0x1591   : > { %v2982_v29 = vadd.f32 %v2981_v28, %v4338_v54  ;;  %v3013_v54 = vld [vmem:[%s4601_s18 + $0x8] sm:$0xff] }
0x1592   : > { %v3759_v37 = vpack.c.bf16 %v3013_v54, %v3012_v36  ;;  %v3362_v54 = vld [vmem:[%s4599_s16] ss:$0 sm:$0xff] }
0x1593   : > { %v2985_v30 = vsel %vm739_vm0, %v2982_v29, 0.0 }
0x1594   : > { %2986 = vadd.xlane.f32.xlu1 %v2985_v30  ;;  %3760 = vmatpush3.bf16.msra.mxu0 %v3759_v37 }
0x1595   : > { %3761 = vmatprep.subr.bf16.mxu0 %v3911_v63 }
0x1598   : > { %3763 = vmatpush3.bf16.msra.mxu0 %v3762_v41 }
0x1599   : > { %3764 = vmatprep.subr.bf16.mxu0 %v3911_v63 }
0x159c   : > { %3766 = vmatpush3.bf16.msra.mxu0 %v3765_v44 }
0x159d   : > { %3767 = vmatprep.subr.bf16.mxu0 %v3911_v63  ;;  %v3115_v63 = vld [vmem:[%s4603_s20 + $0x70] sm:$0xff] }
0x159e   : > { %v3792_v17 = vpack.c.bf16 %v3116_v16, %v3115_v63 }
0x15a0   : > { %3769 = vmatpush3.bf16.msra.mxu0 %v3768_v47  ;;  %3793 = vmatpush3.bf16.msra.mxu1 %v3792_v17 }
0x1621   : > { %v2987_v31 = vpop.xlane.xlu1 %2986 }
0x1622   : > { %v2988_v33 = vmul.f32 0.015625, %v2987_v31 }
0x1624   : > { %v4469_v34 = vsub.f32 %v2982_v29, %v2988_v33 }
0x1626   : > { %v2990_v0 = vmul.f32 %v4469_v34, %v4469_v34 }
0x1628   : > { %v2991_v35 = vsel %vm739_vm0, %v2990_v0, 0.0 }
0x1629   : > { %2992 = vadd.xlane.f32.xlu1 %v2991_v35 }
0x16b6   : > { %v2993_v7 = vpop.xlane.xlu1 %2992 }
0x16b7   : > { %v2994_v8 = vmul.f32 0.015625, %v2993_v7 }
0x16b9   : > { %v2995_v9 = vadd.f32 1e-05, %v2994_v8 }
0x16bb   : > { %3858 = vrsqrt.f32 %v2995_v9 }
0x16c5   : > { %v3859_v10 = vpop.eup %3858 }
0x16c6   : > { %v2997_v12 = vmul.f32 %v3859_v10, %v4469_v34 }
0x16c8   : > { %v3004_v14 = vmul.f32 %v3357_v11, %v2997_v12 }
0x16ca   : > { %v3011_v15 = vadd.f32 %v3358_v13, %v3004_v14 }
0x16cc   : > { %3657 = vmatmul.mubr.msk.f32.vlgmr.msra.gmra.mrb[28].mxu0 %vm739_vm0, %v3011_v15 }
0x179f   : > { %v3096_v19 = vpop.f32.mrb[28].mxu0 }
0x17a0   : > { %v3097_v20 = vadd.f32 %v3359_v18, %v3096_v19  ;;  %v3658_v57 = vpop.f32.mrb[29].mxu0 }
0x17a2   : > { %v3100_v21 = vmax.f32 %v3097_v20, 0.0 }
0x17a4   : > { %3692 = vmatmul.mubr.f32.vlgmr.msra.gmra.mrb[26].mxu1 %v3100_v21 }
0x1877   : > { %v3190_v22 = vpop.f32.mrb[26].mxu1 }
0x1878   : > { %v3191_v23 = vadd.f32 %v3361_v25, %v3190_v22  ;;  %v3693_v24 = vpop.f32.mrb[27].mxu1 }
0x187a   : > { %v3194_v26 = vadd.f32 %v3191_v23, %v3011_v15 }
0x187c   : > { %v3197_v27 = vsel %vm739_vm0, %v3194_v26, 0.0 }
0x187d   : > { %3198 = vadd.xlane.f32.xlu1 %v3197_v27 }
0x190a   : > { %v3199_v28 = vpop.xlane.xlu1 %3198 }
0x190b   : > { %v3200_v29 = vmul.f32 0.015625, %v3199_v28 }
0x190d   : > { %v3201_v30 = vsub.f32 %v3194_v26, %v3200_v29 }
0x190f   : > { %v3202_v31 = vmul.f32 %v3201_v30, %v3201_v30 }
0x1911   : > { %v3203_v33 = vsel %vm739_vm0, %v3202_v31, 0.0 }
0x1912   : > { %3204 = vadd.xlane.f32.xlu1 %v3203_v33 }
0x199f   : > { %v3205_v34 = vpop.xlane.xlu1 %3204 }
0x19a0   : > { %v3206_v0 = vmul.f32 0.015625, %v3205_v34 }
0x19a2   : > { %v3207_v35 = vadd.f32 1e-05, %v3206_v0 }
0x19a4   : > { %3860 = vrsqrt.f32 %v3207_v35 }
0x19ae   : > { %v3861_v36 = vpop.eup %3860 }
0x19af   : > { %v3209_v37 = vmul.f32 %v3861_v36, %v3201_v30 }
0x19b1   : > { %v3216_v40 = vmul.f32 %v3362_v54, %v3209_v37 }
0x19b3   : > { %v3223_v41 = vadd.f32 %v3363_v39, %v3216_v40 }
0x19b5   : > { %3224 = vst.msk [vmem:[%s708_s30] sm:$0xff] %vm739_vm0, %v3223_v41 }
0x19b6 PF: > { %s33_s3 = sadd.s32 1, %s3900_s3  }
0x19b7   : > { %p30_p3 = scmp.ge.s32.totalorder %s33_s3, 4  }
0x19b9   :  { %32 = sbr.rel (!%p30_p3) target bundleno = 9 (0x9), region = 146 }
0x19c0   :  { %3244 = vsyncpa [#allocation3], 1 }
0x19c1   :  { %3246 = vsyncpa [#allocation3 + $0x1], 1 }

</bundles_post_ra>
